<compile_context>
chip_gen: v5e
topology: v5e:2x2
jax: 0.10.0
libtpu: 0.0.40
codegen_flags: <defaults>
</compile_context>

<pallas_src>
import functools

import numpy as np
import jax
import jax.numpy as jnp
from jax.experimental import pallas as pl
from jax.experimental.pallas import tpu as pltpu


DT = jnp.bfloat16  # storage / MXU dtype; elementwise math is f32 in-kernel
                   # (v5e has no bf16 VPU/EUP, so f32 compute + bf16 storage).


def _vmem_limit_bytes():
    # Explicit per-generation scoped-VMEM budget: half of physical capacity
    # (64 MiB on v5e/v6e, 32 MiB on v7x).  Falls back to a safe 32 MiB.
    try:
        return int(pltpu.get_tpu_info().vmem_capacity_bytes // 2)
    except Exception:
        return 32 * 1024 * 1024


VMEM_LIMIT = _vmem_limit_bytes()


def _gelu(x):
    # TODO(synk): PyTorch nn.GELU defaults to the exact erf form; tanh approx
    # is used in-kernel (matches to ~1e-3).
    c = 0.7978845608028654  # sqrt(2/pi)
    return 0.5 * x * (1.0 + jnp.tanh(c * (x + 0.044715 * x * x * x)))


def dynamic_tanh(p, x):
    # DynamicTanh: weight * tanh(alpha * x) + bias  (standalone only for the
    # final norm; everywhere else it is fused into the matmul kernels).
    return jnp.tanh(p["alpha"] * x) * p["weight"] + p["bias"]


# ----------------------------------------------------------------------------
# Fused MLP kernel: fc1 -> GELU -> DynamicTanh -> fc2, tiled over rows.
# ----------------------------------------------------------------------------
def _mlp_kernel(x_ref, w1_ref, b1_ref, alpha_ref, nw_ref, nb_ref,
                w2_ref, b2_ref, o_ref):
    h = jnp.dot(x_ref[...], w1_ref[...], preferred_element_type=jnp.float32)
    h = _gelu(h + b1_ref[...])
    h = jnp.tanh(alpha_ref[...] * h) * nw_ref[...] + nb_ref[...]
    y = jnp.dot(h.astype(w2_ref.dtype), w2_ref[...],
                preferred_element_type=jnp.float32)
    o_ref[...] = (y + b2_ref[...]).astype(o_ref.dtype)


def mlp_fused(p, x, out_dtype=DT):
    shape = x.shape
    cin = shape[-1]
    m = int(np.prod(shape[:-1]))
    hid = p["fc1"]["w"].shape[1]
    cout = p["fc2"]["w"].shape[1]
    x2 = x.reshape(m, cin).astype(DT)
    tm = m if m <= 1024 else 1024           # big row tiles amortize step overhead
    f32 = jnp.float32
    c2 = lambda i: (0, 0)
    out = pl.pallas_call(
        _mlp_kernel,
        out_shape=jax.ShapeDtypeStruct((m, cout), out_dtype),
        grid=(pl.cdiv(m, tm),),
        in_specs=[
            pl.BlockSpec((tm, cin), lambda i: (i, 0)),
            pl.BlockSpec((cin, hid), c2),
            pl.BlockSpec((1, hid), c2),
            pl.BlockSpec((1, 1), c2),
            pl.BlockSpec((1, hid), c2),
            pl.BlockSpec((1, hid), c2),
            pl.BlockSpec((hid, cout), c2),
            pl.BlockSpec((1, cout), c2),
        ],
        out_specs=pl.BlockSpec((tm, cout), lambda i: (i, 0)),
        compiler_params=pltpu.CompilerParams(
            dimension_semantics=("parallel",), vmem_limit_bytes=VMEM_LIMIT),
    )(
        x2,
        p["fc1"]["w"].astype(DT),
        p["fc1"]["b"].reshape(1, hid).astype(f32),
        p["norm"]["alpha"].reshape(1, 1).astype(f32),
        p["norm"]["weight"].reshape(1, hid).astype(f32),
        p["norm"]["bias"].reshape(1, hid).astype(f32),
        p["fc2"]["w"].astype(DT),
        p["fc2"]["b"].reshape(1, cout).astype(f32),
    )
    return out.reshape(shape[:-1] + (cout,))


# ----------------------------------------------------------------------------
# Fused edge-MLP + mean-over-K kernel for LocalEmbeddingBlock:
# fc1 -> GELU -> DynamicTanh -> mean over K (indicator matmul) -> fc2.
# fc2 is affine so it commutes with the equal-weight mean.
# ----------------------------------------------------------------------------
def _edge_mlp_mean_kernel(e_ref, w1_ref, b1_ref, alpha_ref, nw_ref, nb_ref,
                          w2_ref, b2_ref, o_ref, *, k, tq):
    f32 = jnp.float32
    h = jnp.dot(e_ref[...], w1_ref[...], preferred_element_type=f32) + b1_ref[...]
    h = _gelu(h)
    h = jnp.tanh(alpha_ref[...] * h) * nw_ref[...] + nb_ref[...]      # (tq*k, hid)
    col = jax.lax.broadcasted_iota(jnp.int32, (tq, tq * k), 1)
    row = jax.lax.broadcasted_iota(jnp.int32, (tq, tq * k), 0)
    off = col - row * k
    grp = jnp.logical_and(off >= 0, off < k).astype(f32)              # (tq, tq*k)
    hmean = jnp.dot(grp, h, preferred_element_type=f32) * (1.0 / k)   # (tq, hid)
    y = jnp.dot(hmean.astype(w2_ref.dtype), w2_ref[...],
                preferred_element_type=f32)
    o_ref[...] = (y + b2_ref[...]).astype(o_ref.dtype)


def edge_mlp_mean_fused(p, edge, out_dtype=jnp.float32):
    M, k, cin = edge.shape
    hid = p["fc1"]["w"].shape[1]
    cout = p["fc2"]["w"].shape[1]
    f32 = jnp.float32
    tq = M if M <= 64 else 64                   # tq multiple of 8 (or full M)
    e2 = edge.reshape(M * k, cin).astype(DT)
    c2 = lambda i: (0, 0)
    return pl.pallas_call(
        functools.partial(_edge_mlp_mean_kernel, k=k, tq=tq),
        out_shape=jax.ShapeDtypeStruct((M, cout), out_dtype),
        grid=(pl.cdiv(M, tq),),
        in_specs=[
            pl.BlockSpec((tq * k, cin), lambda i: (i, 0)),
            pl.BlockSpec((cin, hid), c2),
            pl.BlockSpec((1, hid), c2),
            pl.BlockSpec((1, 1), c2),
            pl.BlockSpec((1, hid), c2),
            pl.BlockSpec((1, hid), c2),
            pl.BlockSpec((hid, cout), c2),
            pl.BlockSpec((1, cout), c2),
        ],
        out_specs=pl.BlockSpec((tq, cout), lambda i: (i, 0)),
        compiler_params=pltpu.CompilerParams(
            dimension_semantics=("parallel",), vmem_limit_bytes=VMEM_LIMIT),
    )(
        e2,
        p["fc1"]["w"].astype(DT),
        p["fc1"]["b"].reshape(1, hid).astype(f32),
        p["norm"]["alpha"].reshape(1, 1).astype(f32),
        p["norm"]["weight"].reshape(1, hid).astype(f32),
        p["norm"]["bias"].reshape(1, hid).astype(f32),
        p["fc2"]["w"].astype(DT),
        p["fc2"]["b"].reshape(1, cout).astype(f32),
    )


# ----------------------------------------------------------------------------
# Fused InteractionBlock kernel: pairwise physics features + pair mask are
# computed in-kernel; mlp1 (contraction 4) runs on the VPU; x_int is written
# head-major (lane-dense last dim = N); masked mean + global projection fused.
# ----------------------------------------------------------------------------
def _interaction_kernel(xq_ref, xat_ref, mq_ref, mat_ref,
                        alpha_ref, w1_ref, b1_ref, nw_ref, nb_ref,
                        w2t_ref, b2_ref, wg_ref, bg_ref,
                        oint_ref, oglob_ref, *, heads, cut):
    f32 = jnp.float32
    eps = 1e-6
    xq = xq_ref[0]                                  # (ti, C)  query particles
    xa = xat_ref[0]                                 # (C, N)   all particles (T)
    mq = mq_ref[0]                                  # (ti, 1)
    ma = mat_ref[0]                                 # (1, N)

    eta_i = xq[:, 0:1]; phi_i = xq[:, 1:2]; pt_i = jnp.exp(xq[:, 2:3])   # (ti,1)
    eta_j = xa[0:1, :]; phi_j = xa[1:2, :]; pt_j = jnp.exp(xa[2:3, :])   # (1,N)

    d_eta = eta_i - eta_j
    d_phi = phi_i - phi_j
    dr2 = d_eta * d_eta + d_phi * d_phi
    pt_min = jnp.minimum(pt_i, pt_j)
    kt = pt_min * jnp.sqrt(dr2 + eps)
    z = pt_min / (pt_i + pt_j + eps)
    f0 = jnp.log(dr2 + eps)
    f1 = jnp.log(kt + eps)
    f2 = jnp.log(z + eps)
    f3 = d_eta * d_phi
    pm = mq * ma * (dr2 < cut * cut).astype(f32)                         # (ti,N)

    # mlp1 (input dim 4) as broadcast multiply-adds -> (ti, N, hid) stays in VMEM
    h = (f0[:, :, None] * w1_ref[0:1, :] + f1[:, :, None] * w1_ref[1:2, :] +
         f2[:, :, None] * w1_ref[2:3, :] + f3[:, :, None] * w1_ref[3:4, :] +
         b1_ref[...])
    h = _gelu(h)
    h = jnp.tanh(alpha_ref[...] * h) * nw_ref[...] + nb_ref[...]

    # x_int emitted head-major: per head a lane reduction over hid -> (ti, N)
    for hh in range(heads):
        xi = jnp.sum(h * w2t_ref[hh:hh + 1, :], axis=-1)
        xi = (xi + b2_ref[0:1, hh:hh + 1]) * pm
        oint_ref[0, hh] = xi.astype(oint_ref.dtype)

    # Masked mean over neighbours -> global projection (exact divide)
    hm = h * pm[:, :, None]
    hsum = jnp.sum(hm, axis=1)                                           # (ti,hid)
    denom = jnp.maximum(jnp.sum(pm, axis=-1, keepdims=True), 1.0)        # (ti,1)
    hmean = hsum / denom
    g = jnp.dot(hmean.astype(wg_ref.dtype), wg_ref[...],
                preferred_element_type=f32) + bg_ref[...]
    oglob_ref[0] = (g * mq).astype(oglob_ref.dtype)


def interaction_fused(p, x, mask_f, cut, heads):
    B, N, C = x.shape
    hid = p["int_mlp1"]["w"].shape[1]
    f32 = jnp.float32
    ti = N if N <= 32 else 32                       # bigger row tile than before
    x_t = jnp.transpose(x, (0, 2, 1)).astype(f32)           # (B, C, N)
    m_t = jnp.transpose(mask_f, (0, 2, 1)).astype(f32)      # (B, 1, N)
    c2 = lambda b, i: (0, 0)
    x_int, x_glob = pl.pallas_call(
        functools.partial(_interaction_kernel, heads=heads, cut=float(cut)),
        out_shape=(jax.ShapeDtypeStruct((B, heads, N, N), DT),
                   jax.ShapeDtypeStruct((B, N, hid), DT)),
        grid=(B, pl.cdiv(N, ti)),
        in_specs=[
            pl.BlockSpec((1, ti, C), lambda b, i: (b, i, 0)),
            pl.BlockSpec((1, C, N), lambda b, i: (b, 0, 0)),
            pl.BlockSpec((1, ti, 1), lambda b, i: (b, i, 0)),
            pl.BlockSpec((1, 1, N), lambda b, i: (b, 0, 0)),
            pl.BlockSpec((1, 1), c2),
            pl.BlockSpec((4, hid), c2),
            pl.BlockSpec((1, hid), c2),
            pl.BlockSpec((1, hid), c2),
            pl.BlockSpec((1, hid), c2),
            pl.BlockSpec((heads, hid), c2),
            pl.BlockSpec((1, heads), c2),
            pl.BlockSpec((hid, hid), c2),
            pl.BlockSpec((1, hid), c2),
        ],
        out_specs=(
            pl.BlockSpec((1, heads, ti, N), lambda b, i: (b, 0, i, 0)),
            pl.BlockSpec((1, ti, hid), lambda b, i: (b, i, 0)),
        ),
        compiler_params=pltpu.CompilerParams(
            dimension_semantics=("parallel", "parallel"),
            vmem_limit_bytes=VMEM_LIMIT),
    )(
        x.astype(f32), x_t, mask_f.astype(f32), m_t,
        p["int_norm"]["alpha"].reshape(1, 1).astype(f32),
        p["int_mlp1"]["w"].astype(f32),
        p["int_mlp1"]["b"].reshape(1, hid).astype(f32),
        p["int_norm"]["weight"].reshape(1, hid).astype(f32),
        p["int_norm"]["bias"].reshape(1, hid).astype(f32),
        jnp.transpose(p["int_mlp2"]["w"], (1, 0)).astype(f32),   # (heads, hid)
        p["int_mlp2"]["b"].reshape(1, heads).astype(f32),
        p["int_glob"]["w"].astype(DT),
        p["int_glob"]["b"].reshape(1, hid).astype(f32),
    )
    return x_int, x_glob


# ----------------------------------------------------------------------------
# Fused transformer block kernel: norm1 -> fused qkv -> masked/biased MHA ->
# single out-proj -> norm2 -> MLP -> LayerScale -> residual, one batch element
# per grid step.
# ----------------------------------------------------------------------------
def _att_block_kernel(x_ref, kadd_ref, bias_ref, a1_ref, a2_ref, a3_ref,
                      n1w_ref, n1b_ref, wqkv_ref, bqkv_ref, wproj_ref, bproj_ref,
                      n2w_ref, n2b_ref, wf1_ref, bf1_ref, nmw_ref, nmb_ref,
                      wf2_ref, bf2_ref, gamma_ref, o_ref, *, heads):
    f32 = jnp.float32
    x = x_ref[0].astype(f32)                       # (S, D)
    kadd = kadd_ref[0]                             # (1, S) additive key mask
    S, D = x.shape
    dh = D // heads

    # pre-norm (DynamicTanh) + one lane-dense fused QKV matmul (q pre-scaled)
    hn = (jnp.tanh(a1_ref[...] * x) * n1w_ref[...] + n1b_ref[...]).astype(
        wqkv_ref.dtype)
    qkv = jnp.dot(hn, wqkv_ref[...], preferred_element_type=f32) + bqkv_ref[...]

    ctx = []
    for hh in range(heads):                        # heads is small (static loop)
        qh = qkv[:, hh * dh:(hh + 1) * dh]
        kh = qkv[:, D + hh * dh:D + (hh + 1) * dh]
        vh = qkv[:, 2 * D + hh * dh:2 * D + (hh + 1) * dh]
        s = jax.lax.dot_general(qh.astype(DT), kh.astype(DT),
                                (((1,), (1,)), ((), ())),
                                preferred_element_type=f32)
        s = s + bias_ref[0, hh].astype(f32) + kadd         # interaction bias + mask
        s = s - jnp.max(s, axis=-1, keepdims=True)
        p = jnp.exp(s)
        p = p * pl.reciprocal(jnp.sum(p, axis=-1, keepdims=True), approx=True)
        ctx.append(jnp.dot(p.astype(DT), vh.astype(DT),
                           preferred_element_type=f32))
    ctx = jnp.concatenate(ctx, axis=-1)            # (S, D)

    # single lane-dense output projection
    a = jnp.dot(ctx.astype(wproj_ref.dtype), wproj_ref[...],
                preferred_element_type=f32) + bproj_ref[...]

    # MLP branch on the attention residual (fc1 -> GELU -> DynamicTanh -> fc2)
    xm = x + a
    h2 = (jnp.tanh(a2_ref[...] * xm) * n2w_ref[...] + n2b_ref[...]).astype(
        wf1_ref.dtype)
    g = jnp.dot(h2, wf1_ref[...], preferred_element_type=f32)
    g = _gelu(g + bf1_ref[...])
    g = (jnp.tanh(a3_ref[...] * g) * nmw_ref[...] + nmb_ref[...]).astype(
        wf2_ref.dtype)
    mm = jnp.dot(g, wf2_ref[...], preferred_element_type=f32) + bf2_ref[...]

    # LayerScale + outer residual fused as the epilogue
    o_ref[0] = (x + gamma_ref[...] * (a + mm)).astype(o_ref.dtype)


def att_block_fused(bp, gamma, x_seq, kadd, bias, heads):
    B, S, D = x_seq.shape
    dh = D // heads
    rd = bp["mlp"]["fc1"]["w"].shape[1]
    scale = 1.0 / float(np.sqrt(dh))
    f32 = jnp.float32
    # Fold 1/sqrt(dh) into the Q columns of the fused qkv weight/bias.
    qscale = jnp.concatenate(
        [jnp.full((D,), scale, f32), jnp.ones((2 * D,), f32)])
    wqkv = (bp["qkv"]["w"].astype(f32) * qscale[None, :]).astype(DT)
    bqkv = (bp["qkv"]["b"].astype(f32) * qscale).reshape(1, 3 * D)
    c2 = lambda b: (0, 0)
    # TODO(synk): for production S (N >~ 512) tile the key axis flash-style so
    # the per-step (H,S,S) bias/score blocks fit v7x's smaller VMEM; also add a
    # second parallel grid axis so both v7x TensorCores stay busy at small B.
    return pl.pallas_call(
        functools.partial(_att_block_kernel, heads=heads),
        out_shape=jax.ShapeDtypeStruct((B, S, D), DT),
        grid=(B,),
        in_specs=[
            pl.BlockSpec((1, S, D), lambda b: (b, 0, 0)),            # x
            pl.BlockSpec((1, 1, S), lambda b: (b, 0, 0)),            # additive mask
            pl.BlockSpec((1, heads, S, S), lambda b: (b, 0, 0, 0)),  # bias (bf16)
            pl.BlockSpec((1, 1), c2), pl.BlockSpec((1, 1), c2), pl.BlockSpec((1, 1), c2),
            pl.BlockSpec((1, D), c2), pl.BlockSpec((1, D), c2),      # norm1 w,b
            pl.BlockSpec((D, 3 * D), c2), pl.BlockSpec((1, 3 * D), c2),
            pl.BlockSpec((D, D), c2), pl.BlockSpec((1, D), c2),      # proj w,b
            pl.BlockSpec((1, D), c2), pl.BlockSpec((1, D), c2),      # norm2 w,b
            pl.BlockSpec((D, rd), c2), pl.BlockSpec((1, rd), c2),    # fc1
            pl.BlockSpec((1, rd), c2), pl.BlockSpec((1, rd), c2),    # mlp norm
            pl.BlockSpec((rd, D), c2), pl.BlockSpec((1, D), c2),     # fc2
            pl.BlockSpec((1, D), c2),                                # gamma
        ],
        out_specs=pl.BlockSpec((1, S, D), lambda b: (b, 0, 0)),
        compiler_params=pltpu.CompilerParams(
            dimension_semantics=("parallel",), vmem_limit_bytes=VMEM_LIMIT),
    )(
        x_seq.astype(DT), kadd, bias,
        bp["norm1"]["alpha"].reshape(1, 1).astype(f32),
        bp["norm2"]["alpha"].reshape(1, 1).astype(f32),
        bp["mlp"]["norm"]["alpha"].reshape(1, 1).astype(f32),
        bp["norm1"]["weight"].reshape(1, D).astype(f32),
        bp["norm1"]["bias"].reshape(1, D).astype(f32),
        wqkv, bqkv,
        bp["proj"]["w"].astype(DT),
        bp["proj"]["b"].reshape(1, D).astype(f32),
        bp["norm2"]["weight"].reshape(1, D).astype(f32),
        bp["norm2"]["bias"].reshape(1, D).astype(f32),
        bp["mlp"]["fc1"]["w"].astype(DT),
        bp["mlp"]["fc1"]["b"].reshape(1, rd).astype(f32),
        bp["mlp"]["norm"]["weight"].reshape(1, rd).astype(f32),
        bp["mlp"]["norm"]["bias"].reshape(1, rd).astype(f32),
        bp["mlp"]["fc2"]["w"].astype(DT),
        bp["mlp"]["fc2"]["b"].reshape(1, D).astype(f32),
        gamma.reshape(1, D).astype(f32),
    )


# ----------------------------------------------------------------------------
# LocalEmbeddingBlock (EdgeConv-style reconstruction); KNN + gather stay in
# JAX, the edge MLP + mean-over-K runs in the fused Pallas kernel.
# ----------------------------------------------------------------------------
def local_embedding(p, points, feats, mask_f, K):
    # TODO(synk): the reference EdgeConv may exclude the self-neighbour; top_k
    # over -dist2 here includes it (distance 0), as in the previous version.
    B, N, _ = feats.shape
    d = points[:, :, None, :] - points[:, None, :, :]
    dist2 = jnp.sum(d * d, axis=-1)
    _, idx = jax.lax.top_k(-dist2, K)
    gather = jax.vmap(lambda f, i: f[i])
    fj = gather(feats, idx)
    pj = gather(points, idx)
    fi = feats[:, :, None, :]
    pi = points[:, :, None, :]
    eps = 1e-6
    d_eta = pi[..., 0] - pj[..., 0]
    d_phi = pi[..., 1] - pj[..., 1]
    dr2 = d_eta * d_eta + d_phi * d_phi
    pt_i = jnp.exp(fi[..., 2])
    pt_j = jnp.exp(fj[..., 2])
    kt = jnp.minimum(pt_i, pt_j) * jnp.sqrt(dr2 + eps)
    z = jnp.minimum(pt_i, pt_j) / (pt_i + pt_j + eps)
    phys = jnp.stack(
        [jnp.log(dr2 + eps), jnp.log(kt + eps), jnp.log(z + eps), d_eta * d_phi],
        axis=-1)
    edge = jnp.concatenate([jnp.broadcast_to(fi, fj.shape), fj - fi, phys], axis=-1)
    h = edge_mlp_mean_fused(p, edge.reshape(B * N, K, edge.shape[-1]))
    return h.reshape(B, N, -1) * mask_f


# ----------------------------------------------------------------------------
# PET_body parameters + forward
# ----------------------------------------------------------------------------
def init_params(key, input_dim, hidden, heads, mlp_ratio, num_tokens, num_transformers):
    keys = iter(jax.random.split(key, 64))

    def lin(i, o):
        return {"w": 0.02 * jax.random.normal(next(keys), (i, o), jnp.float32),
                "b": jnp.zeros((o,), jnp.float32)}  # _init_weights: biases = 0

    def dyt(d):
        return {"alpha": jnp.float32(1.0),
                "weight": jnp.ones((d,), jnp.float32),
                "bias": jnp.zeros((d,), jnp.float32)}

    def mlp_p(i, h, o):
        return {"fc1": lin(i, h), "norm": dyt(h), "fc2": lin(h, o)}

    hid = mlp_ratio * hidden
    params = {
        "token": 0.02 * jax.random.truncated_normal(
            next(keys), -2.0, 2.0, (1, num_tokens, hidden), jnp.float32),
        "embed": mlp_p(input_dim, hid, hidden),            # InputBlock
        "local": mlp_p(2 * input_dim + 4, hid, hidden),    # LocalEmbeddingBlock
        "int_mlp1": lin(4, hidden),                        # InteractionBlock
        "int_norm": dyt(hidden),
        "int_mlp2": lin(hidden, heads),
        "int_glob": lin(hidden, hidden),
        "blocks": [],
        "scales": [],                                      # LayerScale gammas
        "norm": dyt(hidden),
    }
    for _ in range(num_transformers):
        params["blocks"].append({
            "norm1": dyt(hidden),
            "qkv": lin(hidden, 3 * hidden),
            "proj": lin(hidden, hidden),
            "norm2": dyt(hidden),
            "mlp": mlp_p(hidden, hid, hidden),
        })
        params["scales"].append(1e-5 * jnp.ones((hidden,), jnp.float32))
    return params


def pet_body_forward(params, x, *, num_tokens, heads, K, cut):
    # x: (B, N, input_dim)  (conditional / pid / add_info / time disabled)
    B, N, _ = x.shape
    D = params["token"].shape[-1]
    mask_f = (x[:, :, 3:4] != 0).astype(jnp.float32)
    token = jnp.broadcast_to(params["token"], (B, num_tokens, D))

    x_embed = mlp_fused(params["embed"], x) * mask_f                  # InputBlock
    coord_shift = 999.0 * (1.0 - mask_f)
    local_features = local_embedding(
        params["local"], coord_shift + x[:, :, :2], x, mask_f, K)
    x_int, x_glob = interaction_fused(params, x, mask_f, cut, heads)  # use_int=True

    h = x_embed.astype(jnp.float32) + local_features + x_glob.astype(jnp.float32)

    seq = jnp.concatenate([token, h], axis=1)                         # (B,S,D)
    seq_mask = jnp.concatenate(
        [jnp.ones((B, num_tokens, 1), jnp.float32), mask_f], axis=1)
    # precomputed additive key mask (0 = keep, -1e9 = masked), shape (B,1,S)
    kadd = jnp.transpose(jnp.where(seq_mask > 0.5, 0.0, -1e9), (0, 2, 1))
    T = num_tokens
    # x_int is already head-major (B,H,N,N); pad token rows/cols with zeros.
    bias = jnp.pad(x_int, ((0, 0), (0, 0), (T, 0), (T, 0)))           # (B,H,S,S)

    seq = seq.astype(DT)
    for bp, gamma in zip(params["blocks"], params["scales"]):
        seq = att_block_fused(bp, gamma, seq, kadd, bias, heads)

    return dynamic_tanh(params["norm"], seq.astype(jnp.float32)) * seq_mask


# ----------------------------------------------------------------------------
if __name__ == "__main__":
    B, N, input_dim = 2, 8, 4
    hidden, heads, mlp_ratio = 32, 4, 2
    num_tokens, num_transformers, K, cut = 4, 2, 3, 0.4

    key = jax.random.PRNGKey(0)
    kp, kx = jax.random.split(key)
    params = init_params(kp, input_dim, hidden, heads, mlp_ratio,
                         num_tokens, num_transformers)

    x = jax.random.normal(kx, (B, N, input_dim), jnp.float32)
    # real particles need a non-zero 4th feature (mask = x[:,:,3:4] != 0);
    # zero out the last two particles of each event so they are masked/padded.
    x = x.at[:, :-2, 3].set(jnp.abs(x[:, :-2, 3]) + 0.1)
    x = x.at[:, -2:, :].set(0.0)

    fwd = jax.jit(functools.partial(pet_body_forward, num_tokens=num_tokens,
                                    heads=heads, K=K, cut=cut))
    out = jax.block_until_ready(fwd(params, x))

    assert out.shape == (B, num_tokens + N, hidden), out.shape
    assert bool(jnp.all(jnp.isfinite(out)))
    print("KERNEL_OK")
</pallas_src>

<mosaic_0001>
module attributes {stable_mosaic.version = 11 : i64} {
  func.func @_edge_mlp_mean_kernel(%arg0: i32, %arg1: memref<48x12xbf16, #tpu.memory_space<vmem>>, %arg2: memref<12x64xbf16, #tpu.memory_space<vmem>>, %arg3: memref<1x64xf32, #tpu.memory_space<vmem>>, %arg4: memref<1x1xf32, #tpu.memory_space<vmem>>, %arg5: memref<1x64xf32, #tpu.memory_space<vmem>>, %arg6: memref<1x64xf32, #tpu.memory_space<vmem>>, %arg7: memref<64x32xbf16, #tpu.memory_space<vmem>>, %arg8: memref<1x32xf32, #tpu.memory_space<vmem>>, %arg9: memref<16x32xf32, #tpu.memory_space<vmem>>) attributes {dimension_semantics = [#tpu.dimension_semantics<parallel>], iteration_bounds = array<i64: 1>, scalar_prefetch = 0 : i64, scratch_operands = 0 : i64, tpu.core_type = #tpu.core_type<tc>, window_params = [{transform_indices = @transform_0, window_bounds = array<i64: 48, 12>}, {pipeline_mode = #tpu.pipeline_mode<synchronous>, transform_indices = @transform_1, window_bounds = array<i64: 12, 64>}, {pipeline_mode = #tpu.pipeline_mode<synchronous>, transform_indices = @transform_2, window_bounds = array<i64: 1, 64>}, {pipeline_mode = #tpu.pipeline_mode<synchronous>, transform_indices = @transform_3, window_bounds = array<i64: 1, 1>}, {pipeline_mode = #tpu.pipeline_mode<synchronous>, transform_indices = @transform_4, window_bounds = array<i64: 1, 64>}, {pipeline_mode = #tpu.pipeline_mode<synchronous>, transform_indices = @transform_5, window_bounds = array<i64: 1, 64>}, {pipeline_mode = #tpu.pipeline_mode<synchronous>, transform_indices = @transform_6, window_bounds = array<i64: 64, 32>}, {pipeline_mode = #tpu.pipeline_mode<synchronous>, transform_indices = @transform_7, window_bounds = array<i64: 1, 32>}, {transform_indices = @transform_8, window_bounds = array<i64: 16, 32>}]} {
    %c0 = arith.constant 0 : index
    %c0_0 = arith.constant 0 : index
    %0 = vector.load %arg1[%c0, %c0_0] : memref<48x12xbf16, #tpu.memory_space<vmem>>, vector<48x12xbf16>
    %c0_1 = arith.constant 0 : index
    %c0_2 = arith.constant 0 : index
    %1 = vector.load %arg2[%c0_1, %c0_2] : memref<12x64xbf16, #tpu.memory_space<vmem>>, vector<12x64xbf16>
    %cst = arith.constant dense<0.000000e+00> : vector<48x64xf32>
    %2 = tpu.matmul %0, %1, %cst {dimension_numbers = #tpu.dot_dimension_numbers<[1], [0], [0], [1], [0, 0, 1, 1], [], []>} : vector<48x12xbf16>, vector<12x64xbf16>, vector<48x64xf32> -> vector<48x64xf32>
    %c0_3 = arith.constant 0 : index
    %c0_4 = arith.constant 0 : index
    %3 = vector.load %arg3[%c0_3, %c0_4] : memref<1x64xf32, #tpu.memory_space<vmem>>, vector<1x64xf32>
    %4 = vector.broadcast %3 : vector<1x64xf32> to vector<48x64xf32>
    %5 = arith.addf %2, %4 : vector<48x64xf32>
    %cst_5 = arith.constant 5.000000e-01 : f32
    %6 = vector.broadcast %cst_5 : f32 to vector<48x64xf32>
    %7 = arith.mulf %6, %5 : vector<48x64xf32>
    %cst_6 = arith.constant 4.471500e-02 : f32
    %8 = vector.broadcast %cst_6 : f32 to vector<48x64xf32>
    %9 = arith.mulf %8, %5 : vector<48x64xf32>
    %10 = arith.mulf %9, %5 : vector<48x64xf32>
    %11 = arith.mulf %10, %5 : vector<48x64xf32>
    %12 = arith.addf %5, %11 : vector<48x64xf32>
    %cst_7 = arith.constant 0.797884583 : f32
    %13 = vector.broadcast %cst_7 : f32 to vector<48x64xf32>
    %14 = arith.mulf %13, %12 : vector<48x64xf32>
    %15 = math.tanh %14 : vector<48x64xf32>
    %cst_8 = arith.constant 1.000000e+00 : f32
    %16 = vector.broadcast %cst_8 : f32 to vector<48x64xf32>
    %17 = arith.addf %16, %15 : vector<48x64xf32>
    %18 = arith.mulf %7, %17 : vector<48x64xf32>
    %c0_9 = arith.constant 0 : index
    %c0_10 = arith.constant 0 : index
    %19 = vector.load %arg4[%c0_9, %c0_10] : memref<1x1xf32, #tpu.memory_space<vmem>>, vector<1x1xf32>
    %20 = vector.broadcast %19 : vector<1x1xf32> to vector<48x64xf32>
    %21 = arith.mulf %20, %18 : vector<48x64xf32>
    %22 = math.tanh %21 : vector<48x64xf32>
    %c0_11 = arith.constant 0 : index
    %c0_12 = arith.constant 0 : index
    %23 = vector.load %arg5[%c0_11, %c0_12] : memref<1x64xf32, #tpu.memory_space<vmem>>, vector<1x64xf32>
    %24 = vector.broadcast %23 : vector<1x64xf32> to vector<48x64xf32>
    %25 = arith.mulf %22, %24 : vector<48x64xf32>
    %c0_13 = arith.constant 0 : index
    %c0_14 = arith.constant 0 : index
    %26 = vector.load %arg6[%c0_13, %c0_14] : memref<1x64xf32, #tpu.memory_space<vmem>>, vector<1x64xf32>
    %27 = vector.broadcast %26 : vector<1x64xf32> to vector<48x64xf32>
    %28 = arith.addf %25, %27 : vector<48x64xf32>
    %29 = tpu.iota {dimensions = array<i32: 1>} : vector<16x48xi32>
    %30 = tpu.iota {dimensions = array<i32: 0>} : vector<16x48xi32>
    %c3_i32 = arith.constant 3 : i32
    %31 = vector.broadcast %c3_i32 : i32 to vector<16x48xi32>
    %32 = arith.muli %30, %31 : vector<16x48xi32>
    %33 = arith.subi %29, %32 : vector<16x48xi32>
    %c0_i32 = arith.constant 0 : i32
    %34 = vector.broadcast %c0_i32 : i32 to vector<16x48xi32>
    %35 = arith.cmpi sge, %33, %34 : vector<16x48xi32>
    %c3_i32_15 = arith.constant 3 : i32
    %36 = vector.broadcast %c3_i32_15 : i32 to vector<16x48xi32>
    %37 = arith.cmpi slt, %33, %36 : vector<16x48xi32>
    %38 = arith.andi %35, %37 : vector<16x48xi1>
    %39 = arith.extui %38 : vector<16x48xi1> to vector<16x48xi32>
    %40 = arith.sitofp %39 : vector<16x48xi32> to vector<16x48xf32>
    %cst_16 = arith.constant dense<0.000000e+00> : vector<16x64xf32>
    %41 = tpu.matmul %40, %28, %cst_16 {dimension_numbers = #tpu.dot_dimension_numbers<[1], [0], [0], [1], [0, 0, 1, 1], [], []>} : vector<16x48xf32>, vector<48x64xf32>, vector<16x64xf32> -> vector<16x64xf32>
    %cst_17 = arith.constant 0.333333343 : f32
    %42 = vector.broadcast %cst_17 : f32 to vector<16x64xf32>
    %43 = arith.mulf %41, %42 : vector<16x64xf32>
    %44 = arith.truncf %43 : vector<16x64xf32> to vector<16x64xbf16>
    %c0_18 = arith.constant 0 : index
    %c0_19 = arith.constant 0 : index
    %45 = vector.load %arg7[%c0_18, %c0_19] : memref<64x32xbf16, #tpu.memory_space<vmem>>, vector<64x32xbf16>
    %cst_20 = arith.constant dense<0.000000e+00> : vector<16x32xf32>
    %46 = tpu.matmul %44, %45, %cst_20 {dimension_numbers = #tpu.dot_dimension_numbers<[1], [0], [0], [1], [0, 0, 1, 1], [], []>} : vector<16x64xbf16>, vector<64x32xbf16>, vector<16x32xf32> -> vector<16x32xf32>
    %c0_21 = arith.constant 0 : index
    %c0_22 = arith.constant 0 : index
    %47 = vector.load %arg8[%c0_21, %c0_22] : memref<1x32xf32, #tpu.memory_space<vmem>>, vector<1x32xf32>
    %48 = vector.broadcast %47 : vector<1x32xf32> to vector<16x32xf32>
    %49 = arith.addf %46, %48 : vector<16x32xf32>
    %c0_23 = arith.constant 0 : index
    %c0_24 = arith.constant 0 : index
    %50 = vector.load %arg9[%c0_23, %c0_24] : memref<16x32xf32, #tpu.memory_space<vmem>>, vector<16x32xf32>
    tpu.vector_store %arg9[%c0_23, %c0_24], %49 {strides = array<i32>} : memref<16x32xf32, #tpu.memory_space<vmem>>, vector<16x32xf32>,
    return
  }
  func.func @transform_0(%arg0: i32) -> (i32, i32) {
    %c0_i32 = arith.constant 0 : i32
    %c0_i32_0 = arith.constant 0 : i32
    return %arg0, %c0_i32 : i32, i32
  }
  func.func @transform_1(%arg0: i32) -> (i32, i32) {
    %c0_i32 = arith.constant 0 : i32
    %c0_i32_0 = arith.constant 0 : i32
    %c0_i32_1 = arith.constant 0 : i32
    return %c0_i32, %c0_i32_0 : i32, i32
  }
  func.func @transform_2(%arg0: i32) -> (i32, i32) {
    %c0_i32 = arith.constant 0 : i32
    %c0_i32_0 = arith.constant 0 : i32
    %c0_i32_1 = arith.constant 0 : i32
    return %c0_i32, %c0_i32_0 : i32, i32
  }
  func.func @transform_3(%arg0: i32) -> (i32, i32) {
    %c0_i32 = arith.constant 0 : i32
    %c0_i32_0 = arith.constant 0 : i32
    %c0_i32_1 = arith.constant 0 : i32
    return %c0_i32, %c0_i32_0 : i32, i32
  }
  func.func @transform_4(%arg0: i32) -> (i32, i32) {
    %c0_i32 = arith.constant 0 : i32
    %c0_i32_0 = arith.constant 0 : i32
    %c0_i32_1 = arith.constant 0 : i32
    return %c0_i32, %c0_i32_0 : i32, i32
  }
  func.func @transform_5(%arg0: i32) -> (i32, i32) {
    %c0_i32 = arith.constant 0 : i32
    %c0_i32_0 = arith.constant 0 : i32
    %c0_i32_1 = arith.constant 0 : i32
    return %c0_i32, %c0_i32_0 : i32, i32
  }
  func.func @transform_6(%arg0: i32) -> (i32, i32) {
    %c0_i32 = arith.constant 0 : i32
    %c0_i32_0 = arith.constant 0 : i32
    %c0_i32_1 = arith.constant 0 : i32
    return %c0_i32, %c0_i32_0 : i32, i32
  }
  func.func @transform_7(%arg0: i32) -> (i32, i32) {
    %c0_i32 = arith.constant 0 : i32
    %c0_i32_0 = arith.constant 0 : i32
    %c0_i32_1 = arith.constant 0 : i32
    return %c0_i32, %c0_i32_0 : i32, i32
  }
  func.func @transform_8(%arg0: i32) -> (i32, i32) {
    %c0_i32 = arith.constant 0 : i32
    %c0_i32_0 = arith.constant 0 : i32
    return %arg0, %c0_i32 : i32, i32
  }
}

module attributes {stable_mosaic.version = 11 : i64} {
  func.func @_mlp_kernel(%arg0: i32, %arg1: memref<16x4xbf16, #tpu.memory_space<vmem>>, %arg2: memref<4x64xbf16, #tpu.memory_space<vmem>>, %arg3: memref<1x64xf32, #tpu.memory_space<vmem>>, %arg4: memref<1x1xf32, #tpu.memory_space<vmem>>, %arg5: memref<1x64xf32, #tpu.memory_space<vmem>>, %arg6: memref<1x64xf32, #tpu.memory_space<vmem>>, %arg7: memref<64x32xbf16, #tpu.memory_space<vmem>>, %arg8: memref<1x32xf32, #tpu.memory_space<vmem>>, %arg9: memref<16x32xbf16, #tpu.memory_space<vmem>>) attributes {dimension_semantics = [#tpu.dimension_semantics<parallel>], iteration_bounds = array<i64: 1>, scalar_prefetch = 0 : i64, scratch_operands = 0 : i64, tpu.core_type = #tpu.core_type<tc>, window_params = [{transform_indices = @transform_0, window_bounds = array<i64: 16, 4>}, {pipeline_mode = #tpu.pipeline_mode<synchronous>, transform_indices = @transform_1, window_bounds = array<i64: 4, 64>}, {pipeline_mode = #tpu.pipeline_mode<synchronous>, transform_indices = @transform_2, window_bounds = array<i64: 1, 64>}, {pipeline_mode = #tpu.pipeline_mode<synchronous>, transform_indices = @transform_3, window_bounds = array<i64: 1, 1>}, {pipeline_mode = #tpu.pipeline_mode<synchronous>, transform_indices = @transform_4, window_bounds = array<i64: 1, 64>}, {pipeline_mode = #tpu.pipeline_mode<synchronous>, transform_indices = @transform_5, window_bounds = array<i64: 1, 64>}, {pipeline_mode = #tpu.pipeline_mode<synchronous>, transform_indices = @transform_6, window_bounds = array<i64: 64, 32>}, {pipeline_mode = #tpu.pipeline_mode<synchronous>, transform_indices = @transform_7, window_bounds = array<i64: 1, 32>}, {transform_indices = @transform_8, window_bounds = array<i64: 16, 32>}]} {
    %c0 = arith.constant 0 : index
    %c0_0 = arith.constant 0 : index
    %0 = vector.load %arg1[%c0, %c0_0] : memref<16x4xbf16, #tpu.memory_space<vmem>>, vector<16x4xbf16>
    %c0_1 = arith.constant 0 : index
    %c0_2 = arith.constant 0 : index
    %1 = vector.load %arg2[%c0_1, %c0_2] : memref<4x64xbf16, #tpu.memory_space<vmem>>, vector<4x64xbf16>
    %cst = arith.constant dense<0.000000e+00> : vector<16x64xf32>
    %2 = tpu.matmul %0, %1, %cst {dimension_numbers = #tpu.dot_dimension_numbers<[1], [0], [0], [1], [0, 0, 1, 1], [], []>} : vector<16x4xbf16>, vector<4x64xbf16>, vector<16x64xf32> -> vector<16x64xf32>
    %c0_3 = arith.constant 0 : index
    %c0_4 = arith.constant 0 : index
    %3 = vector.load %arg3[%c0_3, %c0_4] : memref<1x64xf32, #tpu.memory_space<vmem>>, vector<1x64xf32>
    %4 = vector.broadcast %3 : vector<1x64xf32> to vector<16x64xf32>
    %5 = arith.addf %2, %4 : vector<16x64xf32>
    %cst_5 = arith.constant 5.000000e-01 : f32
    %6 = vector.broadcast %cst_5 : f32 to vector<16x64xf32>
    %7 = arith.mulf %6, %5 : vector<16x64xf32>
    %cst_6 = arith.constant 4.471500e-02 : f32
    %8 = vector.broadcast %cst_6 : f32 to vector<16x64xf32>
    %9 = arith.mulf %8, %5 : vector<16x64xf32>
    %10 = arith.mulf %9, %5 : vector<16x64xf32>
    %11 = arith.mulf %10, %5 : vector<16x64xf32>
    %12 = arith.addf %5, %11 : vector<16x64xf32>
    %cst_7 = arith.constant 0.797884583 : f32
    %13 = vector.broadcast %cst_7 : f32 to vector<16x64xf32>
    %14 = arith.mulf %13, %12 : vector<16x64xf32>
    %15 = math.tanh %14 : vector<16x64xf32>
    %cst_8 = arith.constant 1.000000e+00 : f32
    %16 = vector.broadcast %cst_8 : f32 to vector<16x64xf32>
    %17 = arith.addf %16, %15 : vector<16x64xf32>
    %18 = arith.mulf %7, %17 : vector<16x64xf32>
    %c0_9 = arith.constant 0 : index
    %c0_10 = arith.constant 0 : index
    %19 = vector.load %arg4[%c0_9, %c0_10] : memref<1x1xf32, #tpu.memory_space<vmem>>, vector<1x1xf32>
    %20 = vector.broadcast %19 : vector<1x1xf32> to vector<16x64xf32>
    %21 = arith.mulf %20, %18 : vector<16x64xf32>
    %22 = math.tanh %21 : vector<16x64xf32>
    %c0_11 = arith.constant 0 : index
    %c0_12 = arith.constant 0 : index
    %23 = vector.load %arg5[%c0_11, %c0_12] : memref<1x64xf32, #tpu.memory_space<vmem>>, vector<1x64xf32>
    %24 = vector.broadcast %23 : vector<1x64xf32> to vector<16x64xf32>
    %25 = arith.mulf %22, %24 : vector<16x64xf32>
    %c0_13 = arith.constant 0 : index
    %c0_14 = arith.constant 0 : index
    %26 = vector.load %arg6[%c0_13, %c0_14] : memref<1x64xf32, #tpu.memory_space<vmem>>, vector<1x64xf32>
    %27 = vector.broadcast %26 : vector<1x64xf32> to vector<16x64xf32>
    %28 = arith.addf %25, %27 : vector<16x64xf32>
    %29 = arith.truncf %28 : vector<16x64xf32> to vector<16x64xbf16>
    %c0_15 = arith.constant 0 : index
    %c0_16 = arith.constant 0 : index
    %30 = vector.load %arg7[%c0_15, %c0_16] : memref<64x32xbf16, #tpu.memory_space<vmem>>, vector<64x32xbf16>
    %cst_17 = arith.constant dense<0.000000e+00> : vector<16x32xf32>
    %31 = tpu.matmul %29, %30, %cst_17 {dimension_numbers = #tpu.dot_dimension_numbers<[1], [0], [0], [1], [0, 0, 1, 1], [], []>} : vector<16x64xbf16>, vector<64x32xbf16>, vector<16x32xf32> -> vector<16x32xf32>
    %c0_18 = arith.constant 0 : index
    %c0_19 = arith.constant 0 : index
    %32 = vector.load %arg8[%c0_18, %c0_19] : memref<1x32xf32, #tpu.memory_space<vmem>>, vector<1x32xf32>
    %33 = vector.broadcast %32 : vector<1x32xf32> to vector<16x32xf32>
    %34 = arith.addf %31, %33 : vector<16x32xf32>
    %35 = arith.truncf %34 : vector<16x32xf32> to vector<16x32xbf16>
    %c0_20 = arith.constant 0 : index
    %c0_21 = arith.constant 0 : index
    %36 = vector.load %arg9[%c0_20, %c0_21] : memref<16x32xbf16, #tpu.memory_space<vmem>>, vector<16x32xbf16>
    tpu.vector_store %arg9[%c0_20, %c0_21], %35 {strides = array<i32>} : memref<16x32xbf16, #tpu.memory_space<vmem>>, vector<16x32xbf16>,
    return
  }
  func.func @transform_0(%arg0: i32) -> (i32, i32) {
    %c0_i32 = arith.constant 0 : i32
    %c0_i32_0 = arith.constant 0 : i32
    return %arg0, %c0_i32 : i32, i32
  }
  func.func @transform_1(%arg0: i32) -> (i32, i32) {
    %c0_i32 = arith.constant 0 : i32
    %c0_i32_0 = arith.constant 0 : i32
    %c0_i32_1 = arith.constant 0 : i32
    return %c0_i32, %c0_i32_0 : i32, i32
  }
  func.func @transform_2(%arg0: i32) -> (i32, i32) {
    %c0_i32 = arith.constant 0 : i32
    %c0_i32_0 = arith.constant 0 : i32
    %c0_i32_1 = arith.constant 0 : i32
    return %c0_i32, %c0_i32_0 : i32, i32
  }
  func.func @transform_3(%arg0: i32) -> (i32, i32) {
    %c0_i32 = arith.constant 0 : i32
    %c0_i32_0 = arith.constant 0 : i32
    %c0_i32_1 = arith.constant 0 : i32
    return %c0_i32, %c0_i32_0 : i32, i32
  }
  func.func @transform_4(%arg0: i32) -> (i32, i32) {
    %c0_i32 = arith.constant 0 : i32
    %c0_i32_0 = arith.constant 0 : i32
    %c0_i32_1 = arith.constant 0 : i32
    return %c0_i32, %c0_i32_0 : i32, i32
  }
  func.func @transform_5(%arg0: i32) -> (i32, i32) {
    %c0_i32 = arith.constant 0 : i32
    %c0_i32_0 = arith.constant 0 : i32
    %c0_i32_1 = arith.constant 0 : i32
    return %c0_i32, %c0_i32_0 : i32, i32
  }
  func.func @transform_6(%arg0: i32) -> (i32, i32) {
    %c0_i32 = arith.constant 0 : i32
    %c0_i32_0 = arith.constant 0 : i32
    %c0_i32_1 = arith.constant 0 : i32
    return %c0_i32, %c0_i32_0 : i32, i32
  }
  func.func @transform_7(%arg0: i32) -> (i32, i32) {
    %c0_i32 = arith.constant 0 : i32
    %c0_i32_0 = arith.constant 0 : i32
    %c0_i32_1 = arith.constant 0 : i32
    return %c0_i32, %c0_i32_0 : i32, i32
  }
  func.func @transform_8(%arg0: i32) -> (i32, i32) {
    %c0_i32 = arith.constant 0 : i32
    %c0_i32_0 = arith.constant 0 : i32
    return %arg0, %c0_i32 : i32, i32
  }
}

module attributes {stable_mosaic.version = 11 : i64} {
  func.func @_interaction_kernel(%arg0: i32, %arg1: i32, %arg2: memref<1x8x4xf32, #tpu.memory_space<vmem>>, %arg3: memref<1x4x8xf32, #tpu.memory_space<vmem>>, %arg4: memref<1x8x1xf32, #tpu.memory_space<vmem>>, %arg5: memref<1x1x8xf32, #tpu.memory_space<vmem>>, %arg6: memref<1x1xf32, #tpu.memory_space<vmem>>, %arg7: memref<4x32xf32, #tpu.memory_space<vmem>>, %arg8: memref<1x32xf32, #tpu.memory_space<vmem>>, %arg9: memref<1x32xf32, #tpu.memory_space<vmem>>, %arg10: memref<1x32xf32, #tpu.memory_space<vmem>>, %arg11: memref<4x32xf32, #tpu.memory_space<vmem>>, %arg12: memref<1x4xf32, #tpu.memory_space<vmem>>, %arg13: memref<32x32xbf16, #tpu.memory_space<vmem>>, %arg14: memref<1x32xf32, #tpu.memory_space<vmem>>, %arg15: memref<1x4x8x8xbf16, #tpu.memory_space<vmem>>, %arg16: memref<1x8x32xbf16, #tpu.memory_space<vmem>>) attributes {dimension_semantics = [#tpu.dimension_semantics<parallel>, #tpu.dimension_semantics<parallel>], iteration_bounds = array<i64: 2, 1>, scalar_prefetch = 0 : i64, scratch_operands = 0 : i64, tpu.core_type = #tpu.core_type<tc>, window_params = [{transform_indices = @transform_0, window_bounds = array<i64: 1, 8, 4>}, {transform_indices = @transform_1, window_bounds = array<i64: 1, 4, 8>}, {transform_indices = @transform_2, window_bounds = array<i64: 1, 8, 1>}, {transform_indices = @transform_3, window_bounds = array<i64: 1, 1, 8>}, {pipeline_mode = #tpu.pipeline_mode<synchronous>, transform_indices = @transform_4, window_bounds = array<i64: 1, 1>}, {pipeline_mode = #tpu.pipeline_mode<synchronous>, transform_indices = @transform_5, window_bounds = array<i64: 4, 32>}, {pipeline_mode = #tpu.pipeline_mode<synchronous>, transform_indices = @transform_6, window_bounds = array<i64: 1, 32>}, {pipeline_mode = #tpu.pipeline_mode<synchronous>, transform_indices = @transform_7, window_bounds = array<i64: 1, 32>}, {pipeline_mode = #tpu.pipeline_mode<synchronous>, transform_indices = @transform_8, window_bounds = array<i64: 1, 32>}, {pipeline_mode = #tpu.pipeline_mode<synchronous>, transform_indices = @transform_9, window_bounds = array<i64: 4, 32>}, {pipeline_mode = #tpu.pipeline_mode<synchronous>, transform_indices = @transform_10, window_bounds = array<i64: 1, 4>}, {pipeline_mode = #tpu.pipeline_mode<synchronous>, transform_indices = @transform_11, window_bounds = array<i64: 32, 32>}, {pipeline_mode = #tpu.pipeline_mode<synchronous>, transform_indices = @transform_12, window_bounds = array<i64: 1, 32>}, {transform_indices = @transform_13, window_bounds = array<i64: 1, 4, 8, 8>}, {transform_indices = @transform_14, window_bounds = array<i64: 1, 8, 32>}]} {
    %c0 = arith.constant 0 : index
    %c0_0 = arith.constant 0 : index
    %c0_1 = arith.constant 0 : index
    %0 = vector.load %arg2[%c0, %c0_0, %c0_1] : memref<1x8x4xf32, #tpu.memory_space<vmem>>, vector<1x8x4xf32>
    %1 = vector.shape_cast %0 : vector<1x8x4xf32> to vector<8x4xf32>
    %c0_2 = arith.constant 0 : index
    %c0_3 = arith.constant 0 : index
    %c0_4 = arith.constant 0 : index
    %2 = vector.load %arg3[%c0_2, %c0_3, %c0_4] : memref<1x4x8xf32, #tpu.memory_space<vmem>>, vector<1x4x8xf32>
    %3 = vector.shape_cast %2 : vector<1x4x8xf32> to vector<4x8xf32>
    %c0_5 = arith.constant 0 : index
    %c0_6 = arith.constant 0 : index
    %c0_7 = arith.constant 0 : index
    %4 = vector.load %arg4[%c0_5, %c0_6, %c0_7] : memref<1x8x1xf32, #tpu.memory_space<vmem>>, vector<1x8x1xf32>
    %5 = vector.shape_cast %4 : vector<1x8x1xf32> to vector<8x1xf32>
    %c0_8 = arith.constant 0 : index
    %c0_9 = arith.constant 0 : index
    %c0_10 = arith.constant 0 : index
    %6 = vector.load %arg5[%c0_8, %c0_9, %c0_10] : memref<1x1x8xf32, #tpu.memory_space<vmem>>, vector<1x1x8xf32>
    %7 = vector.shape_cast %6 : vector<1x1x8xf32> to vector<1x8xf32>
    %8 = vector.extract_strided_slice %1 {offsets = [0, 0], sizes = [8, 1], strides = [1, 1]} : vector<8x4xf32> to vector<8x1xf32>
    %9 = vector.extract_strided_slice %1 {offsets = [0, 1], sizes = [8, 1], strides = [1, 1]} : vector<8x4xf32> to vector<8x1xf32>
    %10 = vector.extract_strided_slice %1 {offsets = [0, 2], sizes = [8, 1], strides = [1, 1]} : vector<8x4xf32> to vector<8x1xf32>
    %11 = math.exp %10 : vector<8x1xf32>
    %12 = vector.extract_strided_slice %3 {offsets = [0, 0], sizes = [1, 8], strides = [1, 1]} : vector<4x8xf32> to vector<1x8xf32>
    %13 = vector.extract_strided_slice %3 {offsets = [1, 0], sizes = [1, 8], strides = [1, 1]} : vector<4x8xf32> to vector<1x8xf32>
    %14 = vector.extract_strided_slice %3 {offsets = [2, 0], sizes = [1, 8], strides = [1, 1]} : vector<4x8xf32> to vector<1x8xf32>
    %15 = math.exp %14 : vector<1x8xf32>
    %16 = vector.broadcast %8 : vector<8x1xf32> to vector<8x8xf32>
    %17 = vector.broadcast %12 : vector<1x8xf32> to vector<8x8xf32>
    %18 = arith.subf %16, %17 : vector<8x8xf32>
    %19 = vector.broadcast %9 : vector<8x1xf32> to vector<8x8xf32>
    %20 = vector.broadcast %13 : vector<1x8xf32> to vector<8x8xf32>
    %21 = arith.subf %19, %20 : vector<8x8xf32>
    %22 = arith.mulf %18, %18 : vector<8x8xf32>
    %23 = arith.mulf %21, %21 : vector<8x8xf32>
    %24 = arith.addf %22, %23 : vector<8x8xf32>
    %25 = vector.broadcast %11 : vector<8x1xf32> to vector<8x8xf32>
    %26 = vector.broadcast %15 : vector<1x8xf32> to vector<8x8xf32>
    %27 = arith.minimumf %25, %26 : vector<8x8xf32>
    %cst = arith.constant 9.99999997E-7 : f32
    %28 = vector.broadcast %cst : f32 to vector<8x8xf32>
    %29 = arith.addf %24, %28 : vector<8x8xf32>
    %30 = math.sqrt %29 : vector<8x8xf32>
    %31 = arith.mulf %27, %30 : vector<8x8xf32>
    %32 = vector.broadcast %11 : vector<8x1xf32> to vector<8x8xf32>
    %33 = vector.broadcast %15 : vector<1x8xf32> to vector<8x8xf32>
    %34 = arith.addf %32, %33 : vector<8x8xf32>
    %cst_11 = arith.constant 9.99999997E-7 : f32
    %35 = vector.broadcast %cst_11 : f32 to vector<8x8xf32>
    %36 = arith.addf %34, %35 : vector<8x8xf32>
    %37 = arith.divf %27, %36 : vector<8x8xf32>
    %cst_12 = arith.constant 9.99999997E-7 : f32
    %38 = vector.broadcast %cst_12 : f32 to vector<8x8xf32>
    %39 = arith.addf %24, %38 : vector<8x8xf32>
    %40 = math.log %39 : vector<8x8xf32>
    %cst_13 = arith.constant 9.99999997E-7 : f32
    %41 = vector.broadcast %cst_13 : f32 to vector<8x8xf32>
    %42 = arith.addf %31, %41 : vector<8x8xf32>
    %43 = math.log %42 : vector<8x8xf32>
    %cst_14 = arith.constant 9.99999997E-7 : f32
    %44 = vector.broadcast %cst_14 : f32 to vector<8x8xf32>
    %45 = arith.addf %37, %44 : vector<8x8xf32>
    %46 = math.log %45 : vector<8x8xf32>
    %47 = arith.mulf %18, %21 : vector<8x8xf32>
    %48 = vector.broadcast %5 : vector<8x1xf32> to vector<8x8xf32>
    %49 = vector.broadcast %7 : vector<1x8xf32> to vector<8x8xf32>
    %50 = arith.mulf %48, %49 : vector<8x8xf32>
    %cst_15 = arith.constant 1.600000e-01 : f32
    %51 = vector.broadcast %cst_15 : f32 to vector<8x8xf32>
    %52 = arith.cmpf olt, %24, %51 : vector<8x8xf32>
    %53 = arith.extui %52 : vector<8x8xi1> to vector<8x8xi32>
    %54 = arith.sitofp %53 : vector<8x8xi32> to vector<8x8xf32>
    %55 = arith.mulf %50, %54 : vector<8x8xf32>
    %56 = vector.shape_cast %40 : vector<8x8xf32> to vector<8x8x1xf32>
    %c0_16 = arith.constant 0 : index
    %c0_17 = arith.constant 0 : index
    %57 = vector.load %arg7[%c0_16, %c0_17] : memref<4x32xf32, #tpu.memory_space<vmem>>, vector<1x32xf32>
    %58 = vector.shape_cast %57 : vector<1x32xf32> to vector<1x1x32xf32>
    %59 = vector.broadcast %56 : vector<8x8x1xf32> to vector<8x8x32xf32>
    %60 = vector.broadcast %58 : vector<1x1x32xf32> to vector<8x8x32xf32>
    %61 = arith.mulf %59, %60 : vector<8x8x32xf32>
    %62 = vector.shape_cast %43 : vector<8x8xf32> to vector<8x8x1xf32>
    %c1 = arith.constant 1 : index
    %c0_18 = arith.constant 0 : index
    %63 = vector.load %arg7[%c1, %c0_18] : memref<4x32xf32, #tpu.memory_space<vmem>>, vector<1x32xf32>
    %64 = vector.shape_cast %63 : vector<1x32xf32> to vector<1x1x32xf32>
    %65 = vector.broadcast %62 : vector<8x8x1xf32> to vector<8x8x32xf32>
    %66 = vector.broadcast %64 : vector<1x1x32xf32> to vector<8x8x32xf32>
    %67 = arith.mulf %65, %66 : vector<8x8x32xf32>
    %68 = arith.addf %61, %67 : vector<8x8x32xf32>
    %69 = vector.shape_cast %46 : vector<8x8xf32> to vector<8x8x1xf32>
    %c2 = arith.constant 2 : index
    %c0_19 = arith.constant 0 : index
    %70 = vector.load %arg7[%c2, %c0_19] : memref<4x32xf32, #tpu.memory_space<vmem>>, vector<1x32xf32>
    %71 = vector.shape_cast %70 : vector<1x32xf32> to vector<1x1x32xf32>
    %72 = vector.broadcast %69 : vector<8x8x1xf32> to vector<8x8x32xf32>
    %73 = vector.broadcast %71 : vector<1x1x32xf32> to vector<8x8x32xf32>
    %74 = arith.mulf %72, %73 : vector<8x8x32xf32>
    %75 = arith.addf %68, %74 : vector<8x8x32xf32>
    %76 = vector.shape_cast %47 : vector<8x8xf32> to vector<8x8x1xf32>
    %c3 = arith.constant 3 : index
    %c0_20 = arith.constant 0 : index
    %77 = vector.load %arg7[%c3, %c0_20] : memref<4x32xf32, #tpu.memory_space<vmem>>, vector<1x32xf32>
    %78 = vector.shape_cast %77 : vector<1x32xf32> to vector<1x1x32xf32>
    %79 = vector.broadcast %76 : vector<8x8x1xf32> to vector<8x8x32xf32>
    %80 = vector.broadcast %78 : vector<1x1x32xf32> to vector<8x8x32xf32>
    %81 = arith.mulf %79, %80 : vector<8x8x32xf32>
    %82 = arith.addf %75, %81 : vector<8x8x32xf32>
    %c0_21 = arith.constant 0 : index
    %c0_22 = arith.constant 0 : index
    %83 = vector.load %arg8[%c0_21, %c0_22] : memref<1x32xf32, #tpu.memory_space<vmem>>, vector<1x32xf32>
    %84 = vector.shape_cast %83 : vector<1x32xf32> to vector<1x1x32xf32>
    %85 = vector.broadcast %84 : vector<1x1x32xf32> to vector<8x8x32xf32>
    %86 = arith.addf %82, %85 : vector<8x8x32xf32>
    %cst_23 = arith.constant 5.000000e-01 : f32
    %87 = vector.broadcast %cst_23 : f32 to vector<8x8x32xf32>
    %88 = arith.mulf %87, %86 : vector<8x8x32xf32>
    %cst_24 = arith.constant 4.471500e-02 : f32
    %89 = vector.broadcast %cst_24 : f32 to vector<8x8x32xf32>
    %90 = arith.mulf %89, %86 : vector<8x8x32xf32>
    %91 = arith.mulf %90, %86 : vector<8x8x32xf32>
    %92 = arith.mulf %91, %86 : vector<8x8x32xf32>
    %93 = arith.addf %86, %92 : vector<8x8x32xf32>
    %cst_25 = arith.constant 0.797884583 : f32
    %94 = vector.broadcast %cst_25 : f32 to vector<8x8x32xf32>
    %95 = arith.mulf %94, %93 : vector<8x8x32xf32>
    %96 = math.tanh %95 : vector<8x8x32xf32>
    %cst_26 = arith.constant 1.000000e+00 : f32
    %97 = vector.broadcast %cst_26 : f32 to vector<8x8x32xf32>
    %98 = arith.addf %97, %96 : vector<8x8x32xf32>
    %99 = arith.mulf %88, %98 : vector<8x8x32xf32>
    %c0_27 = arith.constant 0 : index
    %c0_28 = arith.constant 0 : index
    %100 = vector.load %arg6[%c0_27, %c0_28] : memref<1x1xf32, #tpu.memory_space<vmem>>, vector<1x1xf32>
    %101 = vector.shape_cast %100 : vector<1x1xf32> to vector<1x1x1xf32>
    %102 = vector.broadcast %101 : vector<1x1x1xf32> to vector<8x8x32xf32>
    %103 = arith.mulf %102, %99 : vector<8x8x32xf32>
    %104 = math.tanh %103 : vector<8x8x32xf32>
    %c0_29 = arith.constant 0 : index
    %c0_30 = arith.constant 0 : index
    %105 = vector.load %arg9[%c0_29, %c0_30] : memref<1x32xf32, #tpu.memory_space<vmem>>, vector<1x32xf32>
    %106 = vector.shape_cast %105 : vector<1x32xf32> to vector<1x1x32xf32>
    %107 = vector.broadcast %106 : vector<1x1x32xf32> to vector<8x8x32xf32>
    %108 = arith.mulf %104, %107 : vector<8x8x32xf32>
    %c0_31 = arith.constant 0 : index
    %c0_32 = arith.constant 0 : index
    %109 = vector.load %arg10[%c0_31, %c0_32] : memref<1x32xf32, #tpu.memory_space<vmem>>, vector<1x32xf32>
    %110 = vector.shape_cast %109 : vector<1x32xf32> to vector<1x1x32xf32>
    %111 = vector.broadcast %110 : vector<1x1x32xf32> to vector<8x8x32xf32>
    %112 = arith.addf %108, %111 : vector<8x8x32xf32>
    %c0_33 = arith.constant 0 : index
    %c0_34 = arith.constant 0 : index
    %113 = vector.load %arg11[%c0_33, %c0_34] : memref<4x32xf32, #tpu.memory_space<vmem>>, vector<1x32xf32>
    %114 = vector.shape_cast %113 : vector<1x32xf32> to vector<1x1x32xf32>
    %115 = vector.broadcast %114 : vector<1x1x32xf32> to vector<8x8x32xf32>
    %116 = arith.mulf %112, %115 : vector<8x8x32xf32>
    %cst_35 = arith.constant dense<0.000000e+00> : vector<8x8xf32>
    %117 = vector.multi_reduction <add>, %116, %cst_35 [2] : vector<8x8x32xf32> to vector<8x8xf32>
    %c0_36 = arith.constant 0 : index
    %c0_37 = arith.constant 0 : index
    %118 = vector.load %arg12[%c0_36, %c0_37] : memref<1x4xf32, #tpu.memory_space<vmem>>, vector<1x1xf32>
    %119 = vector.broadcast %118 : vector<1x1xf32> to vector<8x8xf32>
    %120 = arith.addf %117, %119 : vector<8x8xf32>
    %121 = arith.mulf %120, %55 : vector<8x8xf32>
    %122 = arith.truncf %121 : vector<8x8xf32> to vector<8x8xbf16>
    %c0_38 = arith.constant 0 : index
    %c0_39 = arith.constant 0 : index
    %c0_40 = arith.constant 0 : index
    %c0_41 = arith.constant 0 : index
    %123 = vector.load %arg15[%c0_38, %c0_39, %c0_40, %c0_41] : memref<1x4x8x8xbf16, #tpu.memory_space<vmem>>, vector<1x1x8x8xbf16>
    %124 = vector.shape_cast %123 : vector<1x1x8x8xbf16> to vector<8x8xbf16>
    %125 = vector.shape_cast %122 : vector<8x8xbf16> to vector<1x1x8x8xbf16>
    tpu.vector_store %arg15[%c0_38, %c0_39, %c0_40, %c0_41], %125 {strides = array<i32>} : memref<1x4x8x8xbf16, #tpu.memory_space<vmem>>, vector<1x1x8x8xbf16>,
    %c1_42 = arith.constant 1 : index
    %c0_43 = arith.constant 0 : index
    %126 = vector.load %arg11[%c1_42, %c0_43] : memref<4x32xf32, #tpu.memory_space<vmem>>, vector<1x32xf32>
    %127 = vector.shape_cast %126 : vector<1x32xf32> to vector<1x1x32xf32>
    %128 = vector.broadcast %127 : vector<1x1x32xf32> to vector<8x8x32xf32>
    %129 = arith.mulf %112, %128 : vector<8x8x32xf32>
    %cst_44 = arith.constant dense<0.000000e+00> : vector<8x8xf32>
    %130 = vector.multi_reduction <add>, %129, %cst_44 [2] : vector<8x8x32xf32> to vector<8x8xf32>
    %c0_45 = arith.constant 0 : index
    %c1_46 = arith.constant 1 : index
    %131 = vector.load %arg12[%c0_45, %c1_46] : memref<1x4xf32, #tpu.memory_space<vmem>>, vector<1x1xf32>
    %132 = vector.broadcast %131 : vector<1x1xf32> to vector<8x8xf32>
    %133 = arith.addf %130, %132 : vector<8x8xf32>
    %134 = arith.mulf %133, %55 : vector<8x8xf32>
    %135 = arith.truncf %134 : vector<8x8xf32> to vector<8x8xbf16>
    %c0_47 = arith.constant 0 : index
    %c1_48 = arith.constant 1 : index
    %c0_49 = arith.constant 0 : index
    %c0_50 = arith.constant 0 : index
    %136 = vector.load %arg15[%c0_47, %c1_48, %c0_49, %c0_50] : memref<1x4x8x8xbf16, #tpu.memory_space<vmem>>, vector<1x1x8x8xbf16>
    %137 = vector.shape_cast %136 : vector<1x1x8x8xbf16> to vector<8x8xbf16>
    %138 = vector.shape_cast %135 : vector<8x8xbf16> to vector<1x1x8x8xbf16>
    tpu.vector_store %arg15[%c0_47, %c1_48, %c0_49, %c0_50], %138 {strides = array<i32>} : memref<1x4x8x8xbf16, #tpu.memory_space<vmem>>, vector<1x1x8x8xbf16>,
    %c2_51 = arith.constant 2 : index
    %c0_52 = arith.constant 0 : index
    %139 = vector.load %arg11[%c2_51, %c0_52] : memref<4x32xf32, #tpu.memory_space<vmem>>, vector<1x32xf32>
    %140 = vector.shape_cast %139 : vector<1x32xf32> to vector<1x1x32xf32>
    %141 = vector.broadcast %140 : vector<1x1x32xf32> to vector<8x8x32xf32>
    %142 = arith.mulf %112, %141 : vector<8x8x32xf32>
    %cst_53 = arith.constant dense<0.000000e+00> : vector<8x8xf32>
    %143 = vector.multi_reduction <add>, %142, %cst_53 [2] : vector<8x8x32xf32> to vector<8x8xf32>
    %c0_54 = arith.constant 0 : index
    %c2_55 = arith.constant 2 : index
    %144 = vector.load %arg12[%c0_54, %c2_55] : memref<1x4xf32, #tpu.memory_space<vmem>>, vector<1x1xf32>
    %145 = vector.broadcast %144 : vector<1x1xf32> to vector<8x8xf32>
    %146 = arith.addf %143, %145 : vector<8x8xf32>
    %147 = arith.mulf %146, %55 : vector<8x8xf32>
    %148 = arith.truncf %147 : vector<8x8xf32> to vector<8x8xbf16>
    %c0_56 = arith.constant 0 : index
    %c2_57 = arith.constant 2 : index
    %c0_58 = arith.constant 0 : index
    %c0_59 = arith.constant 0 : index
    %149 = vector.load %arg15[%c0_56, %c2_57, %c0_58, %c0_59] : memref<1x4x8x8xbf16, #tpu.memory_space<vmem>>, vector<1x1x8x8xbf16>
    %150 = vector.shape_cast %149 : vector<1x1x8x8xbf16> to vector<8x8xbf16>
    %151 = vector.shape_cast %148 : vector<8x8xbf16> to vector<1x1x8x8xbf16>
    tpu.vector_store %arg15[%c0_56, %c2_57, %c0_58, %c0_59], %151 {strides = array<i32>} : memref<1x4x8x8xbf16, #tpu.memory_space<vmem>>, vector<1x1x8x8xbf16>,
    %c3_60 = arith.constant 3 : index
    %c0_61 = arith.constant 0 : index
    %152 = vector.load %arg11[%c3_60, %c0_61] : memref<4x32xf32, #tpu.memory_space<vmem>>, vector<1x32xf32>
    %153 = vector.shape_cast %152 : vector<1x32xf32> to vector<1x1x32xf32>
    %154 = vector.broadcast %153 : vector<1x1x32xf32> to vector<8x8x32xf32>
    %155 = arith.mulf %112, %154 : vector<8x8x32xf32>
    %cst_62 = arith.constant dense<0.000000e+00> : vector<8x8xf32>
    %156 = vector.multi_reduction <add>, %155, %cst_62 [2] : vector<8x8x32xf32> to vector<8x8xf32>
    %c0_63 = arith.constant 0 : index
    %c3_64 = arith.constant 3 : index
    %157 = vector.load %arg12[%c0_63, %c3_64] : memref<1x4xf32, #tpu.memory_space<vmem>>, vector<1x1xf32>
    %158 = vector.broadcast %157 : vector<1x1xf32> to vector<8x8xf32>
    %159 = arith.addf %156, %158 : vector<8x8xf32>
    %160 = arith.mulf %159, %55 : vector<8x8xf32>
    %161 = arith.truncf %160 : vector<8x8xf32> to vector<8x8xbf16>
    %c0_65 = arith.constant 0 : index
    %c3_66 = arith.constant 3 : index
    %c0_67 = arith.constant 0 : index
    %c0_68 = arith.constant 0 : index
    %162 = vector.load %arg15[%c0_65, %c3_66, %c0_67, %c0_68] : memref<1x4x8x8xbf16, #tpu.memory_space<vmem>>, vector<1x1x8x8xbf16>
    %163 = vector.shape_cast %162 : vector<1x1x8x8xbf16> to vector<8x8xbf16>
    %164 = vector.shape_cast %161 : vector<8x8xbf16> to vector<1x1x8x8xbf16>
    tpu.vector_store %arg15[%c0_65, %c3_66, %c0_67, %c0_68], %164 {strides = array<i32>} : memref<1x4x8x8xbf16, #tpu.memory_space<vmem>>, vector<1x1x8x8xbf16>,
    %165 = vector.shape_cast %55 : vector<8x8xf32> to vector<8x8x1xf32>
    %166 = vector.broadcast %165 : vector<8x8x1xf32> to vector<8x8x32xf32>
    %167 = arith.mulf %112, %166 : vector<8x8x32xf32>
    %cst_69 = arith.constant dense<0.000000e+00> : vector<8x32xf32>
    %168 = vector.multi_reduction <add>, %167, %cst_69 [1] : vector<8x8x32xf32> to vector<8x32xf32>
    %cst_70 = arith.constant dense<0.000000e+00> : vector<8xf32>
    %169 = vector.multi_reduction <add>, %55, %cst_70 [1] : vector<8x8xf32> to vector<8xf32>
    %170 = vector.shape_cast %169 : vector<8xf32> to vector<8x1xf32>
    %cst_71 = arith.constant 1.000000e+00 : f32
    %171 = vector.broadcast %cst_71 : f32 to vector<8x1xf32>
    %172 = arith.maximumf %170, %171 : vector<8x1xf32>
    %173 = vector.broadcast %172 : vector<8x1xf32> to vector<8x32xf32>
    %174 = arith.divf %168, %173 : vector<8x32xf32>
    %175 = arith.truncf %174 : vector<8x32xf32> to vector<8x32xbf16>
    %c0_72 = arith.constant 0 : index
    %c0_73 = arith.constant 0 : index
    %176 = vector.load %arg13[%c0_72, %c0_73] : memref<32x32xbf16, #tpu.memory_space<vmem>>, vector<32x32xbf16>
    %cst_74 = arith.constant dense<0.000000e+00> : vector<8x32xf32>
    %177 = tpu.matmul %175, %176, %cst_74 {dimension_numbers = #tpu.dot_dimension_numbers<[1], [0], [0], [1], [0, 0, 1, 1], [], []>} : vector<8x32xbf16>, vector<32x32xbf16>, vector<8x32xf32> -> vector<8x32xf32>
    %c0_75 = arith.constant 0 : index
    %c0_76 = arith.constant 0 : index
    %178 = vector.load %arg14[%c0_75, %c0_76] : memref<1x32xf32, #tpu.memory_space<vmem>>, vector<1x32xf32>
    %179 = vector.broadcast %178 : vector<1x32xf32> to vector<8x32xf32>
    %180 = arith.addf %177, %179 : vector<8x32xf32>
    %181 = vector.broadcast %5 : vector<8x1xf32> to vector<8x32xf32>
    %182 = arith.mulf %180, %181 : vector<8x32xf32>
    %183 = arith.truncf %182 : vector<8x32xf32> to vector<8x32xbf16>
    %c0_77 = arith.constant 0 : index
    %c0_78 = arith.constant 0 : index
    %c0_79 = arith.constant 0 : index
    %184 = vector.load %arg16[%c0_77, %c0_78, %c0_79] : memref<1x8x32xbf16, #tpu.memory_space<vmem>>, vector<1x8x32xbf16>
    %185 = vector.shape_cast %184 : vector<1x8x32xbf16> to vector<8x32xbf16>
    %186 = vector.shape_cast %183 : vector<8x32xbf16> to vector<1x8x32xbf16>
    tpu.vector_store %arg16[%c0_77, %c0_78, %c0_79], %186 {strides = array<i32>} : memref<1x8x32xbf16, #tpu.memory_space<vmem>>, vector<1x8x32xbf16>,
    return
  }
  func.func @transform_0(%arg0: i32, %arg1: i32) -> (i32, i32, i32) {
    %c0_i32 = arith.constant 0 : i32
    %c0_i32_0 = arith.constant 0 : i32
    return %arg0, %arg1, %c0_i32 : i32, i32, i32
  }
  func.func @transform_1(%arg0: i32, %arg1: i32) -> (i32, i32, i32) {
    %c0_i32 = arith.constant 0 : i32
    %c0_i32_0 = arith.constant 0 : i32
    %c0_i32_1 = arith.constant 0 : i32
    return %arg0, %c0_i32, %c0_i32_0 : i32, i32, i32
  }
  func.func @transform_2(%arg0: i32, %arg1: i32) -> (i32, i32, i32) {
    %c0_i32 = arith.constant 0 : i32
    %c0_i32_0 = arith.constant 0 : i32
    return %arg0, %arg1, %c0_i32 : i32, i32, i32
  }
  func.func @transform_3(%arg0: i32, %arg1: i32) -> (i32, i32, i32) {
    %c0_i32 = arith.constant 0 : i32
    %c0_i32_0 = arith.constant 0 : i32
    %c0_i32_1 = arith.constant 0 : i32
    return %arg0, %c0_i32, %c0_i32_0 : i32, i32, i32
  }
  func.func @transform_4(%arg0: i32, %arg1: i32) -> (i32, i32) {
    %c0_i32 = arith.constant 0 : i32
    %c0_i32_0 = arith.constant 0 : i32
    %c0_i32_1 = arith.constant 0 : i32
    return %c0_i32, %c0_i32_0 : i32, i32
  }
  func.func @transform_5(%arg0: i32, %arg1: i32) -> (i32, i32) {
    %c0_i32 = arith.constant 0 : i32
    %c0_i32_0 = arith.constant 0 : i32
    %c0_i32_1 = arith.constant 0 : i32
    return %c0_i32, %c0_i32_0 : i32, i32
  }
  func.func @transform_6(%arg0: i32, %arg1: i32) -> (i32, i32) {
    %c0_i32 = arith.constant 0 : i32
    %c0_i32_0 = arith.constant 0 : i32
    %c0_i32_1 = arith.constant 0 : i32
    return %c0_i32, %c0_i32_0 : i32, i32
  }
  func.func @transform_7(%arg0: i32, %arg1: i32) -> (i32, i32) {
    %c0_i32 = arith.constant 0 : i32
    %c0_i32_0 = arith.constant 0 : i32
    %c0_i32_1 = arith.constant 0 : i32
    return %c0_i32, %c0_i32_0 : i32, i32
  }
  func.func @transform_8(%arg0: i32, %arg1: i32) -> (i32, i32) {
    %c0_i32 = arith.constant 0 : i32
    %c0_i32_0 = arith.constant 0 : i32
    %c0_i32_1 = arith.constant 0 : i32
    return %c0_i32, %c0_i32_0 : i32, i32
  }
  func.func @transform_9(%arg0: i32, %arg1: i32) -> (i32, i32) {
    %c0_i32 = arith.constant 0 : i32
    %c0_i32_0 = arith.constant 0 : i32
    %c0_i32_1 = arith.constant 0 : i32
    return %c0_i32, %c0_i32_0 : i32, i32
  }
  func.func @transform_10(%arg0: i32, %arg1: i32) -> (i32, i32) {
    %c0_i32 = arith.constant 0 : i32
    %c0_i32_0 = arith.constant 0 : i32
    %c0_i32_1 = arith.constant 0 : i32
    return %c0_i32, %c0_i32_0 : i32, i32
  }
  func.func @transform_11(%arg0: i32, %arg1: i32) -> (i32, i32) {
    %c0_i32 = arith.constant 0 : i32
    %c0_i32_0 = arith.constant 0 : i32
    %c0_i32_1 = arith.constant 0 : i32
    return %c0_i32, %c0_i32_0 : i32, i32
  }
  func.func @transform_12(%arg0: i32, %arg1: i32) -> (i32, i32) {
    %c0_i32 = arith.constant 0 : i32
    %c0_i32_0 = arith.constant 0 : i32
    %c0_i32_1 = arith.constant 0 : i32
    return %c0_i32, %c0_i32_0 : i32, i32
  }
  func.func @transform_13(%arg0: i32, %arg1: i32) -> (i32, i32, i32, i32) {
    %c0_i32 = arith.constant 0 : i32
    %c0_i32_0 = arith.constant 0 : i32
    %c0_i32_1 = arith.constant 0 : i32
    return %arg0, %c0_i32, %arg1, %c0_i32_0 : i32, i32, i32, i32
  }
  func.func @transform_14(%arg0: i32, %arg1: i32) -> (i32, i32, i32) {
    %c0_i32 = arith.constant 0 : i32
    %c0_i32_0 = arith.constant 0 : i32
    return %arg0, %arg1, %c0_i32 : i32, i32, i32
  }
}

module attributes {stable_mosaic.version = 11 : i64} {
  func.func @_att_block_kernel(%arg0: i32, %arg1: memref<1x12x32xbf16, #tpu.memory_space<vmem>>, %arg2: memref<1x1x12xf32, #tpu.memory_space<vmem>>, %arg3: memref<1x4x12x12xbf16, #tpu.memory_space<vmem>>, %arg4: memref<1x1xf32, #tpu.memory_space<vmem>>, %arg5: memref<1x1xf32, #tpu.memory_space<vmem>>, %arg6: memref<1x1xf32, #tpu.memory_space<vmem>>, %arg7: memref<1x32xf32, #tpu.memory_space<vmem>>, %arg8: memref<1x32xf32, #tpu.memory_space<vmem>>, %arg9: memref<32x96xbf16, #tpu.memory_space<vmem>>, %arg10: memref<1x96xf32, #tpu.memory_space<vmem>>, %arg11: memref<32x32xbf16, #tpu.memory_space<vmem>>, %arg12: memref<1x32xf32, #tpu.memory_space<vmem>>, %arg13: memref<1x32xf32, #tpu.memory_space<vmem>>, %arg14: memref<1x32xf32, #tpu.memory_space<vmem>>, %arg15: memref<32x64xbf16, #tpu.memory_space<vmem>>, %arg16: memref<1x64xf32, #tpu.memory_space<vmem>>, %arg17: memref<1x64xf32, #tpu.memory_space<vmem>>, %arg18: memref<1x64xf32, #tpu.memory_space<vmem>>, %arg19: memref<64x32xbf16, #tpu.memory_space<vmem>>, %arg20: memref<1x32xf32, #tpu.memory_space<vmem>>, %arg21: memref<1x32xf32, #tpu.memory_space<vmem>>, %arg22: memref<1x12x32xbf16, #tpu.memory_space<vmem>>) attributes {dimension_semantics = [#tpu.dimension_semantics<parallel>], iteration_bounds = array<i64: 2>, scalar_prefetch = 0 : i64, scratch_operands = 0 : i64, tpu.core_type = #tpu.core_type<tc>, window_params = [{transform_indices = @transform_0, window_bounds = array<i64: 1, 12, 32>}, {transform_indices = @transform_1, window_bounds = array<i64: 1, 1, 12>}, {transform_indices = @transform_2, window_bounds = array<i64: 1, 4, 12, 12>}, {pipeline_mode = #tpu.pipeline_mode<synchronous>, transform_indices = @transform_3, window_bounds = array<i64: 1, 1>}, {pipeline_mode = #tpu.pipeline_mode<synchronous>, transform_indices = @transform_4, window_bounds = array<i64: 1, 1>}, {pipeline_mode = #tpu.pipeline_mode<synchronous>, transform_indices = @transform_5, window_bounds = array<i64: 1, 1>}, {pipeline_mode = #tpu.pipeline_mode<synchronous>, transform_indices = @transform_6, window_bounds = array<i64: 1, 32>}, {pipeline_mode = #tpu.pipeline_mode<synchronous>, transform_indices = @transform_7, window_bounds = array<i64: 1, 32>}, {pipeline_mode = #tpu.pipeline_mode<synchronous>, transform_indices = @transform_8, window_bounds = array<i64: 32, 96>}, {pipeline_mode = #tpu.pipeline_mode<synchronous>, transform_indices = @transform_9, window_bounds = array<i64: 1, 96>}, {pipeline_mode = #tpu.pipeline_mode<synchronous>, transform_indices = @transform_10, window_bounds = array<i64: 32, 32>}, {pipeline_mode = #tpu.pipeline_mode<synchronous>, transform_indices = @transform_11, window_bounds = array<i64: 1, 32>}, {pipeline_mode = #tpu.pipeline_mode<synchronous>, transform_indices = @transform_12, window_bounds = array<i64: 1, 32>}, {pipeline_mode = #tpu.pipeline_mode<synchronous>, transform_indices = @transform_13, window_bounds = array<i64: 1, 32>}, {pipeline_mode = #tpu.pipeline_mode<synchronous>, transform_indices = @transform_14, window_bounds = array<i64: 32, 64>}, {pipeline_mode = #tpu.pipeline_mode<synchronous>, transform_indices = @transform_15, window_bounds = array<i64: 1, 64>}, {pipeline_mode = #tpu.pipeline_mode<synchronous>, transform_indices = @transform_16, window_bounds = array<i64: 1, 64>}, {pipeline_mode = #tpu.pipeline_mode<synchronous>, transform_indices = @transform_17, window_bounds = array<i64: 1, 64>}, {pipeline_mode = #tpu.pipeline_mode<synchronous>, transform_indices = @transform_18, window_bounds = array<i64: 64, 32>}, {pipeline_mode = #tpu.pipeline_mode<synchronous>, transform_indices = @transform_19, window_bounds = array<i64: 1, 32>}, {pipeline_mode = #tpu.pipeline_mode<synchronous>, transform_indices = @transform_20, window_bounds = array<i64: 1, 32>}, {transform_indices = @transform_21, window_bounds = array<i64: 1, 12, 32>}]} {
    %c0 = arith.constant 0 : index
    %c0_0 = arith.constant 0 : index
    %c0_1 = arith.constant 0 : index
    %0 = vector.load %arg1[%c0, %c0_0, %c0_1] : memref<1x12x32xbf16, #tpu.memory_space<vmem>>, vector<1x12x32xbf16>
    %1 = vector.shape_cast %0 : vector<1x12x32xbf16> to vector<12x32xbf16>
    %2 = arith.extf %1 : vector<12x32xbf16> to vector<12x32xf32>
    %c0_2 = arith.constant 0 : index
    %c0_3 = arith.constant 0 : index
    %c0_4 = arith.constant 0 : index
    %3 = vector.load %arg2[%c0_2, %c0_3, %c0_4] : memref<1x1x12xf32, #tpu.memory_space<vmem>>, vector<1x1x12xf32>
    %4 = vector.shape_cast %3 : vector<1x1x12xf32> to vector<1x12xf32>
    %c0_5 = arith.constant 0 : index
    %c0_6 = arith.constant 0 : index
    %5 = vector.load %arg4[%c0_5, %c0_6] : memref<1x1xf32, #tpu.memory_space<vmem>>, vector<1x1xf32>
    %6 = vector.broadcast %5 : vector<1x1xf32> to vector<12x32xf32>
    %7 = arith.mulf %6, %2 : vector<12x32xf32>
    %8 = math.tanh %7 : vector<12x32xf32>
    %c0_7 = arith.constant 0 : index
    %c0_8 = arith.constant 0 : index
    %9 = vector.load %arg7[%c0_7, %c0_8] : memref<1x32xf32, #tpu.memory_space<vmem>>, vector<1x32xf32>
    %10 = vector.broadcast %9 : vector<1x32xf32> to vector<12x32xf32>
    %11 = arith.mulf %8, %10 : vector<12x32xf32>
    %c0_9 = arith.constant 0 : index
    %c0_10 = arith.constant 0 : index
    %12 = vector.load %arg8[%c0_9, %c0_10] : memref<1x32xf32, #tpu.memory_space<vmem>>, vector<1x32xf32>
    %13 = vector.broadcast %12 : vector<1x32xf32> to vector<12x32xf32>
    %14 = arith.addf %11, %13 : vector<12x32xf32>
    %15 = arith.truncf %14 : vector<12x32xf32> to vector<12x32xbf16>
    %c0_11 = arith.constant 0 : index
    %c0_12 = arith.constant 0 : index
    %16 = vector.load %arg9[%c0_11, %c0_12] : memref<32x96xbf16, #tpu.memory_space<vmem>>, vector<32x96xbf16>
    %cst = arith.constant dense<0.000000e+00> : vector<12x96xf32>
    %17 = tpu.matmul %15, %16, %cst {dimension_numbers = #tpu.dot_dimension_numbers<[1], [0], [0], [1], [0, 0, 1, 1], [], []>} : vector<12x32xbf16>, vector<32x96xbf16>, vector<12x96xf32> -> vector<12x96xf32>
    %c0_13 = arith.constant 0 : index
    %c0_14 = arith.constant 0 : index
    %18 = vector.load %arg10[%c0_13, %c0_14] : memref<1x96xf32, #tpu.memory_space<vmem>>, vector<1x96xf32>
    %19 = vector.broadcast %18 : vector<1x96xf32> to vector<12x96xf32>
    %20 = arith.addf %17, %19 : vector<12x96xf32>
    %21 = vector.extract_strided_slice %20 {offsets = [0, 0], sizes = [12, 8], strides = [1, 1]} : vector<12x96xf32> to vector<12x8xf32>
    %22 = vector.extract_strided_slice %20 {offsets = [0, 32], sizes = [12, 8], strides = [1, 1]} : vector<12x96xf32> to vector<12x8xf32>
    %23 = vector.extract_strided_slice %20 {offsets = [0, 64], sizes = [12, 8], strides = [1, 1]} : vector<12x96xf32> to vector<12x8xf32>
    %24 = arith.truncf %21 : vector<12x8xf32> to vector<12x8xbf16>
    %25 = arith.truncf %22 : vector<12x8xf32> to vector<12x8xbf16>
    %cst_15 = arith.constant dense<0.000000e+00> : vector<12x12xf32>
    %26 = tpu.matmul %24, %25, %cst_15 {dimension_numbers = #tpu.dot_dimension_numbers<[1], [1], [0], [0], [0, 0, 1, 0], [], []>} : vector<12x8xbf16>, vector<12x8xbf16>, vector<12x12xf32> -> vector<12x12xf32>
    %c0_16 = arith.constant 0 : index
    %c0_17 = arith.constant 0 : index
    %c0_18 = arith.constant 0 : index
    %c0_19 = arith.constant 0 : index
    %27 = vector.load %arg3[%c0_16, %c0_17, %c0_18, %c0_19] : memref<1x4x12x12xbf16, #tpu.memory_space<vmem>>, vector<1x1x12x12xbf16>
    %28 = vector.shape_cast %27 : vector<1x1x12x12xbf16> to vector<12x12xbf16>
    %29 = arith.extf %28 : vector<12x12xbf16> to vector<12x12xf32>
    %30 = arith.addf %26, %29 : vector<12x12xf32>
    %31 = vector.broadcast %4 : vector<1x12xf32> to vector<12x12xf32>
    %32 = arith.addf %30, %31 : vector<12x12xf32>
    %cst_20 = arith.constant dense<0xFF800000> : vector<12xf32>
    %33 = vector.multi_reduction <maximumf>, %32, %cst_20 [1] : vector<12x12xf32> to vector<12xf32>
    %34 = vector.shape_cast %33 : vector<12xf32> to vector<12x1xf32>
    %35 = vector.broadcast %34 : vector<12x1xf32> to vector<12x12xf32>
    %36 = arith.subf %32, %35 : vector<12x12xf32>
    %37 = math.exp %36 : vector<12x12xf32>
    %cst_21 = arith.constant dense<0.000000e+00> : vector<12xf32>
    %38 = vector.multi_reduction <add>, %37, %cst_21 [1] : vector<12x12xf32> to vector<12xf32>
    %39 = vector.shape_cast %38 : vector<12xf32> to vector<12x1xf32>
    %40 = tpu.reciprocal %39 {approx = true} : vector<12x1xf32> -> vector<12x1xf32>
    %41 = vector.broadcast %40 : vector<12x1xf32> to vector<12x12xf32>
    %42 = arith.mulf %37, %41 : vector<12x12xf32>
    %43 = arith.truncf %42 : vector<12x12xf32> to vector<12x12xbf16>
    %44 = arith.truncf %23 : vector<12x8xf32> to vector<12x8xbf16>
    %cst_22 = arith.constant dense<0.000000e+00> : vector<12x8xf32>
    %45 = tpu.matmul %43, %44, %cst_22 {dimension_numbers = #tpu.dot_dimension_numbers<[1], [0], [0], [1], [0, 0, 1, 1], [], []>} : vector<12x12xbf16>, vector<12x8xbf16>, vector<12x8xf32> -> vector<12x8xf32>
    %46 = vector.extract_strided_slice %20 {offsets = [0, 8], sizes = [12, 8], strides = [1, 1]} : vector<12x96xf32> to vector<12x8xf32>
    %47 = vector.extract_strided_slice %20 {offsets = [0, 40], sizes = [12, 8], strides = [1, 1]} : vector<12x96xf32> to vector<12x8xf32>
    %48 = vector.extract_strided_slice %20 {offsets = [0, 72], sizes = [12, 8], strides = [1, 1]} : vector<12x96xf32> to vector<12x8xf32>
    %49 = arith.truncf %46 : vector<12x8xf32> to vector<12x8xbf16>
    %50 = arith.truncf %47 : vector<12x8xf32> to vector<12x8xbf16>
    %cst_23 = arith.constant dense<0.000000e+00> : vector<12x12xf32>
    %51 = tpu.matmul %49, %50, %cst_23 {dimension_numbers = #tpu.dot_dimension_numbers<[1], [1], [0], [0], [0, 0, 1, 0], [], []>} : vector<12x8xbf16>, vector<12x8xbf16>, vector<12x12xf32> -> vector<12x12xf32>
    %c0_24 = arith.constant 0 : index
    %c1 = arith.constant 1 : index
    %c0_25 = arith.constant 0 : index
    %c0_26 = arith.constant 0 : index
    %52 = vector.load %arg3[%c0_24, %c1, %c0_25, %c0_26] : memref<1x4x12x12xbf16, #tpu.memory_space<vmem>>, vector<1x1x12x12xbf16>
    %53 = vector.shape_cast %52 : vector<1x1x12x12xbf16> to vector<12x12xbf16>
    %54 = arith.extf %53 : vector<12x12xbf16> to vector<12x12xf32>
    %55 = arith.addf %51, %54 : vector<12x12xf32>
    %56 = vector.broadcast %4 : vector<1x12xf32> to vector<12x12xf32>
    %57 = arith.addf %55, %56 : vector<12x12xf32>
    %cst_27 = arith.constant dense<0xFF800000> : vector<12xf32>
    %58 = vector.multi_reduction <maximumf>, %57, %cst_27 [1] : vector<12x12xf32> to vector<12xf32>
    %59 = vector.shape_cast %58 : vector<12xf32> to vector<12x1xf32>
    %60 = vector.broadcast %59 : vector<12x1xf32> to vector<12x12xf32>
    %61 = arith.subf %57, %60 : vector<12x12xf32>
    %62 = math.exp %61 : vector<12x12xf32>
    %cst_28 = arith.constant dense<0.000000e+00> : vector<12xf32>
    %63 = vector.multi_reduction <add>, %62, %cst_28 [1] : vector<12x12xf32> to vector<12xf32>
    %64 = vector.shape_cast %63 : vector<12xf32> to vector<12x1xf32>
    %65 = tpu.reciprocal %64 {approx = true} : vector<12x1xf32> -> vector<12x1xf32>
    %66 = vector.broadcast %65 : vector<12x1xf32> to vector<12x12xf32>
    %67 = arith.mulf %62, %66 : vector<12x12xf32>
    %68 = arith.truncf %67 : vector<12x12xf32> to vector<12x12xbf16>
    %69 = arith.truncf %48 : vector<12x8xf32> to vector<12x8xbf16>
    %cst_29 = arith.constant dense<0.000000e+00> : vector<12x8xf32>
    %70 = tpu.matmul %68, %69, %cst_29 {dimension_numbers = #tpu.dot_dimension_numbers<[1], [0], [0], [1], [0, 0, 1, 1], [], []>} : vector<12x12xbf16>, vector<12x8xbf16>, vector<12x8xf32> -> vector<12x8xf32>
    %71 = vector.extract_strided_slice %20 {offsets = [0, 16], sizes = [12, 8], strides = [1, 1]} : vector<12x96xf32> to vector<12x8xf32>
    %72 = vector.extract_strided_slice %20 {offsets = [0, 48], sizes = [12, 8], strides = [1, 1]} : vector<12x96xf32> to vector<12x8xf32>
    %73 = vector.extract_strided_slice %20 {offsets = [0, 80], sizes = [12, 8], strides = [1, 1]} : vector<12x96xf32> to vector<12x8xf32>
    %74 = arith.truncf %71 : vector<12x8xf32> to vector<12x8xbf16>
    %75 = arith.truncf %72 : vector<12x8xf32> to vector<12x8xbf16>
    %cst_30 = arith.constant dense<0.000000e+00> : vector<12x12xf32>
    %76 = tpu.matmul %74, %75, %cst_30 {dimension_numbers = #tpu.dot_dimension_numbers<[1], [1], [0], [0], [0, 0, 1, 0], [], []>} : vector<12x8xbf16>, vector<12x8xbf16>, vector<12x12xf32> -> vector<12x12xf32>
    %c0_31 = arith.constant 0 : index
    %c2 = arith.constant 2 : index
    %c0_32 = arith.constant 0 : index
    %c0_33 = arith.constant 0 : index
    %77 = vector.load %arg3[%c0_31, %c2, %c0_32, %c0_33] : memref<1x4x12x12xbf16, #tpu.memory_space<vmem>>, vector<1x1x12x12xbf16>
    %78 = vector.shape_cast %77 : vector<1x1x12x12xbf16> to vector<12x12xbf16>
    %79 = arith.extf %78 : vector<12x12xbf16> to vector<12x12xf32>
    %80 = arith.addf %76, %79 : vector<12x12xf32>
    %81 = vector.broadcast %4 : vector<1x12xf32> to vector<12x12xf32>
    %82 = arith.addf %80, %81 : vector<12x12xf32>
    %cst_34 = arith.constant dense<0xFF800000> : vector<12xf32>
    %83 = vector.multi_reduction <maximumf>, %82, %cst_34 [1] : vector<12x12xf32> to vector<12xf32>
    %84 = vector.shape_cast %83 : vector<12xf32> to vector<12x1xf32>
    %85 = vector.broadcast %84 : vector<12x1xf32> to vector<12x12xf32>
    %86 = arith.subf %82, %85 : vector<12x12xf32>
    %87 = math.exp %86 : vector<12x12xf32>
    %cst_35 = arith.constant dense<0.000000e+00> : vector<12xf32>
    %88 = vector.multi_reduction <add>, %87, %cst_35 [1] : vector<12x12xf32> to vector<12xf32>
    %89 = vector.shape_cast %88 : vector<12xf32> to vector<12x1xf32>
    %90 = tpu.reciprocal %89 {approx = true} : vector<12x1xf32> -> vector<12x1xf32>
    %91 = vector.broadcast %90 : vector<12x1xf32> to vector<12x12xf32>
    %92 = arith.mulf %87, %91 : vector<12x12xf32>
    %93 = arith.truncf %92 : vector<12x12xf32> to vector<12x12xbf16>
    %94 = arith.truncf %73 : vector<12x8xf32> to vector<12x8xbf16>
    %cst_36 = arith.constant dense<0.000000e+00> : vector<12x8xf32>
    %95 = tpu.matmul %93, %94, %cst_36 {dimension_numbers = #tpu.dot_dimension_numbers<[1], [0], [0], [1], [0, 0, 1, 1], [], []>} : vector<12x12xbf16>, vector<12x8xbf16>, vector<12x8xf32> -> vector<12x8xf32>
    %96 = vector.extract_strided_slice %20 {offsets = [0, 24], sizes = [12, 8], strides = [1, 1]} : vector<12x96xf32> to vector<12x8xf32>
    %97 = vector.extract_strided_slice %20 {offsets = [0, 56], sizes = [12, 8], strides = [1, 1]} : vector<12x96xf32> to vector<12x8xf32>
    %98 = vector.extract_strided_slice %20 {offsets = [0, 88], sizes = [12, 8], strides = [1, 1]} : vector<12x96xf32> to vector<12x8xf32>
    %99 = arith.truncf %96 : vector<12x8xf32> to vector<12x8xbf16>
    %100 = arith.truncf %97 : vector<12x8xf32> to vector<12x8xbf16>
    %cst_37 = arith.constant dense<0.000000e+00> : vector<12x12xf32>
    %101 = tpu.matmul %99, %100, %cst_37 {dimension_numbers = #tpu.dot_dimension_numbers<[1], [1], [0], [0], [0, 0, 1, 0], [], []>} : vector<12x8xbf16>, vector<12x8xbf16>, vector<12x12xf32> -> vector<12x12xf32>
    %c0_38 = arith.constant 0 : index
    %c3 = arith.constant 3 : index
    %c0_39 = arith.constant 0 : index
    %c0_40 = arith.constant 0 : index
    %102 = vector.load %arg3[%c0_38, %c3, %c0_39, %c0_40] : memref<1x4x12x12xbf16, #tpu.memory_space<vmem>>, vector<1x1x12x12xbf16>
    %103 = vector.shape_cast %102 : vector<1x1x12x12xbf16> to vector<12x12xbf16>
    %104 = arith.extf %103 : vector<12x12xbf16> to vector<12x12xf32>
    %105 = arith.addf %101, %104 : vector<12x12xf32>
    %106 = vector.broadcast %4 : vector<1x12xf32> to vector<12x12xf32>
    %107 = arith.addf %105, %106 : vector<12x12xf32>
    %cst_41 = arith.constant dense<0xFF800000> : vector<12xf32>
    %108 = vector.multi_reduction <maximumf>, %107, %cst_41 [1] : vector<12x12xf32> to vector<12xf32>
    %109 = vector.shape_cast %108 : vector<12xf32> to vector<12x1xf32>
    %110 = vector.broadcast %109 : vector<12x1xf32> to vector<12x12xf32>
    %111 = arith.subf %107, %110 : vector<12x12xf32>
    %112 = math.exp %111 : vector<12x12xf32>
    %cst_42 = arith.constant dense<0.000000e+00> : vector<12xf32>
    %113 = vector.multi_reduction <add>, %112, %cst_42 [1] : vector<12x12xf32> to vector<12xf32>
    %114 = vector.shape_cast %113 : vector<12xf32> to vector<12x1xf32>
    %115 = tpu.reciprocal %114 {approx = true} : vector<12x1xf32> -> vector<12x1xf32>
    %116 = vector.broadcast %115 : vector<12x1xf32> to vector<12x12xf32>
    %117 = arith.mulf %112, %116 : vector<12x12xf32>
    %118 = arith.truncf %117 : vector<12x12xf32> to vector<12x12xbf16>
    %119 = arith.truncf %98 : vector<12x8xf32> to vector<12x8xbf16>
    %cst_43 = arith.constant dense<0.000000e+00> : vector<12x8xf32>
    %120 = tpu.matmul %118, %119, %cst_43 {dimension_numbers = #tpu.dot_dimension_numbers<[1], [0], [0], [1], [0, 0, 1, 1], [], []>} : vector<12x12xbf16>, vector<12x8xbf16>, vector<12x8xf32> -> vector<12x8xf32>
    %121 = tpu.concatenate %45, %70, %95, %120 in 1 : vector<12x8xf32>, vector<12x8xf32>, vector<12x8xf32>, vector<12x8xf32> -> vector<12x32xf32>
    %122 = arith.truncf %121 : vector<12x32xf32> to vector<12x32xbf16>
    %c0_44 = arith.constant 0 : index
    %c0_45 = arith.constant 0 : index
    %123 = vector.load %arg11[%c0_44, %c0_45] : memref<32x32xbf16, #tpu.memory_space<vmem>>, vector<32x32xbf16>
    %cst_46 = arith.constant dense<0.000000e+00> : vector<12x32xf32>
    %124 = tpu.matmul %122, %123, %cst_46 {dimension_numbers = #tpu.dot_dimension_numbers<[1], [0], [0], [1], [0, 0, 1, 1], [], []>} : vector<12x32xbf16>, vector<32x32xbf16>, vector<12x32xf32> -> vector<12x32xf32>
    %c0_47 = arith.constant 0 : index
    %c0_48 = arith.constant 0 : index
    %125 = vector.load %arg12[%c0_47, %c0_48] : memref<1x32xf32, #tpu.memory_space<vmem>>, vector<1x32xf32>
    %126 = vector.broadcast %125 : vector<1x32xf32> to vector<12x32xf32>
    %127 = arith.addf %124, %126 : vector<12x32xf32>
    %128 = arith.addf %2, %127 : vector<12x32xf32>
    %c0_49 = arith.constant 0 : index
    %c0_50 = arith.constant 0 : index
    %129 = vector.load %arg5[%c0_49, %c0_50] : memref<1x1xf32, #tpu.memory_space<vmem>>, vector<1x1xf32>
    %130 = vector.broadcast %129 : vector<1x1xf32> to vector<12x32xf32>
    %131 = arith.mulf %130, %128 : vector<12x32xf32>
    %132 = math.tanh %131 : vector<12x32xf32>
    %c0_51 = arith.constant 0 : index
    %c0_52 = arith.constant 0 : index
    %133 = vector.load %arg13[%c0_51, %c0_52] : memref<1x32xf32, #tpu.memory_space<vmem>>, vector<1x32xf32>
    %134 = vector.broadcast %133 : vector<1x32xf32> to vector<12x32xf32>
    %135 = arith.mulf %132, %134 : vector<12x32xf32>
    %c0_53 = arith.constant 0 : index
    %c0_54 = arith.constant 0 : index
    %136 = vector.load %arg14[%c0_53, %c0_54] : memref<1x32xf32, #tpu.memory_space<vmem>>, vector<1x32xf32>
    %137 = vector.broadcast %136 : vector<1x32xf32> to vector<12x32xf32>
    %138 = arith.addf %135, %137 : vector<12x32xf32>
    %139 = arith.truncf %138 : vector<12x32xf32> to vector<12x32xbf16>
    %c0_55 = arith.constant 0 : index
    %c0_56 = arith.constant 0 : index
    %140 = vector.load %arg15[%c0_55, %c0_56] : memref<32x64xbf16, #tpu.memory_space<vmem>>, vector<32x64xbf16>
    %cst_57 = arith.constant dense<0.000000e+00> : vector<12x64xf32>
    %141 = tpu.matmul %139, %140, %cst_57 {dimension_numbers = #tpu.dot_dimension_numbers<[1], [0], [0], [1], [0, 0, 1, 1], [], []>} : vector<12x32xbf16>, vector<32x64xbf16>, vector<12x64xf32> -> vector<12x64xf32>
    %c0_58 = arith.constant 0 : index
    %c0_59 = arith.constant 0 : index
    %142 = vector.load %arg16[%c0_58, %c0_59] : memref<1x64xf32, #tpu.memory_space<vmem>>, vector<1x64xf32>
    %143 = vector.broadcast %142 : vector<1x64xf32> to vector<12x64xf32>
    %144 = arith.addf %141, %143 : vector<12x64xf32>
    %cst_60 = arith.constant 5.000000e-01 : f32
    %145 = vector.broadcast %cst_60 : f32 to vector<12x64xf32>
    %146 = arith.mulf %145, %144 : vector<12x64xf32>
    %cst_61 = arith.constant 4.471500e-02 : f32
    %147 = vector.broadcast %cst_61 : f32 to vector<12x64xf32>
    %148 = arith.mulf %147, %144 : vector<12x64xf32>
    %149 = arith.mulf %148, %144 : vector<12x64xf32>
    %150 = arith.mulf %149, %144 : vector<12x64xf32>
    %151 = arith.addf %144, %150 : vector<12x64xf32>
    %cst_62 = arith.constant 0.797884583 : f32
    %152 = vector.broadcast %cst_62 : f32 to vector<12x64xf32>
    %153 = arith.mulf %152, %151 : vector<12x64xf32>
    %154 = math.tanh %153 : vector<12x64xf32>
    %cst_63 = arith.constant 1.000000e+00 : f32
    %155 = vector.broadcast %cst_63 : f32 to vector<12x64xf32>
    %156 = arith.addf %155, %154 : vector<12x64xf32>
    %157 = arith.mulf %146, %156 : vector<12x64xf32>
    %c0_64 = arith.constant 0 : index
    %c0_65 = arith.constant 0 : index
    %158 = vector.load %arg6[%c0_64, %c0_65] : memref<1x1xf32, #tpu.memory_space<vmem>>, vector<1x1xf32>
    %159 = vector.broadcast %158 : vector<1x1xf32> to vector<12x64xf32>
    %160 = arith.mulf %159, %157 : vector<12x64xf32>
    %161 = math.tanh %160 : vector<12x64xf32>
    %c0_66 = arith.constant 0 : index
    %c0_67 = arith.constant 0 : index
    %162 = vector.load %arg17[%c0_66, %c0_67] : memref<1x64xf32, #tpu.memory_space<vmem>>, vector<1x64xf32>
    %163 = vector.broadcast %162 : vector<1x64xf32> to vector<12x64xf32>
    %164 = arith.mulf %161, %163 : vector<12x64xf32>
    %c0_68 = arith.constant 0 : index
    %c0_69 = arith.constant 0 : index
    %165 = vector.load %arg18[%c0_68, %c0_69] : memref<1x64xf32, #tpu.memory_space<vmem>>, vector<1x64xf32>
    %166 = vector.broadcast %165 : vector<1x64xf32> to vector<12x64xf32>
    %167 = arith.addf %164, %166 : vector<12x64xf32>
    %168 = arith.truncf %167 : vector<12x64xf32> to vector<12x64xbf16>
    %c0_70 = arith.constant 0 : index
    %c0_71 = arith.constant 0 : index
    %169 = vector.load %arg19[%c0_70, %c0_71] : memref<64x32xbf16, #tpu.memory_space<vmem>>, vector<64x32xbf16>
    %cst_72 = arith.constant dense<0.000000e+00> : vector<12x32xf32>
    %170 = tpu.matmul %168, %169, %cst_72 {dimension_numbers = #tpu.dot_dimension_numbers<[1], [0], [0], [1], [0, 0, 1, 1], [], []>} : vector<12x64xbf16>, vector<64x32xbf16>, vector<12x32xf32> -> vector<12x32xf32>
    %c0_73 = arith.constant 0 : index
    %c0_74 = arith.constant 0 : index
    %171 = vector.load %arg20[%c0_73, %c0_74] : memref<1x32xf32, #tpu.memory_space<vmem>>, vector<1x32xf32>
    %172 = vector.broadcast %171 : vector<1x32xf32> to vector<12x32xf32>
    %173 = arith.addf %170, %172 : vector<12x32xf32>
    %c0_75 = arith.constant 0 : index
    %c0_76 = arith.constant 0 : index
    %174 = vector.load %arg21[%c0_75, %c0_76] : memref<1x32xf32, #tpu.memory_space<vmem>>, vector<1x32xf32>
    %175 = arith.addf %127, %173 : vector<12x32xf32>
    %176 = vector.broadcast %174 : vector<1x32xf32> to vector<12x32xf32>
    %177 = arith.mulf %176, %175 : vector<12x32xf32>
    %178 = arith.addf %2, %177 : vector<12x32xf32>
    %179 = arith.truncf %178 : vector<12x32xf32> to vector<12x32xbf16>
    %c0_77 = arith.constant 0 : index
    %c0_78 = arith.constant 0 : index
    %c0_79 = arith.constant 0 : index
    %180 = vector.load %arg22[%c0_77, %c0_78, %c0_79] : memref<1x12x32xbf16, #tpu.memory_space<vmem>>, vector<1x12x32xbf16>
    %181 = vector.shape_cast %180 : vector<1x12x32xbf16> to vector<12x32xbf16>
    %182 = vector.shape_cast %179 : vector<12x32xbf16> to vector<1x12x32xbf16>
    tpu.vector_store %arg22[%c0_77, %c0_78, %c0_79], %182 {strides = array<i32>} : memref<1x12x32xbf16, #tpu.memory_space<vmem>>, vector<1x12x32xbf16>,
    return
  }
  func.func @transform_0(%arg0: i32) -> (i32, i32, i32) {
    %c0_i32 = arith.constant 0 : i32
    %c0_i32_0 = arith.constant 0 : i32
    %c0_i32_1 = arith.constant 0 : i32
    return %arg0, %c0_i32, %c0_i32_0 : i32, i32, i32
  }
  func.func @transform_1(%arg0: i32) -> (i32, i32, i32) {
    %c0_i32 = arith.constant 0 : i32
    %c0_i32_0 = arith.constant 0 : i32
    %c0_i32_1 = arith.constant 0 : i32
    return %arg0, %c0_i32, %c0_i32_0 : i32, i32, i32
  }
  func.func @transform_2(%arg0: i32) -> (i32, i32, i32, i32) {
    %c0_i32 = arith.constant 0 : i32
    %c0_i32_0 = arith.constant 0 : i32
    %c0_i32_1 = arith.constant 0 : i32
    %c0_i32_2 = arith.constant 0 : i32
    return %arg0, %c0_i32, %c0_i32_0, %c0_i32_1 : i32, i32, i32, i32
  }
  func.func @transform_3(%arg0: i32) -> (i32, i32) {
    %c0_i32 = arith.constant 0 : i32
    %c0_i32_0 = arith.constant 0 : i32
    %c0_i32_1 = arith.constant 0 : i32
    return %c0_i32, %c0_i32_0 : i32, i32
  }
  func.func @transform_4(%arg0: i32) -> (i32, i32) {
    %c0_i32 = arith.constant 0 : i32
    %c0_i32_0 = arith.constant 0 : i32
    %c0_i32_1 = arith.constant 0 : i32
    return %c0_i32, %c0_i32_0 : i32, i32
  }
  func.func @transform_5(%arg0: i32) -> (i32, i32) {
    %c0_i32 = arith.constant 0 : i32
    %c0_i32_0 = arith.constant 0 : i32
    %c0_i32_1 = arith.constant 0 : i32
    return %c0_i32, %c0_i32_0 : i32, i32
  }
  func.func @transform_6(%arg0: i32) -> (i32, i32) {
    %c0_i32 = arith.constant 0 : i32
    %c0_i32_0 = arith.constant 0 : i32
    %c0_i32_1 = arith.constant 0 : i32
    return %c0_i32, %c0_i32_0 : i32, i32
  }
  func.func @transform_7(%arg0: i32) -> (i32, i32) {
    %c0_i32 = arith.constant 0 : i32
    %c0_i32_0 = arith.constant 0 : i32
    %c0_i32_1 = arith.constant 0 : i32
    return %c0_i32, %c0_i32_0 : i32, i32
  }
  func.func @transform_8(%arg0: i32) -> (i32, i32) {
    %c0_i32 = arith.constant 0 : i32
    %c0_i32_0 = arith.constant 0 : i32
    %c0_i32_1 = arith.constant 0 : i32
    return %c0_i32, %c0_i32_0 : i32, i32
  }
  func.func @transform_9(%arg0: i32) -> (i32, i32) {
    %c0_i32 = arith.constant 0 : i32
    %c0_i32_0 = arith.constant 0 : i32
    %c0_i32_1 = arith.constant 0 : i32
    return %c0_i32, %c0_i32_0 : i32, i32
  }
  func.func @transform_10(%arg0: i32) -> (i32, i32) {
    %c0_i32 = arith.constant 0 : i32
    %c0_i32_0 = arith.constant 0 : i32
    %c0_i32_1 = arith.constant 0 : i32
    return %c0_i32, %c0_i32_0 : i32, i32
  }
  func.func @transform_11(%arg0: i32) -> (i32, i32) {
    %c0_i32 = arith.constant 0 : i32
    %c0_i32_0 = arith.constant 0 : i32
    %c0_i32_1 = arith.constant 0 : i32
    return %c0_i32, %c0_i32_0 : i32, i32
  }
  func.func @transform_12(%arg0: i32) -> (i32, i32) {
    %c0_i32 = arith.constant 0 : i32
    %c0_i32_0 = arith.constant 0 : i32
    %c0_i32_1 = arith.constant 0 : i32
    return %c0_i32, %c0_i32_0 : i32, i32
  }
  func.func @transform_13(%arg0: i32) -> (i32, i32) {
    %c0_i32 = arith.constant 0 : i32
    %c0_i32_0 = arith.constant 0 : i32
    %c0_i32_1 = arith.constant 0 : i32
    return %c0_i32, %c0_i32_0 : i32, i32
  }
  func.func @transform_14(%arg0: i32) -> (i32, i32) {
    %c0_i32 = arith.constant 0 : i32
    %c0_i32_0 = arith.constant 0 : i32
    %c0_i32_1 = arith.constant 0 : i32
    return %c0_i32, %c0_i32_0 : i32, i32
  }
  func.func @transform_15(%arg0: i32) -> (i32, i32) {
    %c0_i32 = arith.constant 0 : i32
    %c0_i32_0 = arith.constant 0 : i32
    %c0_i32_1 = arith.constant 0 : i32
    return %c0_i32, %c0_i32_0 : i32, i32
  }
  func.func @transform_16(%arg0: i32) -> (i32, i32) {
    %c0_i32 = arith.constant 0 : i32
    %c0_i32_0 = arith.constant 0 : i32
    %c0_i32_1 = arith.constant 0 : i32
    return %c0_i32, %c0_i32_0 : i32, i32
  }
  func.func @transform_17(%arg0: i32) -> (i32, i32) {
    %c0_i32 = arith.constant 0 : i32
    %c0_i32_0 = arith.constant 0 : i32
    %c0_i32_1 = arith.constant 0 : i32
    return %c0_i32, %c0_i32_0 : i32, i32
  }
  func.func @transform_18(%arg0: i32) -> (i32, i32) {
    %c0_i32 = arith.constant 0 : i32
    %c0_i32_0 = arith.constant 0 : i32
    %c0_i32_1 = arith.constant 0 : i32
    return %c0_i32, %c0_i32_0 : i32, i32
  }
  func.func @transform_19(%arg0: i32) -> (i32, i32) {
    %c0_i32 = arith.constant 0 : i32
    %c0_i32_0 = arith.constant 0 : i32
    %c0_i32_1 = arith.constant 0 : i32
    return %c0_i32, %c0_i32_0 : i32, i32
  }
  func.func @transform_20(%arg0: i32) -> (i32, i32) {
    %c0_i32 = arith.constant 0 : i32
    %c0_i32_0 = arith.constant 0 : i32
    %c0_i32_1 = arith.constant 0 : i32
    return %c0_i32, %c0_i32_0 : i32, i32
  }
  func.func @transform_21(%arg0: i32) -> (i32, i32, i32) {
    %c0_i32 = arith.constant 0 : i32
    %c0_i32_0 = arith.constant 0 : i32
    %c0_i32_1 = arith.constant 0 : i32
    return %arg0, %c0_i32, %c0_i32_0 : i32, i32, i32
  }
}

</mosaic_0001>

<bundles_post_ra>
// kernel: neg.1
= control target key start
LH: loop header
LB: loop body
LE: loop exit
PB: predicated region body
PF: predicated region fallthrough
CT: control target
= control target key end

     0   :  { %s40_s0 = inlined_call_operand.vmem [shape: f32[2,8,8], index: 0, kind: input, shape index: {}]   ;;  %s41_s1 = inlined_call_operand.vmem [shape: f32[2,8,8], index: 1, kind: output, shape index: {}]  }
   0x1   :  { %v2_v0 = vld [vmem:[%s40_s0] sm:$0xff]  ;;  %v16_v1 = vld [vmem:[%s40_s0 + $0x8] sm:$0xff] }
   0x2   :  { %v5_v2 = vxor.u32 2147483648, %v2_v0  ;;  %v12_v3 = vxor.u32 2147483648, %v16_v1 }
   0x4   :  { %7 = vst [vmem:[%s41_s1] sm:$0xff] %v5_v2 }
   0x5   :  { %17 = vst [vmem:[%s41_s1 + $0x8] sm:$0xff] %v12_v3 }

// kernel: pet_body_forward.5
= control target key start
LH: loop header
LB: loop body
LE: loop exit
PB: predicated region body
PF: predicated region fallthrough
CT: control target
= control target key end

     0   :  { %vm48_vm0 = vcmask 1041408   ;;  %v213_v1 = vmov 0   ;;  %vm44_vm1 = vcmask 31744   ;;  %vm144_vm2 = vcmask 523264   ;;  %s298_s1 = inlined_call_operand.vmem [shape: bf16[4,64], index: 1, kind: input, shape index: {}]   ;;  %s299_s0 = inlined_call_operand.vmem [shape: bf16[16,4], index: 0, kind: input, shape index: {}]   ;;  %s300_s3 = inlined_call_operand.<no memory space> [shape: f32[1,1], index: 3, kind: input, shape index: {}]   ;;  %s301_s2 = inlined_call_operand.vmem [shape: f32[1,64], index: 2, kind: input, shape index: {}]   ;;  %s302_s4 = inlined_call_operand.vmem [shape: f32[1,64], index: 4, kind: input, shape index: {}]   ;;  %s303_s5 = inlined_call_operand.vmem [shape: f32[1,64], index: 5, kind: input, shape index: {}]   ;;  %s304_s7 = inlined_call_operand.vmem [shape: f32[1,32], index: 7, kind: input, shape index: {}]   ;;  %s305_s6 = inlined_call_operand.vmem [shape: bf16[64,32], index: 6, kind: input, shape index: {}]   ;;  %s306_s8 = inlined_call_operand.vmem [shape: bf16[16,32], index: 8, kind: output, shape index: {}]  }
   0x1   :  { %v34_v0 = vld [vmem:[%s298_s1] sm:$0x3]  ;;  %199 = vset.pattern.permute.xlu0 %v213_v1  ;;  %v13_v2 = vstv %s300_s3  ;;  %v197_v7 = vld [vmem:[%s305_s6 + $0x18] sm:$0xff]  ;;  %v196_v10 = vld [vmem:[%s305_s6 + $0x10] sm:$0xff]  ;;  %vm164_vm3 = vcmask 257024  }
   0x2   :  { %v50_v3 = vsel %vm48_vm0, %v34_v0, 0  ;;  %v193_v4 = vld [vmem:[%s299_s0] sm:$0xff]  ;;  %14 = vst [vmem:[#allocation2] sm:$0x1] %v13_v2  ;;  %152 = vmatpush.bf16.msra.mxu1 %v197_v7  ;;  %v195_v12 = vld [vmem:[%s305_s6 + $0x8] sm:$0xff] }
   0x3   :  { %59 = vmatpush.bf16.msra.mxu0 %v50_v3  ;;  %v201_v6 = vld [vmem:[%s301_s2] ss:$0 sm:$0xff] }
   0x4   :  { %v194_v16 = vld [vmem:[%s305_s6] sm:$0xff] }
   0x5   :  { %v202_v36 = vld [vmem:[%s302_s4] ss:$0 sm:$0xff] }
   0x6   :  { %175 = vmatmul.msk.bf16.vlgmr.msra.gmra.mxu0 %vm44_vm1, %v193_v4  ;;  %153 = vmatpush.bf16.msra.mxu1 %v196_v10  ;;  %v203_v39 = vld [vmem:[%s303_s5] ss:$0 sm:$0xff] }
   0x7   :  { %v204_v45 = vld [vmem:[%s304_s7] ss:$0 sm:$0xff] }
   0x9   :  { %v200_v5 = vld [vmem:[#allocation2] ss:$0 sm:$0xff] }
   0xa   :  { %88 = vperm.xlu0 %199, %v200_v5   ;;  %154 = vmatpush.bf16.msra.mxu1 %v195_v12 }
   0xe   :  { %155 = vmatpush.bf16.msra.mxu1 %v194_v16 }
  0x7c   :  { %v89_v29 = vpop.permute.xlu0 %88 }
  0x83   :  { %v61_v8 = vpop.f32.mrf.mxu0 }
  0x84   :  { %v62_v9 = vadd.f32 %v201_v6, %v61_v8 }
  0x86   :  { %v68_v11 = vmul.f32 0.044715, %v62_v9  ;;  %v66_v26 = vmul.f32 0.5, %v62_v9 }
  0x88   :  { %v70_v13 = vmul.f32 %v68_v11, %v62_v9 }
  0x8a   :  { %v72_v14 = vmul.f32 %v70_v13, %v62_v9 }
  0x8b   :  { %v63_v15 = vpop.f32.mrf.mxu0 }
  0x8c   :  { %v64_v17 = vadd.f32 %v201_v6, %v63_v15  ;;  %v74_v18 = vadd.f32 %v72_v14, %v62_v9 }
  0x8e   :  { %v69_v19 = vmul.f32 0.044715, %v64_v17  ;;  %v76_v20 = vmul.f32 0.7978846, %v74_v18  ;;  %v67_v32 = vmul.f32 0.5, %v64_v17 }
  0x90   :  { %v71_v21 = vmul.f32 %v69_v19, %v64_v17  ;;  %205 = vtanh.f32 %v76_v20 }
  0x92   :  { %v73_v22 = vmul.f32 %v71_v21, %v64_v17 }
  0x94   :  { %v75_v23 = vadd.f32 %v73_v22, %v64_v17 }
  0x96   :  { %v206_v24 = vpop.eup %205  ;;  %v77_v25 = vmul.f32 0.7978846, %v75_v23 }
  0x97   :  { %v80_v27 = vadd.f32 1.0, %v206_v24 }
  0x98   :  { %207 = vtanh.f32 %v77_v25 }
  0x99   :  { %v82_v28 = vmul.f32 %v80_v27, %v66_v26 }
  0x9b   :  { %v91_v30 = vmul.f32 %v89_v29, %v82_v28 }
  0x9d   :  { %209 = vtanh.f32 %v91_v30 }
  0x9e   :  { %v208_v31 = vpop.eup %207 }
  0x9f   :  { %v81_v33 = vadd.f32 1.0, %v208_v31 }
  0xa1   :  { %v83_v34 = vmul.f32 %v81_v33, %v67_v32 }
  0xa3   :  { %v92_v35 = vmul.f32 %v89_v29, %v83_v34  ;;  %v210_v37 = vpop.eup %209 }
  0xa4   :  { %v99_v38 = vmul.f32 %v210_v37, %v202_v36 }
  0xa5   :  { %211 = vtanh.f32 %v92_v35 }
  0xa6   :  { %v105_v42 = vadd.f32 %v203_v39, %v99_v38 }
  0xab   :  { %v212_v40 = vpop.eup %211 }
  0xac   :  { %v100_v41 = vmul.f32 %v212_v40, %v202_v36 }
  0xae   :  { %v106_v43 = vadd.f32 %v203_v39, %v100_v41 }
  0xb0   :  { %v107_v44 = vpack.c.bf16 %v106_v43, %v105_v42 }
  0xb2   :  { %192 = vmatmul.msk.bf16.vlgmr.msra.gmra.mxu1 %vm144_vm2, %v107_v44 }
 0x12f   :  { %v157_v46 = vpop.f32.mrf.mxu1 }
 0x130   :  { %v158_v47 = vadd.f32 %v204_v45, %v157_v46 }
 0x132   :  { %v162_v48 = vpack.c.bf16 %v158_v47, %v158_v47 }
 0x134   :  { %165 = vst.msk [vmem:[%s306_s8] sm:$0xf] %vm164_vm3, %v162_v48 }
 0x137   :  { %v159_v49 = vpop.f32.mrf.mxu1 }
 0x138   :  { %v160_v50 = vadd.f32 %v204_v45, %v159_v49 }
 0x13a   :  { %v163_v51 = vpack.c.bf16 %v160_v50, %v160_v50 }
 0x13c   :  { %166 = vst.msk [vmem:[%s306_s8 + $0x4] sm:$0xf] %vm164_vm3, %v163_v51 }

// kernel: pet_body_forward.6
= control target key start
LH: loop header
LB: loop body
LE: loop exit
PB: predicated region body
PF: predicated region fallthrough
CT: control target
= control target key end

     0   :  { %vm74_vm0 = vcmask 1045504   ;;  %v389_v2 = vmov 0   ;;  %vm64_vm1 = vcmask 97280   ;;  %vm214_vm5 = vcmask 392192   ;;  %s484_s1 = inlined_call_operand.vmem [shape: bf16[12,64], index: 1, kind: input, shape index: {}]   ;;  %s485_s3 = inlined_call_operand.<no memory space> [shape: f32[1,1], index: 3, kind: input, shape index: {}]   ;;  %s486_s0 = inlined_call_operand.vmem [shape: bf16[48,12], index: 0, kind: input, shape index: {}]   ;;  %s487_s2 = inlined_call_operand.vmem [shape: f32[1,64], index: 2, kind: input, shape index: {}]   ;;  %s488_s4 = inlined_call_operand.vmem [shape: f32[1,64], index: 4, kind: input, shape index: {}]   ;;  %s489_s5 = inlined_call_operand.vmem [shape: f32[1,64], index: 5, kind: input, shape index: {}]   ;;  %s490_s6 = inlined_call_operand.vmem [shape: bf16[64,32], index: 6, kind: input, shape index: {}]   ;;  %s491_s7 = inlined_call_operand.vmem [shape: f32[1,32], index: 7, kind: input, shape index: {}]   ;;  %s492_s8 = inlined_call_operand.vmem [shape: f32[16,32], index: 8, kind: output, shape index: {}]  }
   0x1   :  { %v322_v0 = vld [vmem:[%s484_s1] sm:$0xf]  ;;  %v351_v1 = vld [vmem:[%s484_s1] sm:$0x30]  ;;  %359 = vset.pattern.permute.xlu0 %v389_v2  ;;  %v13_v3 = vstv %s485_s3  ;;  %v349_v6 = vld [vmem:[%s486_s0 + $0x8] sm:$0xff]  ;;  %vm283_vm9 = vcmask 523264  }
   0x2   :  { %v323_v4 = vor.u32 %v351_v1, %v322_v0  ;;  %14 = vst [vmem:[#allocation2] sm:$0x1] %v13_v3  ;;  %v348_v7 = vld [vmem:[%s486_s0] sm:$0xff]  ;;  %v350_v9 = vld [vmem:[%s486_s0 + $0x10] sm:$0xff]  ;;  %vm301_vm10 = vcmask 261120  }
   0x3   :  { %v361_v12 = vld [vmem:[%s487_s2] ss:$0 sm:$0xff] }
   0x4   :  { %v76_v5 = vsel %vm74_vm0, %v323_v4, 0 }
   0x5   :  { %356 = vmatpush.bf16.msra.mxu3 %v76_v5  ;;  %85 = vmatpush.bf16.msra.mxu0 %v76_v5 }
   0x8   :  { %325 = vmatmul.msk.bf16.vlgmr.msra.gmra.mxu3 %vm64_vm1, %v349_v6  ;;  %324 = vmatmul.msk.bf16.vlgmr.msra.gmra.mxu0 %vm64_vm1, %v348_v7 }
   0x9   :  { %v360_v8 = vld [vmem:[#allocation2] ss:$0 sm:$0xff] }
   0xa   :  { %160 = vperm.xlu0 %359, %v360_v8  }
  0x18   :  { %326 = vmatmul.msk.bf16.gmra.mxu3 %vm64_vm1, %v350_v9 }
  0x7c   :  { %v161_v5 = vpop.permute.xlu0 %160 }
  0x85   :  { %v87_v10 = vpop.f32.mrf.mxu0 }
  0x86   :  { %v88_v18 = vadd.f32 %v361_v12, %v87_v10 }
  0x88   :  { %v108_v23 = vmul.f32 0.044715, %v88_v18  ;;  %v102_v6 = vmul.f32 0.5, %v88_v18 }
  0x8a   :  { %v114_v29 = vmul.f32 %v108_v23, %v88_v18 }
  0x8b   :  { %v92_v11 = vpop.f32.mrf.mxu3 }
  0x8c   :  { %v93_v14 = vadd.f32 %v361_v12, %v92_v11  ;;  %v120_v35 = vmul.f32 %v114_v29, %v88_v18 }
  0x8d   :  { %v89_v13 = vpop.f32.mrf.mxu0 }
  0x8e   :  { %v90_v15 = vadd.f32 %v361_v12, %v89_v13  ;;  %v110_v19 = vmul.f32 0.044715, %v93_v14  ;;  %v126_v43 = vadd.f32 %v120_v35, %v88_v18  ;;  %v104_v3 = vmul.f32 0.5, %v93_v14 }
  0x90   :  { %v109_v21 = vmul.f32 0.044715, %v90_v15  ;;  %v116_v24 = vmul.f32 %v110_v19, %v93_v14  ;;  %v132_v49 = vmul.f32 0.7978846, %v126_v43  ;;  %v103_v0 = vmul.f32 0.5, %v90_v15 }
  0x91   :  { %v195_v19 = vlaneseq }
  0x92   :  { %v115_v25 = vmul.f32 %v109_v21, %v90_v15  ;;  %v122_v30 = vmul.f32 %v116_v24, %v93_v14 }
  0x93   :  { %v94_v16 = vpop.f32.mrf.mxu3  ;;  %v198_v18 = vshrl.u32 %v195_v19, 7 }
  0x94   :  { %v95_v17 = vadd.f32 %v361_v12, %v94_v16  ;;  %v121_v32 = vmul.f32 %v115_v25, %v90_v15  ;;  %v128_v36 = vadd.f32 %v122_v30, %v93_v14  ;;  %v355_v14 = vld [vmem:[%s490_s6 + $0x18] sm:$0xff]  ;;  %v362_v25 = vld [vmem:[%s488_s4] ss:$0 sm:$0xff] }
  0x95   :  { %291 = vmatpush.bf16.msra.mxu2 %v355_v14  ;;  %v363_v30 = vld [vmem:[%s489_s5] ss:$0 sm:$0xff] }
  0x96   :  { %v111_v20 = vmul.f32 0.044715, %v95_v17  ;;  %v127_v38 = vadd.f32 %v121_v32, %v90_v15  ;;  %v134_v44 = vmul.f32 0.7978846, %v128_v36  ;;  %v105_v60 = vmul.f32 0.5, %v95_v17 }
  0x98   :  { %v117_v22 = vmul.f32 %v111_v20, %v95_v17  ;;  %v133_v47 = vmul.f32 0.7978846, %v127_v38 }
  0x9a   :  { %v123_v26 = vmul.f32 %v117_v22, %v95_v17 }
  0x9b   :  { %v97_v27 = vpop.f32.mrf.mxu3 }
  0x9c   :  { %v98_v28 = vadd.f32 %v361_v12, %v97_v27  ;;  %v129_v33 = vadd.f32 %v123_v26, %v95_v17  ;;  %v196_v26 = vand.u32 127, %v195_v19  ;;  %v200_v27 = vmul.u32 3, %v198_v18 }
  0x9e   :  { %v112_v31 = vmul.f32 0.044715, %v98_v28  ;;  %v135_v39 = vmul.f32 0.7978846, %v129_v33  ;;  %v106_v59 = vmul.f32 0.5, %v98_v28  ;;  %v202_v36 = vsub.s32 %v196_v26, %v200_v27 }
  0xa0   :  { %v118_v34 = vmul.f32 %v112_v31, %v98_v28  ;;  %365 = vtanh.f32 %v135_v39  ;;  %vm204_vm2 = vcmp.ge.s32.totalorder %v202_v36, 0  ;;  %vm206_vm3 = vcmp.lt.s32.totalorder %v202_v36, 3 }
  0xa1   :  { %vm208_vm4 = vmand %vm204_vm2, %vm206_vm3 }
  0xa2   :  { %v124_v37 = vmul.f32 %v118_v34, %v98_v28 }
  0xa3   :  { %v99_v40 = vpop.f32.mrf.mxu3 }
  0xa4   :  { %v130_v41 = vadd.f32 %v124_v37, %v98_v28  ;;  %v100_v42 = vadd.f32 %v361_v12, %v99_v40  ;;  %v199_v37 = vadd.s32 8, %v198_v18 }
  0xa6   :  { %v136_v45 = vmul.f32 0.7978846, %v130_v41  ;;  %v113_v46 = vmul.f32 0.044715, %v100_v42  ;;  %v366_v52 = vpop.eup %365  ;;  %v107_v10 = vmul.f32 0.5, %v100_v42  ;;  %v201_v43 = vmul.u32 3, %v199_v37 }
  0xa7   :  { %v147_v57 = vadd.f32 1.0, %v366_v52  ;;  %v354_v52 = vld [vmem:[%s490_s6 + $0x10] sm:$0xff] }
  0xa8   :  { %367 = vtanh.f32 %v136_v45  ;;  %v119_v48 = vmul.f32 %v113_v46, %v100_v42  ;;  %292 = vmatpush.bf16.msra.mxu2 %v354_v52 }
  0xa9   :  { %369 = vtanh.f32 %v134_v44  ;;  %v153_v2 = vmul.f32 %v147_v57, %v105_v60  ;;  %v364_v60 = vld [vmem:[%s491_s7] ss:$0 sm:$0xff] }
  0xaa   :  { %v125_v50 = vmul.f32 %v119_v48, %v100_v42  ;;  %371 = vtanh.f32 %v133_v47  ;;  %v203_v47 = vsub.s32 %v196_v26, %v201_v43 }
  0xab   :  { %373 = vtanh.f32 %v132_v49  ;;  %v166_v13 = vmul.f32 %v161_v5, %v153_v2  ;;  %v390_v49 = vmov 0.0  }
  0xac   :  { %v131_v51 = vadd.f32 %v125_v50, %v100_v42  ;;  %v327_v50 = vsel %vm208_vm4, 1.0, %v390_v49  ;;  %vm205_vm6 = vcmp.ge.s32.totalorder %v203_v47, 0  ;;  %vm207_vm7 = vcmp.lt.s32.totalorder %v203_v47, 3 }
  0xad   :  { %vm209_vm8 = vmand %vm205_vm6, %vm207_vm7 }
  0xae   :  { %v368_v53 = vpop.eup %367  ;;  %v137_v54 = vmul.f32 0.7978846, %v131_v51  ;;  %v328_v51 = vsel %vm209_vm8, 1.0, %v390_v49 }
  0xaf   :  { %v148_v55 = vadd.f32 1.0, %v368_v53  ;;  %v370_v56 = vpop.eup %369  ;;  %v353_v53 = vld [vmem:[%s490_s6 + $0x8] sm:$0xff] }
  0xb0   :  { %375 = vtanh.f32 %v137_v54  ;;  %v372_v58 = vpop.eup %371  ;;  %v146_v62 = vadd.f32 1.0, %v370_v56  ;;  %293 = vmatpush.bf16.msra.mxu2 %v353_v53  ;;  %v352_v54 = vld [vmem:[%s490_s6] sm:$0xff] }
  0xb1   :  { %v374_v61 = vpop.eup %373  ;;  %v154_v63 = vmul.f32 %v148_v55, %v106_v59  ;;  %v145_v1 = vadd.f32 1.0, %v372_v58 }
  0xb2   :  { %v144_v7 = vadd.f32 1.0, %v374_v61  ;;  %v152_v8 = vmul.f32 %v146_v62, %v104_v3 }
  0xb3   :  { %v167_v9 = vmul.f32 %v161_v5, %v154_v63  ;;  %v151_v12 = vmul.f32 %v145_v1, %v103_v0 }
  0xb4   :  { %v150_v17 = vmul.f32 %v144_v7, %v102_v6  ;;  %v165_v20 = vmul.f32 %v161_v5, %v152_v8  ;;  %294 = vmatpush.bf16.msra.mxu2 %v352_v54 }
  0xb5   :  { %377 = vtanh.f32 %v167_v9  ;;  %v164_v15 = vmul.f32 %v161_v5, %v151_v12 }
  0xb6   :  { %v376_v4 = vpop.eup %375  ;;  %379 = vtanh.f32 %v166_v13  ;;  %v163_v22 = vmul.f32 %v161_v5, %v150_v17 }
  0xb7   :  { %v149_v11 = vadd.f32 1.0, %v376_v4 }
  0xb9   :  { %v155_v16 = vmul.f32 %v149_v11, %v107_v10 }
  0xbb   :  { %v168_v21 = vmul.f32 %v161_v5, %v155_v16  ;;  %v378_v23 = vpop.eup %377 }
  0xbc   :  { %v380_v24 = vpop.eup %379  ;;  %v183_v31 = vmul.f32 %v378_v23, %v362_v25 }
  0xbd   :  { %381 = vtanh.f32 %v168_v21  ;;  %v182_v35 = vmul.f32 %v380_v24, %v362_v25 }
  0xbe   :  { %383 = vtanh.f32 %v165_v20  ;;  %v193_v38 = vadd.f32 %v363_v30, %v183_v31 }
  0xbf   :  { %385 = vtanh.f32 %v164_v15  ;;  %v192_v42 = vadd.f32 %v363_v30, %v182_v35 }
  0xc0   :  { %387 = vtanh.f32 %v163_v22 }
  0xc3   :  { %v382_v28 = vpop.eup %381 }
  0xc4   :  { %v184_v29 = vmul.f32 %v382_v28, %v362_v25  ;;  %v384_v32 = vpop.eup %383 }
  0xc5   :  { %v386_v33 = vpop.eup %385  ;;  %v181_v39 = vmul.f32 %v384_v32, %v362_v25 }
  0xc6   :  { %v194_v34 = vadd.f32 %v363_v30, %v184_v29  ;;  %v388_v40 = vpop.eup %387  ;;  %v180_v41 = vmul.f32 %v386_v33, %v362_v25 }
  0xc7   :  { %v191_v44 = vadd.f32 %v363_v30, %v181_v39  ;;  %v179_v45 = vmul.f32 %v388_v40, %v362_v25 }
  0xc8   :  { %231 = vmatpush.msra.mxu1 %v194_v34  ;;  %v190_v46 = vadd.f32 %v363_v30, %v180_v41 }
  0xc9   :  { %v189_v48 = vadd.f32 %v363_v30, %v179_v45 }
  0xca   :  { %232 = vmatpush.msra.mxu1 %v193_v38 }
  0xcc   :  { %233 = vmatpush.msra.mxu1 %v192_v42 }
  0xce   :  { %234 = vmatpush.msra.mxu1 %v191_v44 }
  0xd0   :  { %235 = vmatpush.msra.mxu1 %v190_v46 }
  0xd2   :  { %236 = vmatpush.msra.mxu1 %v189_v48 }
  0xd3   :  { %329 = vmatmul.msk.f32.vlgmr.msra.gmra.mxu1 %vm214_vm5, %v327_v50 }
  0xdb   :  { %330 = vmatmul.msk.f32.gmra.mxu1 %vm214_vm5, %v328_v51 }
 0x150   :  { %v238_v55 = vpop.f32.mrf.mxu1 }
 0x151   :  { %v244_v57 = vmul.f32 0.33333334, %v238_v55 }
 0x158   :  { %v241_v56 = vpop.f32.mrf.mxu1 }
 0x159   :  { %v245_v58 = vmul.f32 0.33333334, %v241_v56 }
 0x15b   :  { %v246_v59 = vpack.c.bf16 %v245_v58, %v244_v57 }
 0x15d   :  { %347 = vmatmul.msk.bf16.vlgmr.msra.gmra.mxu2 %vm283_vm9, %v246_v59 }
 0x1e0   :  { %v296_v61 = vpop.f32.mrf.mxu2 }
 0x1e1   :  { %v297_v62 = vadd.f32 %v364_v60, %v296_v61 }
 0x1e3   :  { %302 = vst.msk [vmem:[%s492_s8] sm:$0xff] %vm301_vm10, %v297_v62 }
 0x1e8   :  { %v298_v63 = vpop.f32.mrf.mxu2 }
 0x1e9   :  { %v299_v0 = vadd.f32 %v364_v60, %v298_v63 }
 0x1eb   :  { %303 = vst.msk [vmem:[%s492_s8 + $0x8] sm:$0xff] %vm301_vm10, %v299_v0 }

// kernel: pet_body_forward.7
= control target key start
LH: loop header
LB: loop body
LE: loop exit
PB: predicated region body
PF: predicated region fallthrough
CT: control target
= control target key end

     0   :  { %s2409_s15 = smov 0   ;;  %s2411_s16 = smov 0   ;;  %s3333_s0 = inlined_call_operand.vmem [shape: f32[2,8,4], index: 0, kind: input, shape index: {}]   ;;  %s3334_s1 = inlined_call_operand.vmem [shape: f32[2,4,8], index: 1, kind: input, shape index: {}]   ;;  %s3335_s2 = inlined_call_operand.vmem [shape: f32[2,8,1], index: 2, kind: input, shape index: {}]   ;;  %s3336_s3 = inlined_call_operand.vmem [shape: f32[2,1,8], index: 3, kind: input, shape index: {}]   ;;  %s3337_s4 = inlined_call_operand.<no memory space> [shape: f32[1,1], index: 4, kind: input, shape index: {}]   ;;  %s3338_s5 = inlined_call_operand.vmem [shape: f32[4,32], index: 5, kind: input, shape index: {}]   ;;  %s3339_s6 = inlined_call_operand.vmem [shape: f32[1,32], index: 6, kind: input, shape index: {}]   ;;  %s3340_s7 = inlined_call_operand.vmem [shape: f32[1,32], index: 7, kind: input, shape index: {}]   ;;  %s3341_s8 = inlined_call_operand.vmem [shape: f32[1,32], index: 8, kind: input, shape index: {}]   ;;  %s3342_s9 = inlined_call_operand.vmem [shape: f32[4,32], index: 9, kind: input, shape index: {}]   ;;  %s3343_s10 = inlined_call_operand.vmem [shape: f32[1,4], index: 10, kind: input, shape index: {}]   ;;  %s3344_s11 = inlined_call_operand.vmem [shape: bf16[32,32], index: 11, kind: input, shape index: {}]   ;;  %s3345_s12 = inlined_call_operand.vmem [shape: f32[1,32], index: 12, kind: input, shape index: {}]   ;;  %s3346_s13 = inlined_call_operand.vmem [shape: bf16[2,4,8,8], index: 13, kind: output, shape index: {0}]   ;;  %s3347_s14 = inlined_call_operand.vmem [shape: bf16[2,8,32], index: 14, kind: output, shape index: {1}]  }
   0x1   :  { %v20_v0 = vstv %s3337_s4  ;;  %s2413_s17 = smov 0  }
   0x2   :  { %21 = vst [vmem:[#allocation2] sm:$0x1] %v20_v0 }
   0x3 LB: > { %s39_s4 = sadd.s32 1, %s2320_s16  ;;  %p2152_p0 = scmp.ge.s32.totalorder %s2324_s17, 1  ;;  %s2324_s17 = sphi %s2413_s17, %s27_s17   ;;  %s2320_s16 = sphi %s2411_s16, %s3419_s16   ;;  %s2316_s15 = sphi %s2409_s15, %s3418_s15  }
   0x4   : > { %p41_p1 = scmp.ge.s32.totalorder %s39_s4, 2  ;;  %p468_p2 = scmp.lt.s32.totalorder %s2324_s17, 3 }
   0x6   : > { %s3421_s4 = smov (%p41_p1, %s39_s4), 0  ;;  %p469_p3 = pnand %p2152_p0, %p468_p2 }
   0x8   : > { %472 = sbr.rel (%p469_p3) target bundleno = 854 (0x356), region = 72 }
   0xd   : > { %p540_p4 = scmp.lt.s32.totalorder %s2316_s15, 1  ;;  %v2326_v1 = vmov 0   ;;  %v2222_v2 = vld [vmem:[#allocation2] ss:$0 sm:$0xff]  ;;  %v2327_v7 = vmov 1   ;;  %v2328_v9 = vmov 2   ;;  %v3348_v12 = vlaneseq }
   0xe   : > { %2206 = vset.pattern.permute.xlu0 %v2326_v1  ;;  %2208 = vset.pattern.permute.xlu1 %v2326_v1  ;;  %v2224_v6 = vld [vmem:[%s3343_s10] ss:$0 sm:$0xff]  ;;  %v2329_v43 = vmov 0.0   ;;  %vm1771_vm5 = vcmask 64512   ;;  %vm1090_vm8 = vcmask 261120  }
   0xf   : > { %s3423_s15 = smov (!%p540_p4, %s2316_s15), 1  ;;  %2209 = vset.pattern.permute.xlu2 %v2326_v1  ;;  %v2223_v10 = vld [vmem:[%s3343_s10] ss:$0 sm:$0xff]  ;;  %v2454_v13 = vshrl.u32 %v3348_v12, 7 }
  0x10   : > { %1037 = vperm.xlu2 %2209, %v2222_v2   ;;  %s2153_s18 = sshll.u32 %s3423_s15, 3  ;;  %s560_s27 = scalar_lea.vmem %s3336_s3, %s3423_s15  ;;  %v2225_v11 = vld [vmem:[%s3343_s10] ss:$0 sm:$0xff] }
  0x11   : > { %s546_s21 = scalar_lea.vmem %s3333_s0, %s2153_s18  ;;  %s557_s24 = scalar_lea.vmem %s3335_s2, %s2153_s18  ;;  %3359 = vst [vmem:[#allocation3_spill] sm:$0xff] %v2454_v13  ;;  %v2226_v36 = vld [vmem:[%s560_s27] ss:$0 sm:$0xff] }
  0x12   : > { %v577_v3 = vld [vmem:[%s546_s21] sm:$0xff]  ;;  %s2154_s21 = sshll.u32 %s3423_s15, 2  ;;  %s2174_s18 = sshll.u32 %s3423_s15, 4 }
  0x13   : > { %v579_v4 = vld [vmem:[%s557_s24] sm:$0xff]  ;;  %587 = vperm.xlu0 %2206, %v577_v3   ;;  %v581_v5 = vmul.f32 1.442695, %v577_v3  ;;  %s550_s24 = scalar_lea.vmem %s3334_s1, %s2154_s21  ;;  %s3260_s22 = scalar_lea.vmem %s3346_s13, %s2174_s18 }
  0x14   : > { %650 = vperm.xlu1 %2208, %v579_v4   ;;  %v578_v15 = vld [vmem:[%s550_s24] sm:$0xf]  ;;  %s575_s27 = scalar_lea.vmem %s3347_s14, %s2154_s21 }
  0x15   : > { %2240 = vpow2.f32 %v581_v5  ;;  %v590_v16 = vperm.slane %v578_v15, 0  ;;  %v596_v17 = vperm.slane %v578_v15, 1  ;;  %v583_v29 = vmul.f32 1.442695, %v578_v15 }
  0x18   : > { %2212 = vset.pattern.permute.xlu2 %v2327_v7 }
  0x19   : > { %1317 = vperm.xlu2 %2212, %v2224_v6  }
  0x1b   : > { %v2241_v8 = vpop.eup %2240  ;;  %2207 = vset.pattern.permute.xlu0 %v2327_v7 }
  0x1c   : > { %2210 = vset.pattern.permute.xlu1 %v2328_v9  ;;  %593 = vperm.xlu0 %2207, %v577_v3  }
  0x1d   : > { %603 = vperm.xlu1 %2210, %v2241_v8  }
  0x21   : > { %2216 = vset.pattern.permute.xlu2 %v2454_v13 }
  0x24   : > { %2214 = vset.pattern.permute.xlu0 %v2454_v13 }
  0x25   : > { %2211 = vset.pattern.permute.xlu1 %v2326_v1 }
  0x26   : > { %1119 = vperm.xlu1 %2211, %v2223_v10  }
  0x2e   : > { %2213 = vset.pattern.permute.xlu1 %v2328_v9 }
  0x2f   : > { %1441 = vperm.xlu1 %2213, %v2225_v11  }
  0x37   : > { %2215 = vset.pattern.permute.xlu1 %v2454_v13 }
  0x85   : > { %v588_v14 = vpop.permute.xlu0 %587 }
  0x86   : > { %v591_v18 = vsub.f32 %v588_v14, %v590_v16  ;;  %v2465_v32 = vpop.permute.xlu1 %650 }
  0x87   : > { %3360 = vst [vmem:[#allocation4_spill] sm:$0xff] %v2465_v32  ;;  %v656_v40 = vmul.f32 %v2226_v36, %v2465_v32 }
  0x88   : > { %v598_v21 = vmul.f32 %v591_v18, %v591_v18 }
  0x8e   : > { %v594_v19 = vpop.permute.xlu0 %593 }
  0x8f   : > { %v597_v20 = vsub.f32 %v594_v19, %v596_v17  ;;  %v604_v47 = vpop.permute.xlu1 %603 }
  0x91   : > { %v599_v22 = vmul.f32 %v597_v20, %v597_v20  ;;  %v647_v23 = vmul.f32 %v597_v20, %v591_v18 }
  0x93   : > { %v600_v24 = vadd.f32 %v599_v22, %v598_v21  ;;  %v889_v25 = vperm.slane %v647_v23, 2  ;;  %v875_v26 = vperm.slane %v647_v23, 0  ;;  %v882_v27 = vperm.slane %v647_v23, 1 }
  0x94   : > { %v910_v30 = vperm.slane %v647_v23, 5  ;;  %v896_v31 = vperm.slane %v647_v23, 3  ;;  %v903_v33 = vperm.slane %v647_v23, 4  ;;  %v917_v41 = vperm.slane %v647_v23, 6 }
  0x95   : > { %v608_v28 = vadd.f32 1e-06, %v600_v24  ;;  %894 = vperm.xlu2 %2216, %v889_v25   ;;  %880 = vperm.xlu0 %2214, %v875_v26   ;;  %vm657_vm0 = vcmp.lt.f32.partialorder %v600_v24, 0.16  ;;  %v924_v45 = vperm.slane %v647_v23, 7 }
  0x96   : > { %887 = vperm.xlu1 %2215, %v882_v27   ;;  %v2159_v44 = vsel %vm657_vm0, 1.0, %v2329_v43 }
  0x97   : > { %2242 = vrsqrt.f32 %v608_v28  ;;  %v2473_v49 = vmul.f32 %v2159_v44, %v656_v40  ;;  %vm616_vm1 = vcmp.eq.f32.partialorder %v608_v28, inf  ;;  %v619_v56 = vand.u32 2147483648, %v608_v28 }
  0x98   : > { %2244 = vpow2.f32 %v583_v29  ;;  %vm618_vm2 = vcmp.eq.f32.partialorder %v608_v28, 0.0 }
  0x99   : > { %v1138_v52 = vperm.slane %v2473_v49, 1  ;;  %v1145_v54 = vperm.slane %v2473_v49, 2  ;;  %v1152_v60 = vperm.slane %v2473_v49, 3  ;;  %v1166_v61 = vperm.slane %v2473_v49, 5 }
  0x9a   : > { %v1173_v5 = vperm.slane %v2473_v49, 6  ;;  %v1772_v17 = vsel %vm1771_vm5, %v2473_v49, 0.0 }
  0x9d   : > { %v2243_v34 = vpop.eup %2242  ;;  %915 = vperm.xlu2 %2216, %v910_v30   ;;  %901 = vperm.xlu0 %2214, %v896_v31   ;;  %v1131_v30 = vperm.slane %v2473_v49, 0 }
  0x9e   : > { %908 = vperm.xlu1 %2215, %v903_v33   ;;  %v610_v35 = vmul.f32 %v2243_v34, %v608_v28  ;;  %v2245_v37 = vpop.eup %2244 }
  0x9f   : > { %v606_v42 = vperm.slane %v2245_v37, 2 }
  0xa0   : > { %v611_v38 = vmul.f32 %v2243_v34, %v610_v35  ;;  %v1159_v35 = vperm.slane %v2473_v49, 4 }
  0xa1   : > { %v622_v48 = vadd.f32 %v606_v42, %v604_v47  ;;  %v607_v57 = vmin.f32 %v604_v47, %v606_v42 }
  0xa2   : > { %v612_v39 = vmul.f32 0.5, %v611_v38 }
  0xa3   : > { %v623_v51 = vadd.f32 1e-06, %v622_v48 }
  0xa4   : > { %v613_v46 = vsub.f32 1.5, %v612_v39 }
  0xa5   : > { %922 = vperm.xlu0 %2214, %v917_v41   ;;  %2246 = vrcp.f32 %v623_v51  ;;  %vm629_vm3 = vweird.f32 %v623_v51  ;;  %v635_v8 = vand.u32 2147483648, %v623_v51  ;;  %v633_v10 = vand.u32 2147483647, %v623_v51  ;;  %v2505_v41 = vpop.permute.xlu1 %1119 }
  0xa6   : > { %929 = vperm.xlu1 %2215, %v924_v45   ;;  %v614_v50 = vmul.f32 %v2243_v34, %v613_v46  ;;  %2248 = vlog2.f32 %v608_v28 }
  0xa7   : > { %v636_v16 = vor.u32 1.1754944e-38, %v635_v8  ;;  %vm634_vm7 = vcmp.eq.f32.partialorder %v633_v10, 8.507059e+37 }
  0xa8   : > { %v615_v53 = vmul.f32 %v614_v50, %v608_v28 }
  0xaa   : > { %v617_v55 = vsel %vm616_vm1, %v608_v28, %v615_v53  ;;  %v2519_v53 = vpop.permute.xlu2 %1037 }
  0xab   : > { %v2247_v58 = vpop.eup %2246  ;;  %v620_v59 = vsel %vm618_vm2, %v619_v56, %v617_v55  ;;  %v2524_v55 = vld [vmem:[%s3338_s5 + $0x3] ss:$0 sm:$0xff] }
  0xac   : > { %v2249_v62 = vpop.eup %2248  ;;  %v621_v63 = vmul.f32 %v620_v59, %v607_v57  ;;  %v625_v0 = vmul.f32 %v2247_v58, %v623_v51  ;;  %vm630_vm4 = vweird.f32 %v2247_v58 }
  0xad   : > { %1143 = vperm.xlu0 %2214, %v1138_v52   ;;  %v2487_v2 = vmul.f32 0.6931472, %v2249_v62  ;;  %vm631_vm6 = vmor %vm629_vm3, %vm630_vm4  ;;  %v2508_v43 = vpop.permute.xlu1 %1441 }
  0xae   : > { %1150 = vperm.xlu1 %2215, %v1145_v54   ;;  %v626_v3 = vsub.f32 1.0, %v625_v0  ;;  %v641_v4 = vadd.f32 1e-06, %v621_v63 }
  0xaf   : > { %v675_v6 = vperm.slane %v2487_v2, 2  ;;  %v689_v11 = vperm.slane %v2487_v2, 4  ;;  %v696_v15 = vperm.slane %v2487_v2, 5  ;;  %v710_v23 = vperm.slane %v2487_v2, 7 }
  0xb0   : > { %v627_v7 = vmul.f32 %v2247_v58, %v626_v3  ;;  %2250 = vlog2.f32 %v641_v4  ;;  %v661_v38 = vperm.slane %v2487_v2, 0  ;;  %v668_v40 = vperm.slane %v2487_v2, 1 }
  0xb1   : > { %v682_v42 = vperm.slane %v2487_v2, 3  ;;  %v703_v44 = vperm.slane %v2487_v2, 6 }
  0xb2   : > { %v628_v9 = vadd.f32 %v2247_v58, %v627_v7  ;;  %v2531_v62 = vpop.permute.xlu2 %1317 }
  0xb4   : > { %v632_v18 = vsel %vm631_vm6, %v2247_v58, %v628_v9 }
  0xb5   : > { %1157 = vperm.xlu0 %2214, %v1152_v60   ;;  %v637_v20 = vsel %vm634_vm7, %v636_v16, %v632_v18 }
  0xb6   : > { %1171 = vperm.xlu1 %2215, %v1166_v61   ;;  %v2251_v14 = vpop.eup %2250  ;;  %v638_v22 = vmul.f32 %v637_v20, %v607_v57 }
  0xb7   : > { %v643_v19 = vmul.f32 0.6931472, %v2251_v14 }
  0xb8   : > { %v644_v24 = vadd.f32 1e-06, %v638_v22  ;;  %v2558_v22 = vld [vmem:[%s3338_s5 + $0x1] ss:$0 sm:$0xff] }
  0xb9   : > { %v734_v21 = vperm.slane %v643_v19, 1  ;;  %v755_v25 = vperm.slane %v643_v19, 4  ;;  %v741_v26 = vperm.slane %v643_v19, 2  ;;  %v776_v28 = vperm.slane %v643_v19, 7 }
  0xba   : > { %2252 = vlog2.f32 %v644_v24  ;;  %v762_v29 = vperm.slane %v643_v19, 5  ;;  %v727_v47 = vperm.slane %v643_v19, 0  ;;  %v748_v51 = vperm.slane %v643_v19, 3 }
  0xbb   : > { %v769_v59 = vperm.slane %v643_v19, 6 }
  0xbd   : > { %1178 = vperm.xlu0 %2214, %v1173_v5  }
  0xbe   : > { %680 = vperm.xlu1 %2215, %v675_v6  }
  0xc0   : > { %v2253_v27 = vpop.eup %2252 }
  0xc1   : > { %v646_v31 = vmul.f32 0.6931472, %v2253_v27 }
  0xc3   : > { %v815_v33 = vperm.slane %v646_v31, 2  ;;  %v801_v34 = vperm.slane %v646_v31, 0  ;;  %v836_v36 = vperm.slane %v646_v31, 5  ;;  %v822_v37 = vperm.slane %v646_v31, 3 }
  0xc4   : > { %v843_v39 = vperm.slane %v646_v31, 6  ;;  %v808_v2 = vperm.slane %v646_v31, 1  ;;  %v829_v7 = vperm.slane %v646_v31, 4 }
  0xc5   : > { %694 = vperm.xlu0 %2214, %v689_v11   ;;  %v850_v11 = vperm.slane %v646_v31, 7 }
  0xc6   : > { %701 = vperm.xlu1 %2215, %v696_v15   ;;  %1773 = vadd.xlane.f32.xlu2 %v1772_v17  ;;  %v2548_v17 = vld [vmem:[%s3338_s5] ss:$0 sm:$0xff] }
  0xcd   : > { %739 = vperm.xlu0 %2214, %v734_v21  }
  0xce   : > { %715 = vperm.xlu1 %2215, %v710_v23  }
  0xd5   : > { %760 = vperm.xlu0 %2214, %v755_v25  }
  0xd6   : > { %746 = vperm.xlu1 %2215, %v741_v26  }
  0xdd   : > { %781 = vperm.xlu0 %2214, %v776_v28  }
  0xde   : > { %767 = vperm.xlu1 %2215, %v762_v29   ;;  %1136 = vperm.xlu2 %2216, %v1131_v30  }
  0xe5   : > { %820 = vperm.xlu0 %2214, %v815_v33  }
  0xe6   : > { %806 = vperm.xlu1 %2215, %v801_v34   ;;  %1164 = vperm.xlu2 %2216, %v1159_v35  }
  0xed   : > { %841 = vperm.xlu0 %2214, %v836_v36  }
  0xee   : > { %827 = vperm.xlu1 %2215, %v822_v37   ;;  %666 = vperm.xlu2 %2216, %v661_v38   ;;  %v2573_v37 = vld [vmem:[%s3338_s5 + $0x2] ss:$0 sm:$0xff] }
  0xef   : > { %v895_v3 = vpop.permute.xlu2 %894 }
  0xf6   : > { %848 = vperm.xlu1 %2215, %v843_v39   ;;  %673 = vperm.xlu2 %2216, %v668_v40  }
  0xf7   : > { %v916_v10 = vpop.permute.xlu2 %915 }
  0xfe   : > { %687 = vperm.xlu2 %2216, %v682_v42  }
 0x106   : > { %708 = vperm.xlu2 %2216, %v703_v44  }
 0x107   : > { %v2511_v45 = vpop.permute.xlu0 %880 }
 0x108   : > { %v2513_v46 = vpop.permute.xlu1 %887 }
 0x10e   : > { %732 = vperm.xlu2 %2216, %v727_v47   ;;  %v935_v47 = vmul.f32 %v2524_v55, %v895_v3 }
 0x10f   : > { %v2515_v48 = vpop.permute.xlu0 %901 }
 0x110   : > { %v2517_v50 = vpop.permute.xlu1 %908 }
 0x116   : > { %753 = vperm.xlu2 %2216, %v748_v51   ;;  %v2583_v51 = vld [vmem:[%s3339_s6] ss:$0 sm:$0xff] }
 0x117   : > { %v2526_v56 = vpop.permute.xlu0 %922 }
 0x118   : > { %v930_v57 = vpop.permute.xlu1 %929 }
 0x119   : > { %v2529_v58 = vmul.f32 %v2524_v55, %v930_v57 }
 0x11e   : > { %774 = vperm.xlu2 %2216, %v769_v59  }
 0x11f   : > { %v2533_v63 = vpop.permute.xlu0 %1143 }
 0x120   : > { %v2535_v0 = vpop.permute.xlu1 %1150 }
 0x126   : > { %813 = vperm.xlu2 %2216, %v808_v2  }
 0x127   : > { %v2537_v4 = vpop.permute.xlu0 %1157 }
 0x128   : > { %v2539_v6 = vpop.permute.xlu1 %1171 }
 0x12e   : > { %834 = vperm.xlu2 %2216, %v829_v7  }
 0x12f   : > { %v2541_v8 = vpop.permute.xlu0 %1178 }
 0x130   : > { %v681_v9 = vpop.permute.xlu1 %680 }
 0x131   : > { %v721_v38 = vmul.f32 %v2548_v17, %v681_v9 }
 0x136   : > { %855 = vperm.xlu2 %2216, %v850_v11  }
 0x137   : > { %v695_v14 = vpop.permute.xlu0 %694 }
 0x138   : > { %v702_v15 = vpop.permute.xlu1 %701  ;;  %v723_v24 = vmul.f32 %v2548_v17, %v695_v14 }
 0x139   : > { %v2543_v16 = vpop.xlane.xlu2 %1773 }
 0x13f   : > { %v2550_v18 = vpop.permute.xlu0 %739 }
 0x140   : > { %v716_v19 = vpop.permute.xlu1 %715 }
 0x141   : > { %v726_v20 = vmul.f32 %v2548_v17, %v716_v19  ;;  %v2553_v21 = vpop.permute.xlu2 %1136 }
 0x147   : > { %v761_v23 = vpop.permute.xlu0 %760 }
 0x148   : > { %v789_v25 = vmul.f32 %v2558_v22, %v761_v23  ;;  %v747_v31 = vpop.permute.xlu1 %746 }
 0x149   : > { %v2562_v26 = vpop.permute.xlu2 %1164  ;;  %v787_v36 = vmul.f32 %v2558_v22, %v747_v31 }
 0x14a   : > { %3361 = vst [vmem:[#allocation5_spill] sm:$0xff] %v2562_v26  ;;  %v2564_v27 = vadd.f32 %v789_v25, %v723_v24 }
 0x14b   : > { %v795_v40 = vadd.f32 %v787_v36, %v721_v38 }
 0x14f   : > { %v782_v28 = vpop.permute.xlu0 %781 }
 0x150   : > { %v792_v29 = vmul.f32 %v2558_v22, %v782_v28  ;;  %v768_v14 = vpop.permute.xlu1 %767  ;;  %v724_v28 = vmul.f32 %v2548_v17, %v702_v15 }
 0x151   : > { %v667_v33 = vpop.permute.xlu2 %666  ;;  %v790_v3 = vmul.f32 %v2558_v22, %v768_v14 }
 0x152   : > { %v2567_v34 = vadd.f32 %v792_v29, %v726_v20 }
 0x153   : > { %v798_v36 = vadd.f32 %v790_v3, %v724_v28 }
 0x157   : > { %v821_v39 = vpop.permute.xlu0 %820 }
 0x158   : > { %v861_v42 = vmul.f32 %v2573_v37, %v821_v39  ;;  %v807_v29 = vpop.permute.xlu1 %806 }
 0x159   : > { %v2577_v44 = vpop.permute.xlu2 %673  ;;  %v859_v14 = vmul.f32 %v2573_v37, %v807_v29 }
 0x15a   : > { %v869_v57 = vadd.f32 %v861_v42, %v795_v40 }
 0x15c   : > { %v943_v59 = vadd.f32 %v935_v47, %v869_v57  ;;  %v719_v57 = vmul.f32 %v2548_v17, %v667_v33 }
 0x15e   : > { %v955_v2 = vadd.f32 %v2583_v51, %v943_v59 }
 0x15f   : > { %v842_v25 = vpop.permute.xlu0 %841 }
 0x160   : > { %v971_v7 = vmul.f32 0.044715, %v955_v2  ;;  %v864_v31 = vmul.f32 %v2573_v37, %v842_v25  ;;  %v963_v39 = vmul.f32 0.5, %v955_v2  ;;  %v828_v25 = vpop.permute.xlu1 %827 }
 0x161   : > { %v688_v11 = vpop.permute.xlu2 %687 }
 0x162   : > { %v979_v9 = vmul.f32 %v971_v7, %v955_v2  ;;  %v872_v42 = vadd.f32 %v864_v31, %v798_v36  ;;  %v938_v7 = vmul.f32 %v2524_v55, %v916_v10  ;;  %v722_v10 = vmul.f32 %v2548_v17, %v688_v11  ;;  %v2605_v36 = vld [vmem:[%s3340_s7] ss:$0 sm:$0xff] }
 0x164   : > { %v987_v19 = vmul.f32 %v979_v9, %v955_v2 }
 0x166   : > { %v995_v20 = vadd.f32 %v987_v19, %v955_v2 }
 0x168   : > { %v1003_v23 = vmul.f32 0.7978846, %v995_v20  ;;  %v946_v20 = vadd.f32 %v938_v7, %v872_v42 }
 0x169   : > { %v709_v24 = vpop.permute.xlu2 %708 }
 0x16a   : > { %2254 = vtanh.f32 %v1003_v23  ;;  %v933_v23 = vmul.f32 %v2524_v55, %v2511_v45  ;;  %v2597_v33 = vadd.f32 %v2583_v51, %v946_v20  ;;  %v862_v45 = vmul.f32 %v2573_v37, %v828_v25 }
 0x16c   : > { %v974_v11 = vmul.f32 0.044715, %v2597_v33 }
 0x16e   : > { %v982_v20 = vmul.f32 %v974_v11, %v2597_v33 }
 0x170   : > { %v2255_v38 = vpop.eup %2254 }
 0x171   : > { %v1019_v40 = vadd.f32 1.0, %v2255_v38  ;;  %v733_v47 = vpop.permute.xlu2 %732 }
 0x172   : > { %v785_v59 = vmul.f32 %v2558_v22, %v733_v47  ;;  %v936_v47 = vmul.f32 %v2524_v55, %v2515_v48 }
 0x173   : > { %v1027_v9 = vmul.f32 %v1019_v40, %v963_v39  ;;  %v2611_v40 = vld [vmem:[%s3341_s8] ss:$0 sm:$0xff] }
 0x174   : > { %v793_v19 = vadd.f32 %v785_v59, %v719_v57 }
 0x175   : > { %v1042_v15 = vmul.f32 %v2519_v53, %v1027_v9  ;;  %v2620_v9 = vld [vmem:[%s3342_s9] ss:$0 sm:$0xff] }
 0x176   : > { %v867_v2 = vadd.f32 %v859_v14, %v793_v19 }
 0x177   : > { %2256 = vtanh.f32 %v1042_v15 }
 0x178   : > { %v941_v3 = vadd.f32 %v933_v23, %v867_v2  ;;  %v849_v23 = vpop.permute.xlu1 %848  ;;  %v725_v2 = vmul.f32 %v2548_v17, %v709_v24  ;;  %v720_v24 = vmul.f32 %v2548_v17, %v2577_v44 }
 0x179   : > { %v754_v28 = vpop.permute.xlu2 %753 }
 0x17a   : > { %v953_v31 = vadd.f32 %v2583_v51, %v941_v3  ;;  %v788_v29 = vmul.f32 %v2558_v22, %v754_v28 }
 0x17c   : > { %v969_v38 = vmul.f32 0.044715, %v953_v31  ;;  %v796_v39 = vadd.f32 %v788_v29, %v722_v10  ;;  %v865_v29 = vmul.f32 %v2573_v37, %v849_v23 }
 0x17d   : > { %v2257_v42 = vpop.eup %2256 }
 0x17e   : > { %v977_v57 = vmul.f32 %v969_v38, %v953_v31  ;;  %v870_v59 = vadd.f32 %v862_v45, %v796_v39  ;;  %v1062_v7 = vmul.f32 %v2257_v42, %v2605_v36  ;;  %v939_v42 = vmul.f32 %v2524_v55, %v2526_v56 }
 0x180   : > { %v985_v14 = vmul.f32 %v977_v57, %v953_v31  ;;  %v944_v19 = vadd.f32 %v936_v47, %v870_v59  ;;  %v2623_v15 = vadd.f32 %v2611_v40, %v1062_v7  ;;  %v990_v47 = vmul.f32 %v982_v20, %v2597_v33 }
 0x181   : > { %v775_v48 = vpop.permute.xlu2 %774  ;;  %v786_v7 = vmul.f32 %v2558_v22, %v2550_v18  ;;  %v934_v20 = vmul.f32 %v2524_v55, %v2513_v46 }
 0x182   : > { %v993_v25 = vadd.f32 %v985_v14, %v953_v31  ;;  %v956_v3 = vadd.f32 %v2583_v51, %v944_v19  ;;  %v791_v28 = vmul.f32 %v2558_v22, %v775_v48  ;;  %v1084_v10 = vmul.f32 %v2620_v9, %v2623_v15 }
 0x183   : > { %v794_v23 = vadd.f32 %v786_v7, %v720_v24  ;;  %v998_v56 = vadd.f32 %v990_v47, %v2597_v33 }
 0x184   : > { %v1001_v45 = vmul.f32 0.7978846, %v993_v25  ;;  %v972_v38 = vmul.f32 0.044715, %v956_v3  ;;  %v799_v39 = vadd.f32 %v791_v28, %v725_v2  ;;  %v1097_v11 = vsel %vm1090_vm8, %v1084_v10, 0.0 }
 0x185   : > { %1098 = vadd.xlane.f32.xlu2 %v1097_v11  ;;  %v1006_v22 = vmul.f32 0.7978846, %v998_v56  ;;  %v964_v56 = vmul.f32 0.5, %v956_v3 }
 0x186   : > { %2258 = vtanh.f32 %v1001_v45  ;;  %v980_v57 = vmul.f32 %v972_v38, %v956_v3  ;;  %v873_v59 = vadd.f32 %v865_v29, %v799_v39  ;;  %v961_v45 = vmul.f32 0.5, %v953_v31 }
 0x187   : > { %v937_v31 = vmul.f32 %v2524_v55, %v2517_v50 }
 0x188   : > { %v988_v14 = vmul.f32 %v980_v57, %v956_v3  ;;  %v947_v19 = vadd.f32 %v939_v42, %v873_v59 }
 0x189   : > { %v814_v2 = vpop.permute.xlu2 %813 }
 0x18a   : > { %v996_v48 = vadd.f32 %v988_v14, %v956_v3  ;;  %v959_v17 = vadd.f32 %v2583_v51, %v947_v19  ;;  %v860_v44 = vmul.f32 %v2573_v37, %v814_v2 }
 0x18c   : > { %v2259_v25 = vpop.eup %2258  ;;  %v1004_v28 = vmul.f32 0.7978846, %v996_v48  ;;  %v975_v10 = vmul.f32 0.044715, %v959_v17  ;;  %v868_v29 = vadd.f32 %v860_v44, %v794_v23 }
 0x18d   : > { %v1017_v18 = vadd.f32 1.0, %v2259_v25 }
 0x18e   : > { %2260 = vtanh.f32 %v1004_v28  ;;  %v983_v38 = vmul.f32 %v975_v10, %v959_v17  ;;  %v942_v39 = vadd.f32 %v934_v20, %v868_v29 }
 0x18f   : > { %v1025_v42 = vmul.f32 %v1017_v18, %v961_v45  ;;  %2262 = vtanh.f32 %v1006_v22 }
 0x190   : > { %v991_v24 = vmul.f32 %v983_v38, %v959_v17  ;;  %v954_v11 = vadd.f32 %v2583_v51, %v942_v39 }
 0x191   : > { %v835_v47 = vpop.permute.xlu2 %834  ;;  %v1040_v57 = vmul.f32 %v2519_v53, %v1025_v42 }
 0x192   : > { %v999_v59 = vadd.f32 %v991_v24, %v959_v17  ;;  %v970_v7 = vmul.f32 0.044715, %v954_v11  ;;  %v863_v46 = vmul.f32 %v2573_v37, %v835_v47  ;;  %v967_v47 = vmul.f32 0.5, %v959_v17 }
 0x193   : > { %2264 = vtanh.f32 %v1040_v57 }
 0x194   : > { %v2261_v14 = vpop.eup %2260  ;;  %v1007_v19 = vmul.f32 0.7978846, %v999_v59  ;;  %v978_v23 = vmul.f32 %v970_v7, %v954_v11  ;;  %v871_v2 = vadd.f32 %v863_v46, %v2564_v27  ;;  %v966_v7 = vmul.f32 0.5, %v2597_v33 }
 0x195   : > { %v1020_v48 = vadd.f32 1.0, %v2261_v14  ;;  %v2263_v28 = vpop.eup %2262 }
 0x196   : > { %2266 = vtanh.f32 %v1007_v19  ;;  %v986_v44 = vmul.f32 %v978_v23, %v954_v11  ;;  %v945_v25 = vadd.f32 %v937_v31, %v871_v2  ;;  %v1022_v39 = vadd.f32 1.0, %v2263_v28 }
 0x197   : > { %v1028_v20 = vmul.f32 %v1020_v48, %v964_v56 }
 0x198   : > { %v994_v10 = vadd.f32 %v986_v44, %v954_v11  ;;  %v957_v29 = vadd.f32 %v2583_v51, %v945_v25  ;;  %v1030_v19 = vmul.f32 %v1022_v39, %v966_v7 }
 0x199   : > { %v2265_v45 = vpop.eup %2264  ;;  %v856_v18 = vpop.permute.xlu2 %855  ;;  %v1043_v22 = vmul.f32 %v2519_v53, %v1028_v20 }
 0x19a   : > { %v1002_v38 = vmul.f32 0.7978846, %v994_v10  ;;  %v973_v50 = vmul.f32 0.044715, %v957_v29  ;;  %v866_v55 = vmul.f32 %v2573_v37, %v856_v18  ;;  %v1060_v27 = vmul.f32 %v2265_v45, %v2605_v36 }
 0x19b   : > { %2268 = vtanh.f32 %v1043_v22  ;;  %v1045_v28 = vmul.f32 %v2519_v53, %v1030_v19 }
 0x19c   : > { %v2267_v3 = vpop.eup %2266  ;;  %2270 = vtanh.f32 %v1002_v38  ;;  %v981_v42 = vmul.f32 %v973_v50, %v957_v29  ;;  %v874_v24 = vadd.f32 %v866_v55, %v2567_v34  ;;  %v2657_v59 = vadd.f32 %v2611_v40, %v1060_v27 }
 0x19d   : > { %v1023_v57 = vadd.f32 1.0, %v2267_v3 }
 0x19e   : > { %v989_v46 = vmul.f32 %v981_v42, %v957_v29  ;;  %v948_v14 = vadd.f32 %v2529_v58, %v874_v24  ;;  %v1082_v31 = vmul.f32 %v2620_v9, %v2657_v59  ;;  %v962_v58 = vmul.f32 0.5, %v954_v11 }
 0x19f   : > { %v1031_v37 = vmul.f32 %v1023_v57, %v967_v47  ;;  %v965_v42 = vmul.f32 0.5, %v957_v29 }
 0x1a0   : > { %v997_v23 = vadd.f32 %v989_v46, %v957_v29  ;;  %v960_v2 = vadd.f32 %v2583_v51, %v948_v14  ;;  %v1091_v34 = vsel %vm1090_vm8, %v1082_v31, 0.0  ;;  %v2235_v29 = vld [vmem:[%s3342_s9 + $0x1] ss:$0 sm:$0xff] }
 0x1a1   : > { %v2269_v56 = vpop.eup %2268  ;;  %v1046_v17 = vmul.f32 %v2519_v53, %v1031_v37  ;;  %1092 = vadd.xlane.f32.xlu0 %v1091_v34 }
 0x1a2   : > { %v2271_v48 = vpop.eup %2270  ;;  %v1005_v44 = vmul.f32 0.7978846, %v997_v23  ;;  %v976_v25 = vmul.f32 0.044715, %v960_v2  ;;  %v1063_v33 = vmul.f32 %v2269_v56, %v2605_v36 }
 0x1a3   : > { %v1018_v20 = vadd.f32 1.0, %v2271_v48  ;;  %2272 = vtanh.f32 %v1046_v17  ;;  %v968_v17 = vmul.f32 0.5, %v960_v2 }
 0x1a4   : > { %2274 = vtanh.f32 %v1005_v44  ;;  %v984_v10 = vmul.f32 %v976_v25, %v960_v2  ;;  %v2669_v51 = vadd.f32 %v2611_v40, %v1063_v33  ;;  %v1283_v25 = vmul.f32 %v2235_v29, %v2623_v15 }
 0x1a5   : > { %v1026_v45 = vmul.f32 %v1018_v20, %v962_v58  ;;  %2276 = vtanh.f32 %v1045_v28 }
 0x1a6   : > { %3362 = vst [vmem:[#allocation6_spill] sm:$0xff] %v2669_v51  ;;  %v992_v18 = vmul.f32 %v984_v10, %v960_v2  ;;  %v1085_v22 = vmul.f32 %v2620_v9, %v2669_v51 }
 0x1a7   : > { %v1041_v38 = vmul.f32 %v2519_v53, %v1026_v45  ;;  %v1295_v45 = vsel %vm1090_vm8, %v1283_v25, 0.0 }
 0x1a8   : > { %v1000_v50 = vadd.f32 %v992_v18, %v960_v2  ;;  %v1100_v11 = vsel %vm1090_vm8, %v1085_v22, 0.0 }
 0x1a9   : > { %v2273_v55 = vpop.eup %2272  ;;  %2278 = vtanh.f32 %v1041_v38  ;;  %1101 = vadd.xlane.f32.xlu2 %v1100_v11 }
 0x1aa   : > { %v2275_v27 = vpop.eup %2274  ;;  %v1008_v3 = vmul.f32 0.7978846, %v1000_v50  ;;  %v1066_v39 = vmul.f32 %v2273_v55, %v2605_v36 }
 0x1ab   : > { %v1021_v24 = vadd.f32 1.0, %v2275_v27  ;;  %v2277_v7 = vpop.eup %2276 }
 0x1ac   : > { %2280 = vtanh.f32 %v1008_v3  ;;  %v2677_v47 = vadd.f32 %v2611_v40, %v1066_v39  ;;  %v1065_v34 = vmul.f32 %v2277_v7, %v2605_v36  ;;  %v1281_v39 = vmul.f32 %v2235_v29, %v2657_v59 }
 0x1ad   : > { %v1029_v57 = vmul.f32 %v1021_v24, %v965_v42  ;;  %v2236_v24 = vld [vmem:[%s3342_s9 + $0x2] ss:$0 sm:$0xff] }
 0x1ae   : > { %v1088_v46 = vmul.f32 %v2620_v9, %v2677_v47  ;;  %v2696_v20 = vadd.f32 %v2611_v40, %v1065_v34  ;;  %v1405_v7 = vmul.f32 %v2236_v24, %v2657_v59 }
 0x1af   : > { %v2279_v14 = vpop.eup %2278  ;;  %v1044_v37 = vmul.f32 %v2519_v53, %v1029_v57 }
 0x1b0   : > { %v1109_v31 = vsel %vm1090_vm8, %v1088_v46, 0.0  ;;  %v1061_v19 = vmul.f32 %v2279_v14, %v2605_v36  ;;  %3364 = vst [vmem:[#allocation8_spill] sm:$0xff] %v2696_v20  ;;  %v1087_v18 = vmul.f32 %v2620_v9, %v2696_v20  ;;  %v1286_v50 = vmul.f32 %v2235_v29, %v2696_v20 }
 0x1b1   : > { %2282 = vtanh.f32 %v1044_v37  ;;  %1110 = vadd.xlane.f32.xlu2 %v1109_v31  ;;  %v1289_v46 = vsel %vm1090_vm8, %v1281_v39, 0.0  ;;  %v1284_v37 = vmul.f32 %v2235_v29, %v2669_v51  ;;  %v1408_v31 = vmul.f32 %v2236_v24, %v2669_v51 }
 0x1b2   : > { %v2281_v23 = vpop.eup %2280  ;;  %v2688_v56 = vadd.f32 %v2611_v40, %v1061_v19  ;;  %v1304_v27 = vsel %vm1090_vm8, %v1286_v50, 0.0 }
 0x1b3   : > { %v1024_v48 = vadd.f32 1.0, %v2281_v23  ;;  %v1422_v23 = vsel %vm1090_vm8, %v1408_v31, 0.0 }
 0x1b4   : > { %3363 = vst [vmem:[#allocation7_spill] sm:$0xff] %v2688_v56  ;;  %v1083_v44 = vmul.f32 %v2620_v9, %v2688_v56 }
 0x1b5   : > { %v1032_v33 = vmul.f32 %v1024_v48, %v968_v17  ;;  %v1287_v17 = vmul.f32 %v2235_v29, %v2677_v47  ;;  %v1411_v48 = vmul.f32 %v2236_v24, %v2677_v47 }
 0x1b6   : > { %v1094_v58 = vsel %vm1090_vm8, %v1083_v44, 0.0 }
 0x1b7   : > { %v2283_v28 = vpop.eup %2282  ;;  %v1047_v10 = vmul.f32 %v2519_v53, %v1032_v33  ;;  %1095 = vadd.xlane.f32.xlu1 %v1094_v58  ;;  %v1106_v53 = vsel %vm1090_vm8, %v1087_v18, 0.0  ;;  %v1307_v25 = vsel %vm1090_vm8, %v1287_v17, 0.0  ;;  %v1431_v33 = vsel %vm1090_vm8, %v1411_v48, 0.0 }
 0x1b8   : > { %v1064_v2 = vmul.f32 %v2283_v28, %v2605_v36  ;;  %v1407_v28 = vmul.f32 %v2236_v24, %v2623_v15  ;;  %v1410_v18 = vmul.f32 %v2236_v24, %v2696_v20 }
 0x1b9   : > { %2284 = vtanh.f32 %v1047_v10  ;;  %1296 = vadd.xlane.f32.xlu2 %v1295_v45 }
 0x1ba   : > { %v2704_v22 = vadd.f32 %v2611_v40, %v1064_v2  ;;  %v1419_v45 = vsel %vm1090_vm8, %v1407_v28, 0.0  ;;  %v1406_v2 = vmul.f32 %v2236_v24, %v2688_v56  ;;  %v1428_v50 = vsel %vm1090_vm8, %v1410_v18, 0.0 }
 0x1bc   : > { %v1086_v38 = vmul.f32 %v2620_v9, %v2704_v22  ;;  %v1285_v34 = vmul.f32 %v2235_v29, %v2704_v22 }
 0x1be   : > { %v1103_v11 = vsel %vm1090_vm8, %v1086_v38, 0.0  ;;  %v1301_v44 = vsel %vm1090_vm8, %v1285_v34, 0.0  ;;  %v1416_v38 = vsel %vm1090_vm8, %v1406_v2, 0.0 }
 0x1bf   : > { %v2285_v55 = vpop.eup %2284  ;;  %1107 = vadd.xlane.f32.xlu1 %v1106_v53  ;;  %1104 = vadd.xlane.f32.xlu0 %v1103_v11  ;;  %v1180_v11 = vperm.slane %v2473_v49, 7 }
 0x1c0   : > { %v1067_v3 = vmul.f32 %v2285_v55, %v2605_v36  ;;  %v1413_v36 = vsel %vm1090_vm8, %v1405_v7, 0.0 }
 0x1c1   : > { %1305 = vadd.xlane.f32.xlu2 %v1304_v27 }
 0x1c2   : > { %v2715_v42 = vadd.f32 %v2611_v40, %v1067_v3  ;;  %v1282_v40 = vmul.f32 %v2235_v29, %v2688_v56 }
 0x1c4   : > { %3365 = vst [vmem:[#allocation9_spill] sm:$0xff] %v2715_v42  ;;  %v1089_v57 = vmul.f32 %v2620_v9, %v2715_v42  ;;  %v1292_v19 = vsel %vm1090_vm8, %v1282_v40, 0.0  ;;  %v1298_v9 = vsel %vm1090_vm8, %v1284_v37, 0.0  ;;  %v1288_v58 = vmul.f32 %v2235_v29, %v2715_v42 }
 0x1c5   : > { %v1409_v29 = vmul.f32 %v2236_v24, %v2704_v22  ;;  %v1412_v55 = vmul.f32 %v2236_v24, %v2715_v42  ;;  %v2330_v24 = vmov 3  }
 0x1c6   : > { %v1112_v14 = vsel %vm1090_vm8, %v1089_v57, 0.0  ;;  %v1310_v10 = vsel %vm1090_vm8, %v1288_v58, 0.0  ;;  %v2803_v58 = vmax.f32 %v2543_v16, 1.0 }
 0x1c7   : > { %1290 = vadd.xlane.f32.xlu1 %v1289_v46  ;;  %1113 = vadd.xlane.f32.xlu0 %v1112_v14  ;;  %v1425_v53 = vsel %vm1090_vm8, %v1409_v29, 0.0  ;;  %v1434_v27 = vsel %vm1090_vm8, %v1412_v55, 0.0 }
 0x1c8   : > { %v2811_v2 = vrot.slane %v2803_v58, 4  ;;  %2286 = vrcp.f32 %v2803_v58  ;;  %v2829_v55 = vrot.slane %v2803_v58, 6  ;;  %vm1797_vm9 = vweird.f32 %v2803_v58 }
 0x1c9   : > { %1414 = vadd.xlane.f32.xlu2 %v1413_v36 }
 0x1ca   : > { %vm1857_vm11 = vweird.f32 %v2811_v2  ;;  %vm1887_vm1 = vweird.f32 %v2829_v55 }
 0x1cf   : > { %1293 = vadd.xlane.f32.xlu0 %v1292_v19  ;;  %1299 = vadd.xlane.f32.xlu1 %v1298_v9 }
 0x1d1   : > { %1423 = vadd.xlane.f32.xlu2 %v1422_v23 }
 0x1d7   : > { %1302 = vadd.xlane.f32.xlu0 %v1301_v44  ;;  %1308 = vadd.xlane.f32.xlu1 %v1307_v25 }
 0x1d9   : > { %1432 = vadd.xlane.f32.xlu2 %v1431_v33 }
 0x1df   : > { %1311 = vadd.xlane.f32.xlu0 %v1310_v10  ;;  %1420 = vadd.xlane.f32.xlu1 %v1419_v45  ;;  %v2808_v45 = vrot.slane %v2803_v58, 2 }
 0x1e1   : > { %2288 = vrcp.f32 %v2808_v45  ;;  %vm1827_vm10 = vweird.f32 %v2808_v45 }
 0x1e2   : > { %2290 = vrcp.f32 %v2811_v2 }
 0x1e3   : > { %2292 = vrcp.f32 %v2829_v55 }
 0x1e7   : > { %1417 = vadd.xlane.f32.xlu0 %v1416_v38  ;;  %1429 = vadd.xlane.f32.xlu1 %v1428_v50 }
 0x1ef   : > { %1426 = vadd.xlane.f32.xlu0 %v1425_v53  ;;  %v2238_v53 = vld [vmem:[%s3343_s10] ss:$0 sm:$0xff] }
 0x1f1   : > { %1185 = vperm.xlu2 %2216, %v1180_v11  }
 0x1f7   : > { %1435 = vadd.xlane.f32.xlu0 %v1434_v27  ;;  %v2831_v27 = vpop.eup %2286 }
 0x1f8   : > { %vm1798_vm12 = vweird.f32 %v2831_v27 }
 0x1f9   : > { %1670 = vperm.xlu2 %2216, %v1145_v54   ;;  %v1099_v54 = vpop.xlane.xlu2 %1098  ;;  %vm2935_vm3 = vmor %vm1797_vm9, %vm1798_vm12 }
 0x1fa   : > { %v1124_v18 = vadd.f32 %v2505_v41, %v1099_v54 }
 0x1fc   : > { %v1197_v54 = vmul.f32 %v2535_v0, %v1124_v18 }
 0x200   : > { %1656 = vperm.xlu1 %2215, %v1131_v30  }
 0x201   : > { %1684 = vperm.xlu2 %2216, %v1159_v35  }
 0x208   : > { %1677 = vperm.xlu1 %2215, %v1152_v60   ;;  %v2237_v60 = vld [vmem:[%s3342_s9 + $0x3] ss:$0 sm:$0xff] }
 0x209   : > { %1698 = vperm.xlu2 %2216, %v1173_v5   ;;  %v1531_v49 = vmul.f32 %v2237_v60, %v2623_v15  ;;  %v1530_v7 = vmul.f32 %v2237_v60, %v2688_v56  ;;  %v1533_v46 = vmul.f32 %v2237_v60, %v2704_v22  ;;  %v1529_v36 = vmul.f32 %v2237_v60, %v2657_v59 }
 0x20a   : > { %v1532_v23 = vmul.f32 %v2237_v60, %v2669_v51  ;;  %v1535_v34 = vmul.f32 %v2237_v60, %v2677_v47  ;;  %v1534_v28 = vmul.f32 %v2237_v60, %v2696_v20 }
 0x20b   : > { %1663 = vperm.xlu0 %2214, %v1138_v52   ;;  %v1540_v40 = vsel %vm1090_vm8, %v1530_v7, 0.0  ;;  %v1549_v37 = vsel %vm1090_vm8, %v1533_v46, 0.0  ;;  %v1537_v9 = vsel %vm1090_vm8, %v1529_v36, 0.0  ;;  %v1205_v46 = vpack.c.bf16 %v1197_v54, %v1197_v54 }
 0x20c   : > { %v1546_v17 = vsel %vm1090_vm8, %v1532_v23, 0.0  ;;  %v1555_v48 = vsel %vm1090_vm8, %v1535_v34, 0.0  ;;  %v1552_v10 = vsel %vm1090_vm8, %v1534_v28, 0.0  ;;  %v1833_v34 = vand.u32 2147483648, %v2808_v45 }
 0x20d   : > { %v1221_v18 = vunpack.c.l.b16 %v1205_v46  ;;  %v1831_v54 = vand.u32 2147483647, %v2808_v45 }
 0x20e   : > { %v2873_v46 = vor.u32 1.1754944e-38, %v1833_v34 }
 0x20f   : > { %vm2918_vm15 = vcmp.eq.f32.partialorder %v1831_v54, 8.507059e+37 }
 0x210   : > { %1691 = vperm.xlu1 %2215, %v1166_v61   ;;  %v1543_v61 = vsel %vm1090_vm8, %v1531_v49, 0.0 }
 0x211   : > { %2219 = vset.pattern.permute.xlu2 %v2326_v1 }
 0x213   : > { %1705 = vperm.xlu0 %2214, %v1180_v11   ;;  %v1536_v11 = vmul.f32 %v2237_v60, %v2715_v42  ;;  %v2840_v60 = vpop.eup %2288 }
 0x214   : > { %v2772_v5 = vpop.xlane.xlu0 %1092  ;;  %v2844_v7 = vpop.eup %2290  ;;  %v1823_v28 = vmul.f32 %v2840_v60, %v2808_v45  ;;  %vm1828_vm14 = vweird.f32 %v2840_v60 }
 0x215   : > { %vm1858_vm2 = vweird.f32 %v2844_v7  ;;  %vm2961_vm5 = vmor %vm1827_vm10, %vm1828_vm14 }
 0x216   : > { %v1824_v12 = vsub.f32 1.0, %v1823_v28  ;;  %v1122_v28 = vadd.f32 %v2505_v41, %v2772_v5  ;;  %v2905_v5 = vrot.slane %v2803_v58, 5  ;;  %vm2975_vm12 = vmor %vm1857_vm11, %vm1858_vm2 }
 0x218   : > { %2220 = vset.pattern.permute.xlu1 %v2326_v1  ;;  %v1195_v51 = vmul.f32 %v2553_v21, %v1122_v28 }
 0x21b   : > { %2217 = vset.pattern.permute.xlu0 %v2330_v24  ;;  %v1793_v24 = vmul.f32 %v2831_v27, %v2803_v58 }
 0x21c   : > { %v2767_v30 = vpop.xlane.xlu2 %1101 }
 0x224   : > { %v1111_v35 = vpop.xlane.xlu2 %1110 }
 0x225   : > { %v1128_v36 = vadd.f32 %v2505_v41, %v1111_v35  ;;  %v1853_v35 = vmul.f32 %v2844_v7, %v2811_v2 }
 0x227   : > { %v1854_v32 = vsub.f32 1.0, %v1853_v35 }
 0x22a   : > { %v1096_v52 = vpop.xlane.xlu1 %1095 }
 0x22b   : > { %v1123_v38 = vadd.f32 %v2505_v41, %v1096_v52  ;;  %v1558_v52 = vsel %vm1090_vm8, %v1536_v11, 0.0 }
 0x22c   : > { %v2774_v3 = vpop.xlane.xlu2 %1296 }
 0x22d   : > { %v1196_v49 = vmul.f32 %v2533_v63, %v1123_v38  ;;  %v1201_v38 = vmul.f32 %v2541_v8, %v1128_v36  ;;  %v1861_v36 = vand.u32 2147483647, %v2811_v2  ;;  %v1322_v28 = vadd.f32 %v2531_v62, %v2774_v3 }
 0x22f   : > { %v1209_v42 = vpack.c.bf16 %v1201_v38, %v1201_v38  ;;  %vm2922_vm0 = vcmp.eq.f32.partialorder %v1861_v36, 8.507059e+37 }
 0x232   : > { %v1105_v39 = vpop.xlane.xlu0 %1104  ;;  %1544 = vadd.xlane.f32.xlu2 %v1543_v61  ;;  %v2782_v14 = vpop.xlane.xlu1 %1107  ;;  %v2837_v61 = vrot.slane %v2803_v58, 3 }
 0x234   : > { %v2778_v57 = vpop.xlane.xlu2 %1305  ;;  %2294 = vrcp.f32 %v2837_v61  ;;  %vm1842_vm4 = vweird.f32 %v2837_v61 }
 0x23a   : > { %v2787_v31 = vpop.xlane.xlu0 %1113  ;;  %1541 = vadd.xlane.f32.xlu1 %v1540_v40  ;;  %1550 = vadd.xlane.f32.xlu2 %v1549_v37  ;;  %v2796_v44 = vpop.xlane.xlu1 %1290  ;;  %v1204_v40 = vpack.c.bf16 %v1196_v49, %v1196_v49  ;;  %v1126_v37 = vadd.f32 %v2505_v41, %v1105_v39  ;;  %v1801_v49 = vand.u32 2147483647, %v2803_v58 }
 0x23b   : > { %v2861_v39 = vpop.eup %2292 }
 0x23c   : > { %v2789_v19 = vpop.xlane.xlu2 %1414  ;;  %v1199_v11 = vmul.f32 %v2562_v26, %v1126_v37  ;;  %v2879_v37 = vpop.eup %2294  ;;  %v1883_v13 = vmul.f32 %v2861_v39, %v2829_v55  ;;  %vm2894_vm13 = vcmp.eq.f32.partialorder %v1801_v49, 8.507059e+37  ;;  %v1855_v49 = vmul.f32 %v2844_v7, %v1854_v32 }
 0x23d   : > { %3366 = vst [vmem:[#allocation10_spill] sm:$0xff] %v2789_v19  ;;  %1538 = vadd.xlane.f32.xlu0 %v1537_v9  ;;  %v1838_v38 = vmul.f32 %v2879_v37, %v2837_v61  ;;  %v1825_v19 = vmul.f32 %v2840_v60, %v1824_v12  ;;  %vm1888_vm6 = vweird.f32 %v2861_v39  ;;  %vm1843_vm9 = vweird.f32 %v2879_v37 }
 0x23e   : > { %v1884_v20 = vsub.f32 1.0, %v1883_v13  ;;  %vm3025_vm11 = vmor %vm1887_vm1, %vm1888_vm6  ;;  %vm1872_vm1 = vweird.f32 %v2905_v5 }
 0x23f   : > { %v1839_v54 = vsub.f32 1.0, %v1838_v38  ;;  %vm3050_vm14 = vmor %vm1842_vm4, %vm1843_vm9 }
 0x242   : > { %1547 = vadd.xlane.f32.xlu1 %v1546_v17  ;;  %1556 = vadd.xlane.f32.xlu2 %v1555_v48  ;;  %v2798_v25 = vpop.xlane.xlu0 %1293  ;;  %v2816_v50 = vpop.xlane.xlu1 %1299  ;;  %v1863_v17 = vand.u32 2147483648, %v2811_v2 }
 0x243   : > { %v1321_v34 = vadd.f32 %v2531_v62, %v2798_v25  ;;  %v1129_v25 = vadd.f32 %v2505_v41, %v2787_v31  ;;  %v1323_v38 = vadd.f32 %v2531_v62, %v2816_v50 }
 0x244   : > { %v2800_v33 = vpop.xlane.xlu2 %1423 }
 0x245   : > { %3367 = vst [vmem:[#allocation11_spill] sm:$0xff] %v2800_v33  ;;  %v1329_v26 = vmul.f32 %v1321_v34, %v2533_v63  ;;  %v1885_v34 = vmul.f32 %v2861_v39, %v1884_v20 }
 0x24a   : > { %1553 = vadd.xlane.f32.xlu1 %v1552_v10  ;;  %v2820_v29 = vpop.xlane.xlu0 %1302  ;;  %v2851_v23 = vpop.xlane.xlu1 %1308  ;;  %v1794_v10 = vsub.f32 1.0, %v1793_v24  ;;  %v2871_v24 = vrot.slane %v2803_v58, 1 }
 0x24b   : > { %3369 = vst [vmem:[#allocation13_spill] sm:$0xff] %v2820_v29 }
 0x24c   : > { %v2818_v16 = vpop.xlane.xlu2 %1432  ;;  %v1795_v33 = vmul.f32 %v2831_v27, %v1794_v10  ;;  %2296 = vrcp.f32 %v2871_v24  ;;  %v1816_v45 = vand.u32 2147483647, %v2871_v24 }
 0x24d   : > { %3368 = vst [vmem:[#allocation12_spill] sm:$0xff] %v2818_v16  ;;  %2298 = vrcp.f32 %v2905_v5 }
 0x251   : > { %1565 = vperm.xlu0 %2217, %v2238_v53   ;;  %v1220_v53 = vunpack.c.l.b16 %v1204_v40  ;;  %v2876_v40 = vor.u32 1.1754944e-38, %v1863_v17 }
 0x252   : > { %1559 = vadd.xlane.f32.xlu1 %v1558_v52  ;;  %v2855_v48 = vpop.xlane.xlu0 %1311  ;;  %v1803_v52 = vand.u32 2147483648, %v2803_v58  ;;  %v2911_v31 = vpop.xlane.xlu1 %1420 }
 0x253   : > { %3371 = vst [vmem:[#allocation15_spill] sm:$0xff] %v2855_v48  ;;  %v1225_v48 = vunpack.c.l.b16 %v1209_v42  ;;  %v1846_v42 = vand.u32 2147483647, %v2837_v61 }
 0x254   : > { %v2848_v9 = vpop.permute.xlu2 %1185  ;;  %v1804_v10 = vor.u32 1.1754944e-38, %v1803_v52  ;;  %v1796_v52 = vadd.f32 %v2831_v27, %v1795_v33  ;;  %v1331_v33 = vmul.f32 %v1323_v38, %v2537_v4 }
 0x255   : > { %3370 = vst [vmem:[#allocation14_spill] sm:$0xff] %v2848_v9  ;;  %v1202_v56 = vmul.f32 %v2848_v9, %v1129_v25  ;;  %v1337_v25 = vpack.c.bf16 %v1329_v26, %v1329_v26  ;;  %vm3002_vm10 = vcmp.eq.f32.partialorder %v1846_v42, 8.507059e+37 }
 0x257   : > { %v1210_v9 = vpack.c.bf16 %v1202_v56, %v1202_v56 }
 0x259   : > { %2218 = vset.pattern.permute.xlu0 %v2326_v1  ;;  %v1891_v1 = vand.u32 2147483647, %v2829_v55 }
 0x25a   : > { %1234 = vperm.xlu2 %2219, %v1221_v18   ;;  %1231 = vperm.xlu0 %2218, %v1220_v53   ;;  %v1207_v18 = vpack.c.bf16 %v1199_v11, %v1199_v11  ;;  %v1893_v53 = vand.u32 2147483648, %v2829_v55  ;;  %v1848_v11 = vand.u32 2147483648, %v2837_v61  ;;  %v2915_v29 = vpop.xlane.xlu0 %1417 }
 0x25b   : > { %vm2966_vm7 = vcmp.eq.f32.partialorder %v1891_v1, 8.507059e+37  ;;  %v1818_v1 = vand.u32 2147483648, %v2871_v24 }
 0x25c   : > { %v2887_v17 = vpop.permute.xlu2 %1670  ;;  %v1223_v16 = vunpack.c.l.b16 %v1207_v18  ;;  %v2927_v32 = vor.u32 1.1754944e-38, %v1893_v53  ;;  %v2939_v36 = vor.u32 1.1754944e-38, %v1848_v11  ;;  %v2942_v18 = vpop.eup %2296  ;;  %v1800_v53 = vsel %vm2935_vm3, %v2831_v27, %v1796_v52 }
 0x25d   : > { %v2981_v56 = vsel %vm2894_vm13, %v1804_v10, %v1800_v53  ;;  %v1808_v3 = vmul.f32 %v2942_v18, %v2871_v24  ;;  %v1886_v27 = vadd.f32 %v2861_v39, %v1885_v34  ;;  %v2995_v35 = vpop.eup %2298  ;;  %v1330_v10 = vmul.f32 %v1322_v28, %v2535_v0 }
 0x25e   : > { %v1353_v52 = vunpack.c.l.b16 %v1337_v25  ;;  %v1868_v55 = vmul.f32 %v2995_v35, %v2905_v5  ;;  %v1339_v28 = vpack.c.bf16 %v1331_v33, %v1331_v33  ;;  %v1326_v25 = vadd.f32 %v2531_v62, %v2851_v23 }
 0x25f   : > { %v1890_v13 = vsel %vm3025_vm11, %v2861_v39, %v1886_v27  ;;  %v1338_v42 = vpack.c.bf16 %v1330_v10, %v1330_v10  ;;  %vm1813_vm13 = vweird.f32 %v2942_v18  ;;  %v1819_v27 = vor.u32 1.1754944e-38, %v1818_v1 }
 0x260   : > { %v3059_v23 = vsel %vm2966_vm7, %v2927_v32, %v1890_v13  ;;  %v1334_v32 = vmul.f32 %v1326_v25, %v2541_v8  ;;  %v1446_v1 = vadd.f32 %v2508_v43, %v2911_v31  ;;  %vm1873_vm3 = vweird.f32 %v2995_v35 }
 0x261   : > { %vm3142_vm4 = vmor %vm1872_vm1, %vm1873_vm3  ;;  %vm1263_vm11 = vcmask 1042434   ;;  %vm1273_vm1 = vcmask 1047559  }
 0x262   : > { %1240 = vperm.xlu2 %2219, %v1223_v16   ;;  %1246 = vperm.xlu0 %2218, %v1225_v48   ;;  %v1826_v16 = vadd.f32 %v2840_v60, %v1825_v19  ;;  %v1856_v48 = vadd.f32 %v2844_v7, %v1855_v49  ;;  %v1203_v19 = vpack.c.bf16 %v1195_v51, %v1195_v51  ;;  %v3032_v12 = vpop.xlane.xlu0 %1426  ;;  %v1869_v51 = vsub.f32 1.0, %v1868_v55 }
 0x263   : > { %v1125_v49 = vadd.f32 %v2505_v41, %v2767_v30  ;;  %v1840_v30 = vmul.f32 %v2879_v37, %v1839_v54  ;;  %v1226_v54 = vunpack.c.l.b16 %v1210_v9 }
 0x264   : > { %v1685_v11 = vpop.permute.xlu2 %1684  ;;  %v1830_v50 = vsel %vm2961_vm5, %v2840_v60, %v1826_v16  ;;  %v1860_v2 = vsel %vm2975_vm12, %v2844_v7, %v1856_v48  ;;  %v1219_v53 = vunpack.c.l.b16 %v1203_v19  ;;  %v1709_v60 = vmul.f32 %v2887_v17, %v2623_v15  ;;  %v3009_v48 = vpop.xlane.xlu1 %1429 }
 0x265   : > { %v1198_v20 = vmul.f32 %v2537_v4, %v1125_v49  ;;  %v3007_v16 = vrot.slane %v2803_v58, 7  ;;  %v3014_v34 = vsel %vm2918_vm15, %v2873_v46, %v1830_v50  ;;  %v3019_v9 = vsel %vm2922_vm0, %v2876_v40, %v1860_v2 }
 0x266   : > { %v1841_v58 = vadd.f32 %v2879_v37, %v1840_v30  ;;  %v1809_v17 = vsub.f32 1.0, %v1808_v3  ;;  %v1325_v46 = vadd.f32 %v2531_v62, %v2778_v57  ;;  %v1711_v40 = vmul.f32 %v1685_v11, %v2704_v22 }
 0x267   : > { %v1206_v57 = vpack.c.bf16 %v1198_v20, %v1198_v20  ;;  %v1127_v22 = vadd.f32 %v2505_v41, %v2782_v14  ;;  %v1729_v11 = vsel %vm1090_vm8, %v1709_v60, 0.0  ;;  %vm1812_vm15 = vweird.f32 %v2871_v24 }
 0x268   : > { %2300 = vrcp.f32 %v3007_v16  ;;  %v1845_v14 = vsel %vm3050_vm14, %v2879_v37, %v1841_v58  ;;  %v1810_v61 = vmul.f32 %v2942_v18, %v1809_v17  ;;  %v1333_v19 = vmul.f32 %v1325_v46, %v2539_v6  ;;  %vm3105_vm2 = vmor %vm1812_vm15, %vm1813_vm13 }
 0x269   : > { %v1743_v49 = vsel %vm1090_vm8, %v1711_v40, 0.0  ;;  %v1878_v30 = vand.u32 2147483648, %v2905_v5  ;;  %v1354_v3 = vunpack.c.l.b16 %v1338_v42  ;;  %v1355_v50 = vunpack.c.l.b16 %v1339_v28 }
 0x26a   : > { %1249 = vperm.xlu2 %2219, %v1226_v54   ;;  %1364 = vperm.xlu0 %2218, %v1353_v52   ;;  %v1730_v26 = vrot.slane %v1729_v11, 4  ;;  %v1222_v2 = vunpack.c.l.b16 %v1206_v57  ;;  %v1876_v37 = vand.u32 2147483647, %v2905_v5  ;;  %v1744_v10 = vrot.slane %v1743_v49, 4  ;;  %v3098_v13 = vpop.xlane.xlu0 %1435  ;;  %v3411_v5 = vld [vmem:[#allocation14_spill] sm:$0xff] }
 0x26b   : > { %1228 = vperm.xlu1 %2220, %v1219_v53   ;;  %v3076_v54 = vsel %vm3002_vm10, %v2939_v36, %v1845_v14  ;;  %v1811_v53 = vadd.f32 %v2942_v18, %v1810_v61  ;;  %v1341_v60 = vpack.c.bf16 %v1333_v19, %v1333_v19  ;;  %vm3086_vm0 = vcmp.eq.f32.partialorder %v1816_v45, 8.507059e+37  ;;  %v2176_v14 = vld [vmem:[%s3344_s11 + $0x8] sm:$0xff] }
 0x26c   : > { %v1699_v38 = vpop.permute.xlu2 %1698  ;;  %v3091_v36 = vor.u32 1.1754944e-38, %v1878_v30  ;;  %v1342_v7 = vpack.c.bf16 %v1334_v32, %v1334_v32  ;;  %v1445_v17 = vadd.f32 %v2508_v43, %v2915_v29  ;;  %v1731_v46 = vadd.f32 %v1730_v26, %v1729_v11  ;;  %v3396_v30 = vld [vmem:[#allocation13_spill] sm:$0xff]  ;;  %1980 = vmatpush.bf16.msra.mxu0 %v2176_v14  ;;  %v3402_v14 = vld [vmem:[#allocation12_spill] sm:$0xff] }
 0x26d   : > { %v1713_v41 = vmul.f32 %v1699_v38, %v2677_v47  ;;  %v1200_v47 = vmul.f32 %v2539_v6, %v1127_v22  ;;  %v1870_v31 = vmul.f32 %v2995_v35, %v1869_v51  ;;  %v1745_v42 = vadd.f32 %v1744_v10, %v1743_v49  ;;  %v3401_v29 = vld [vmem:[#allocation5_spill] sm:$0xff] }
 0x26e   : > { %v3079_v20 = vpop.eup %2300  ;;  %v1357_v38 = vunpack.c.l.b16 %v1341_v60  ;;  %v1454_v57 = vmul.f32 %v1446_v1, %v2535_v0  ;;  %v1815_v22 = vsel %vm3105_vm2, %v2942_v18, %v1811_v53  ;;  %v1358_v11 = vunpack.c.l.b16 %v1342_v7  ;;  %v2175_v53 = vld [vmem:[%s3344_s11] sm:$0xff] }
 0x26f   : > { %v1757_v52 = vsel %vm1090_vm8, %v1713_v41, 0.0  ;;  %v1208_v40 = vpack.c.bf16 %v1200_v47, %v1200_v47  ;;  %v1898_v25 = vmul.f32 %v3079_v20, %v3007_v16  ;;  %v1453_v24 = vmul.f32 %v1445_v17, %v2533_v63 }
 0x270   : > { %v1758_v45 = vrot.slane %v1757_v52, 4  ;;  %v1732_v39 = vrot.slane %v1731_v46, 2  ;;  %v3123_v51 = vadd.f32 %v2995_v35, %v1870_v31  ;;  %v1324_v18 = vadd.f32 %v2531_v62, %v3396_v30  ;;  %1981 = vmatpush.bf16.msra.mxu0 %v2175_v53 }
 0x271   : > { %v1224_v61 = vunpack.c.l.b16 %v1208_v40  ;;  %v1899_v32 = vsub.f32 1.0, %v1898_v25  ;;  %v1906_v26 = vand.u32 2147483647, %v3007_v16  ;;  %v1448_v47 = vadd.f32 %v2508_v43, %v3032_v12 }
 0x272   : > { %1367 = vperm.xlu2 %2219, %v1354_v3   ;;  %1370 = vperm.xlu0 %2218, %v1355_v50   ;;  %v1657_v33 = vpop.permute.xlu1 %1656  ;;  %v1759_v49 = vadd.f32 %v1758_v45, %v1757_v52  ;;  %v1746_v3 = vrot.slane %v1745_v42, 2  ;;  %v1461_v60 = vpack.c.bf16 %v1453_v24, %v1453_v24  ;;  %v1733_v1 = vadd.f32 %v1732_v39, %v1731_v46  ;;  %v3400_v45 = vld [vmem:[#allocation7_spill] sm:$0xff] }
 0x273   : > { %v1707_v15 = vmul.f32 %v1657_v33, %v2657_v59  ;;  %1237 = vperm.xlu1 %2220, %v1222_v2   ;;  %v1320_v59 = vadd.f32 %v2531_v62, %v2796_v44  ;;  %v1908_v44 = vand.u32 2147483648, %v3007_v16  ;;  %v1462_v2 = vpack.c.bf16 %v1454_v57, %v1454_v57  ;;  %v3397_v33 = vld [vmem:[#allocation6_spill] sm:$0xff] }
 0x274   : > { %v1760_v31 = vrot.slane %v1759_v49, 2  ;;  %v1747_v58 = vadd.f32 %v1746_v3, %v1745_v42  ;;  %vm1903_vm5 = vweird.f32 %v3079_v20  ;;  %v1332_v25 = vmul.f32 %v1324_v18, %v3401_v29  ;;  %v3403_v3 = vld [vmem:[#allocation15_spill] sm:$0xff] }
 0x275   : > { %v1715_v55 = vsel %vm1090_vm8, %v1707_v15, 0.0  ;;  %v1328_v19 = vmul.f32 %v1320_v59, %v2553_v21  ;;  %v3136_v15 = vsel %vm3086_vm0, %v1819_v27, %v1815_v22  ;;  %v3146_v7 = vor.u32 1.1754944e-38, %v1908_v44 }
 0x276   : > { %v1716_v28 = vrot.slane %v1715_v55, 4  ;;  %v1875_v27 = vsel %vm3142_vm4, %v2995_v35, %v3123_v51  ;;  %v1478_v44 = vunpack.c.l.b16 %v1462_v2  ;;  %v1477_v22 = vunpack.c.l.b16 %v1461_v60  ;;  %v3405_v60 = vld [vmem:[#allocation10_spill] sm:$0xff] }
 0x277   : > { %v1336_v17 = vpack.c.bf16 %v1328_v19, %v1328_v19  ;;  %vm1902_vm6 = vweird.f32 %v3007_v16  ;;  %v1761_v19 = vadd.f32 %v1760_v31, %v1759_v49  ;;  %v1327_v18 = vadd.f32 %v2531_v62, %v3403_v3 }
 0x278   : > { %v1717_v41 = vadd.f32 %v1716_v28, %v1715_v55  ;;  %v1900_v28 = vmul.f32 %v3079_v20, %v1899_v32  ;;  %v1444_v49 = vadd.f32 %v2508_v43, %v3405_v60  ;;  %vm3171_vm7 = vcmp.eq.f32.partialorder %v1876_v37, 8.507059e+37  ;;  %vm3188_vm12 = vmor %vm1902_vm6, %vm1903_vm5 }
 0x279   : > { %v1352_v42 = vunpack.c.l.b16 %v1336_v17  ;;  %v1340_v17 = vpack.c.bf16 %v1332_v25, %v1332_v25  ;;  %vm3176_vm9 = vcmp.eq.f32.partialorder %v1906_v26, 8.507059e+37  ;;  %v1335_v37 = vmul.f32 %v1327_v18, %v3411_v5 }
 0x27a   : > { %1376 = vperm.xlu2 %2219, %v1357_v38   ;;  %1379 = vperm.xlu0 %2218, %v1358_v11   ;;  %v1678_v50 = vpop.permute.xlu1 %1677  ;;  %v1718_v10 = vrot.slane %v1717_v41, 2  ;;  %v1456_v38 = vmul.f32 %v1448_v47, %v3401_v29  ;;  %v1734_v11 = vrot.slane %v1733_v1, 1  ;;  %v1901_v2 = vadd.f32 %v3079_v20, %v1900_v28 }
 0x27b   : > { %v1710_v52 = vmul.f32 %v1678_v50, %v3397_v33  ;;  %1243 = vperm.xlu1 %2220, %v1224_v61   ;;  %v1450_v61 = vadd.f32 %v2508_v43, %v3402_v14  ;;  %v1748_v50 = vrot.slane %v1747_v58, 1  ;;  %v1356_v3 = vunpack.c.l.b16 %v1340_v17 }
 0x27c   : > { %v1719_v57 = vadd.f32 %v1718_v10, %v1717_v41  ;;  %v1464_v47 = vpack.c.bf16 %v1456_v38, %v1456_v38  ;;  %v1735_v31 = vadd.f32 %v1734_v11, %v1733_v1  ;;  %v1343_v17 = vpack.c.bf16 %v1335_v37, %v1335_v37 }
 0x27d   : > { %v1736_v40 = vsel %vm1090_vm8, %v1710_v52, 0.0  ;;  %v1664_v59 = vpop.permute.xlu0 %1663  ;;  %v3404_v52 = vld [vmem:[#allocation8_spill] sm:$0xff]  ;;  %v1458_v62 = vmul.f32 %v1450_v61, %v2541_v8  ;;  %v1749_v25 = vadd.f32 %v1748_v50, %v1747_v58  ;;  %vm1261_vm10 = vcmask 1041409  }
 0x27e   : > { %v1737_v46 = vrot.slane %v1736_v40, 4  ;;  %v1708_v55 = vmul.f32 %v1664_v59, %v3400_v45  ;;  %v1720_v10 = vrot.slane %v1719_v57, 1  ;;  %v1762_v59 = vrot.slane %v1761_v19, 1 }
 0x27f   : > { %v1836_v14 = vmul.f32 %v3014_v34, %v1735_v31  ;;  %v1866_v18 = vmul.f32 %v3019_v9, %v1749_v25  ;;  %v1359_v12 = vunpack.c.l.b16 %v1343_v17  ;;  %vm1265_vm13 = vcmask 1043459  }
 0x280   : > { %v1738_v24 = vadd.f32 %v1737_v46, %v1736_v40  ;;  %v1722_v39 = vsel %vm1090_vm8, %v1708_v55, 0.0  ;;  %vm1267_vm14 = vcmask 1044484   ;;  %vm1269_vm15 = vcmask 1045509  }
 0x281   : > { %v1723_v30 = vrot.slane %v1722_v39, 4  ;;  %vm1271_vm0 = vcmask 1046534   ;;  %vm1989_vm2 = vcmask 257024  }
 0x282   : > { %v1739_v32 = vrot.slane %v1738_v24, 2  ;;  %1488 = vperm.xlu2 %2219, %v1477_v22   ;;  %1491 = vperm.xlu0 %2218, %v1478_v44   ;;  %v1692_v41 = vpop.permute.xlu1 %1691  ;;  %v3410_v22 = vld [vmem:[#allocation9_spill] sm:$0xff] }
 0x283   : > { %v1724_v33 = vadd.f32 %v1723_v30, %v1722_v39  ;;  %v1712_v53 = vmul.f32 %v1692_v41, %v3404_v52  ;;  %1361 = vperm.xlu1 %2220, %v1352_v42   ;;  %v1721_v39 = vadd.f32 %v1720_v10, %v1719_v57  ;;  %v1466_v52 = vpack.c.bf16 %v1458_v62, %v1458_v62 }
 0x284   : > { %v1740_v40 = vadd.f32 %v1739_v32, %v1738_v24  ;;  %v1480_v24 = vunpack.c.l.b16 %v1464_v47  ;;  %v1763_v32 = vadd.f32 %v1762_v59, %v1761_v19  ;;  %v1905_v47 = vsel %vm3188_vm12, %v3079_v20, %v1901_v2 }
 0x285   : > { %v1725_v46 = vrot.slane %v1724_v33, 2  ;;  %v1750_v55 = vsel %vm1090_vm8, %v1712_v53, 0.0  ;;  %v1706_v44 = vpop.permute.xlu0 %1705  ;;  %v1452_v19 = vmul.f32 %v1444_v49, %v2553_v21  ;;  %v1806_v10 = vmul.f32 %v2981_v56, %v1721_v39 }
 0x286   : > { %v1741_v1 = vrot.slane %v1740_v40, 1  ;;  %v1751_v38 = vrot.slane %v1750_v55, 4  ;;  %v1714_v11 = vmul.f32 %v1706_v44, %v3410_v22  ;;  %v1914_v53 = vpack.c.bf16 %v1836_v14, %v1836_v14 }
 0x287   : > { %v1726_v42 = vadd.f32 %v1725_v46, %v1724_v33  ;;  %v1896_v9 = vmul.f32 %v3059_v23, %v1763_v32  ;;  %v1916_v59 = vpack.c.bf16 %v1866_v18, %v1866_v18  ;;  %v1880_v56 = vsel %vm3171_vm7, %v3091_v36, %v1875_v27 }
 0x288   : > { %v1742_v61 = vadd.f32 %v1741_v1, %v1740_v40  ;;  %v1752_v30 = vadd.f32 %v1751_v38, %v1750_v55  ;;  %v1764_v26 = vsel %vm1090_vm8, %v1714_v11, 0.0  ;;  %v1910_v2 = vsel %vm3176_vm9, %v3146_v7, %v1905_v47  ;;  %v3414_v38 = vld [vmem:[#allocation11_spill] sm:$0xff] }
 0x289   : > { %v1727_v41 = vrot.slane %v1726_v42, 1  ;;  %v1765_v57 = vrot.slane %v1764_v26, 4  ;;  %v1460_v23 = vpack.c.bf16 %v1452_v19, %v1452_v19  ;;  %v1912_v49 = vpack.c.bf16 %v1806_v10, %v1806_v10 }
 0x28a   : > { %v1851_v34 = vmul.f32 %v3076_v54, %v1742_v61  ;;  %v1753_v50 = vrot.slane %v1752_v30, 2  ;;  %1497 = vperm.xlu2 %2219, %v1480_v24   ;;  %v1482_v46 = vunpack.c.l.b16 %v1466_v52  ;;  %v1938_v55 = vunpack.c.l.b16 %v1914_v53 }
 0x28b   : > { %v1728_v16 = vadd.f32 %v1727_v41, %v1726_v42  ;;  %v1766_v33 = vadd.f32 %v1765_v57, %v1764_v26  ;;  %1373 = vperm.xlu1 %2220, %v1356_v3   ;;  %v1918_v25 = vpack.c.bf16 %v1896_v9, %v1896_v9  ;;  %v1447_v36 = vadd.f32 %v2508_v43, %v3414_v38 }
 0x28c   : > { %v1754_v60 = vadd.f32 %v1753_v50, %v1752_v30  ;;  %v1915_v54 = vpack.c.bf16 %v1851_v34, %v1851_v34  ;;  %v1940_v27 = vunpack.c.l.b16 %v1916_v59  ;;  %v1936_v7 = vunpack.c.l.b16 %v1912_v49 }
 0x28d   : > { %v1821_v31 = vmul.f32 %v3136_v15, %v1728_v16  ;;  %v1767_v40 = vrot.slane %v1766_v33, 2  ;;  %v1946_v11 = vrot.slane %v1938_v55, 6  ;;  %v1942_v39 = vunpack.c.l.b16 %v1918_v25 }
 0x28e   : > { %v1755_v20 = vrot.slane %v1754_v60, 1  ;;  %v1939_v1 = vunpack.c.l.b16 %v1915_v54  ;;  %v1950_v61 = vrot.slane %v1940_v27, 4  ;;  %v1476_v57 = vunpack.c.l.b16 %v1460_v23 }
 0x28f   : > { %v1913_v62 = vpack.c.bf16 %v1821_v31, %v1821_v31  ;;  %v1768_v15 = vadd.f32 %v1767_v40, %v1766_v33  ;;  %v1455_v18 = vmul.f32 %v1447_v36, %v2537_v4  ;;  %v1954_v50 = vrot.slane %v1942_v39, 2 }
 0x290   : > { %v1756_v44 = vadd.f32 %v1755_v20, %v1754_v60  ;;  %v1948_v42 = vrot.slane %v1939_v1, 5  ;;  %v1449_v33 = vadd.f32 %v2508_v43, %v3009_v48 }
 0x291   : > { %v1937_v35 = vunpack.c.l.b16 %v1913_v62  ;;  %v1769_v51 = vrot.slane %v1768_v15, 1  ;;  %v1463_v16 = vpack.c.bf16 %v1455_v18, %v1455_v18  ;;  %v3416_v18 = vlaneseq }
 0x292   : > { %v1881_v45 = vmul.f32 %v1880_v56, %v1756_v44  ;;  %1503 = vperm.xlu2 %2219, %v1482_v46   ;;  %v1457_v17 = vmul.f32 %v1449_v33, %v2539_v6 }
 0x293   : > { %v1944_v28 = vrot.slane %v1937_v35, 7  ;;  %v1770_v22 = vadd.f32 %v1769_v51, %v1768_v15  ;;  %1382 = vperm.xlu1 %2220, %v1359_v12   ;;  %v1479_v60 = vunpack.c.l.b16 %v1463_v16 }
 0x294   : > { %v1917_v24 = vpack.c.bf16 %v1881_v45, %v1881_v45  ;;  %v1465_v9 = vpack.c.bf16 %v1457_v17, %v1457_v17 }
 0x295   : > { %v1945_v37 = vsel %vm1261_vm10, %v1944_v28, %v1936_v7  ;;  %v1911_v14 = vmul.f32 %v1910_v2, %v1770_v22 }
 0x296   : > { %v1941_v30 = vunpack.c.l.b16 %v1917_v24  ;;  %v1947_v26 = vsel %vm1263_vm11, %v1946_v11, %v1945_v37  ;;  %v1481_v54 = vunpack.c.l.b16 %v1465_v9  ;;  %v1451_v11 = vadd.f32 %v2508_v43, %v3098_v13 }
 0x297   : > { %v1919_v3 = vpack.c.bf16 %v1911_v14, %v1911_v14  ;;  %v1949_v32 = vsel %vm1265_vm13, %v1948_v42, %v1947_v26 }
 0x298   : > { %v1952_v41 = vrot.slane %v1941_v30, 3  ;;  %v1951_v58 = vsel %vm1267_vm14, %v1950_v61, %v1949_v32 }
 0x299   : > { %v1943_v34 = vunpack.c.l.b16 %v1919_v3 }
 0x29a   : > { %v1953_v47 = vsel %vm1269_vm15, %v1952_v41, %v1951_v58  ;;  %v3415_v41 = vld [vmem:[#allocation3_spill] sm:$0xff] }
 0x29b   : > { %1485 = vperm.xlu1 %2220, %v1476_v57   ;;  %v1955_v19 = vsel %vm1271_vm0, %v1954_v50, %v1953_v47  ;;  %v1956_v10 = vrot.slane %v1943_v34, 1  ;;  %v3239_v34 = vand.u32 127, %v3416_v18 }
 0x29d   : > { %v1957_v52 = vsel %vm1273_vm1, %v1956_v10, %v1955_v19 }
 0x29e   : > { %v1958_v53 = vpack.c.b16 %v1957_v52, %v1957_v52 }
 0x2a0   : > { %2171 = vmatmul.msk.bf16.vlgmr.msra.gmra.mxu0 %vm1090_vm8, %v1958_v53  ;;  %vm1277_vm8 = vcmask 60416  }
 0x2a3   : > { %1494 = vperm.xlu1 %2220, %v1479_v60  }
 0x2a5   : > { %v1545_v31 = vpop.xlane.xlu2 %1544 }
 0x2ab   : > { %1500 = vperm.xlu1 %2220, %v1481_v54  }
 0x2ad   : > { %v1542_v40 = vpop.xlane.xlu1 %1541  ;;  %v1551_v59 = vpop.xlane.xlu2 %1550 }
 0x2b0   : > { %v1539_v56 = vpop.xlane.xlu0 %1538 }
 0x2b5   : > { %v1548_v20 = vpop.xlane.xlu1 %1547  ;;  %v1557_v62 = vpop.xlane.xlu2 %1556 }
 0x2bd   : > { %v1554_v51 = vpop.xlane.xlu1 %1553  ;;  %v1235_v26 = vpop.permute.xlu2 %1234 }
 0x2be   : > { %v1255_v52 = vperm.slane %v1235_v26, %v3239_v34 }
 0x2c3   : > { %v1566_v2 = vpop.permute.xlu0 %1565 }
 0x2c4   : > { %v1568_v23 = vadd.f32 %v1566_v2, %v1539_v56  ;;  %v1570_v48 = vadd.f32 %v1566_v2, %v1545_v31  ;;  %v1569_v49 = vadd.f32 %v1566_v2, %v1542_v40  ;;  %v1574_v55 = vadd.f32 %v1566_v2, %v1557_v62 }
 0x2c5   : > { %v1571_v44 = vadd.f32 %v1566_v2, %v1548_v20  ;;  %v1572_v25 = vadd.f32 %v1566_v2, %v1551_v59  ;;  %v1241_v57 = vpop.permute.xlu2 %1240 }
 0x2c6   : > { %v1576_v15 = vmul.f32 %v1568_v23, %v2553_v21  ;;  %v1578_v46 = vmul.f32 %v1570_v48, %v2535_v0  ;;  %v1577_v12 = vmul.f32 %v1569_v49, %v2533_v63  ;;  %v1582_v45 = vmul.f32 %v1574_v55, %v2541_v8 }
 0x2c7   : > { %v1579_v7 = vmul.f32 %v1571_v44, %v2537_v4  ;;  %v1580_v21 = vmul.f32 %v1572_v25, %v3401_v29  ;;  %v1573_v63 = vadd.f32 %v1566_v2, %v1554_v51  ;;  %v1459_v8 = vmul.f32 %v1451_v11, %v3411_v5  ;;  %v1560_v4 = vpop.xlane.xlu1 %1559 }
 0x2c8   : > { %v1584_v1 = vpack.c.bf16 %v1576_v15, %v1576_v15  ;;  %v1586_v35 = vpack.c.bf16 %v1578_v46, %v1578_v46  ;;  %v1585_v38 = vpack.c.bf16 %v1577_v12, %v1577_v12  ;;  %v1590_v0 = vpack.c.bf16 %v1582_v45, %v1582_v45 }
 0x2c9   : > { %v1587_v22 = vpack.c.bf16 %v1579_v7, %v1579_v7  ;;  %v1588_v24 = vpack.c.bf16 %v1580_v21, %v1580_v21  ;;  %v1581_v37 = vmul.f32 %v1573_v63, %v2539_v6  ;;  %v1575_v29 = vadd.f32 %v1566_v2, %v1560_v4 }
 0x2ca   : > { %v1600_v36 = vunpack.c.l.b16 %v1584_v1  ;;  %v1602_v27 = vunpack.c.l.b16 %v1586_v35  ;;  %v1601_v28 = vunpack.c.l.b16 %v1585_v38  ;;  %v1606_v39 = vunpack.c.l.b16 %v1590_v0 }
 0x2cb   : > { %v1603_v42 = vunpack.c.l.b16 %v1587_v22  ;;  %v1604_v14 = vunpack.c.l.b16 %v1588_v24  ;;  %v1589_v61 = vpack.c.bf16 %v1581_v37, %v1581_v37  ;;  %v1467_v30 = vpack.c.bf16 %v1459_v8, %v1459_v8  ;;  %v2239_v8 = vld [vmem:[%s3345_s12] ss:$0 sm:$0xff] }
 0x2cc   : > { %1609 = vperm.xlu2 %2219, %v1600_v36   ;;  %1615 = vperm.xlu0 %2218, %v1602_v27   ;;  %v1583_v3 = vmul.f32 %v1575_v29, %v3411_v5  ;;  %v1232_v32 = vpop.permute.xlu0 %1231  ;;  %v1257_v9 = vperm.slane %v1241_v57, %v3239_v34  ;;  %v3417_v29 = vld [vmem:[#allocation4_spill] sm:$0xff] }
 0x2cd   : > { %1612 = vperm.xlu1 %2220, %v1601_v28   ;;  %v1605_v43 = vunpack.c.l.b16 %v1589_v61  ;;  %v1483_v13 = vunpack.c.l.b16 %v1467_v30  ;;  %v1254_v10 = vperm.slane %v1232_v32, %v3239_v34  ;;  %v1250_v53 = vpop.permute.xlu2 %1249 }
 0x2ce   : > { %v1591_v58 = vpack.c.bf16 %v1583_v3, %v1583_v3  ;;  %v1260_v20 = vperm.slane %v1250_v53, %v3239_v34 }
 0x2d0   : > { %v1607_v50 = vunpack.c.l.b16 %v1591_v58 }
 0x2d4   : > { %1627 = vperm.xlu0 %2218, %v1606_v39   ;;  %1618 = vperm.xlu2 %2219, %v1603_v42   ;;  %v1247_v47 = vpop.permute.xlu0 %1246 }
 0x2d5   : > { %1621 = vperm.xlu1 %2220, %v1604_v14   ;;  %v1259_v59 = vperm.slane %v1247_v47, %v3239_v34  ;;  %v1368_v62 = vpop.permute.xlu2 %1367 }
 0x2d6   : > { %v1386_v25 = vperm.slane %v1368_v62, %v3239_v34 }
 0x2dc   : > { %1624 = vperm.xlu2 %2219, %v1605_v43   ;;  %2221 = vset.pattern.permute.xlu0 %v3415_v41  ;;  %v1365_v31 = vpop.permute.xlu0 %1364 }
 0x2dd   : > { %1506 = vperm.xlu1 %2220, %v1483_v13   ;;  %v1229_v6 = vpop.permute.xlu1 %1228  ;;  %v1385_v55 = vperm.slane %v1365_v31, %v3239_v34  ;;  %v1377_v36 = vpop.permute.xlu2 %1376 }
 0x2de   : > { %v1253_v19 = vperm.slane %v1229_v6, %v3239_v34  ;;  %v1389_v7 = vperm.slane %v1377_v36, %v3239_v34 }
 0x2e0   : > { %v1262_v16 = vsel %vm1261_vm10, %v1254_v10, %v1253_v19 }
 0x2e1   : > { %v1264_v60 = vsel %vm1263_vm11, %v1255_v52, %v1262_v16 }
 0x2e4   : > { %1630 = vperm.xlu2 %2219, %v1607_v50   ;;  %v1371_v44 = vpop.permute.xlu0 %1370 }
 0x2e5   : > { %v1238_v5 = vpop.permute.xlu1 %1237  ;;  %v1387_v51 = vperm.slane %v1371_v44, %v3239_v34  ;;  %v1489_v42 = vpop.permute.xlu2 %1488 }
 0x2e6   : > { %v1256_v33 = vperm.slane %v1238_v5, %v3239_v34 }
 0x2e8   : > { %v1266_v17 = vsel %vm1265_vm13, %v1256_v33, %v1264_v60  ;;  %v1509_v33 = vperm.slane %v1489_v42, %v3239_v34 }
 0x2e9   : > { %v1268_v56 = vsel %vm1267_vm14, %v1257_v9, %v1266_v17 }
 0x2ec   : > { %v1380_v28 = vpop.permute.xlu0 %1379 }
 0x2ed   : > { %v1244_v54 = vpop.permute.xlu1 %1243  ;;  %v1390_v0 = vperm.slane %v1380_v28, %v3239_v34  ;;  %v1498_v37 = vpop.permute.xlu2 %1497 }
 0x2ee   : > { %v1258_v40 = vperm.slane %v1244_v54, %v3239_v34 }
 0x2f0   : > { %v1270_v2 = vsel %vm1269_vm15, %v1258_v40, %v1268_v56 }
 0x2f1   : > { %v1272_v23 = vsel %vm1271_vm0, %v1259_v59, %v1270_v2 }
 0x2f2   : > { %v1274_v48 = vsel %vm1273_vm1, %v1260_v20, %v1272_v23 }
 0x2f3   : > { %v1275_v49 = vpack.c.b16 %v1274_v48, %v1274_v48 }
 0x2f4   : > { %v1492_v6 = vpop.permute.xlu0 %1491 }
 0x2f5   : > { %v1362_v15 = vpop.permute.xlu1 %1361  ;;  %1278 = vst.msk [vmem:[%s3260_s22] sm:$0xf] %vm1277_vm8, %v1275_v49  ;;  %v1504_v30 = vpop.permute.xlu2 %1503  ;;  %v1510_v17 = vperm.slane %v1492_v6, %v3239_v34 }
 0x2f6   : > { %v1384_v46 = vperm.slane %v1362_v15, %v3239_v34  ;;  %v1512_v15 = vperm.slane %v1498_v37, %v3239_v34 }
 0x2f8   : > { %v1392_v12 = vsel %vm1261_vm10, %v1385_v55, %v1384_v46 }
 0x2f9   : > { %v1393_v1 = vsel %vm1263_vm11, %v1386_v25, %v1392_v12 }
 0x2fa   : > { %v1394_v27 = vsel %vm1265_vm13, %v1387_v51, %v1393_v1  ;;  %v1514_v51 = vperm.slane %v1504_v30, %v3239_v34 }
 0x2fd   : > { %v1374_v35 = vpop.permute.xlu1 %1373 }
 0x2fe   : > { %v1388_v38 = vperm.slane %v1374_v35, %v3239_v34 }
 0x300   : > { %v1395_v45 = vsel %vm1267_vm14, %v1388_v38, %v1394_v27 }
 0x301   : > { %v1396_v21 = vsel %vm1269_vm15, %v1389_v7, %v1395_v45 }
 0x302   : > { %v1397_v11 = vsel %vm1271_vm0, %v1390_v0, %v1396_v21 }
 0x305   : > { %v1383_v22 = vpop.permute.xlu1 %1382 }
 0x306   : > { %v1391_v63 = vperm.slane %v1383_v22, %v3239_v34 }
 0x308   : > { %v1398_v24 = vsel %vm1273_vm1, %v1391_v63, %v1397_v11 }
 0x309   : > { %v1399_v39 = vpack.c.b16 %v1398_v24, %v1398_v24 }
 0x30b   : > { %2160 = vst.msk [vmem:[%s3260_s22 + $0x4] sm:$0xf] %vm1277_vm8, %v1399_v39 }
 0x30d   : > { %v1486_v3 = vpop.permute.xlu1 %1485 }
 0x30e   : > { %v1508_v5 = vperm.slane %v1486_v3, %v3239_v34 }
 0x310   : > { %v1516_v52 = vsel %vm1261_vm10, %v1509_v33, %v1508_v5 }
 0x311   : > { %v1517_v56 = vsel %vm1263_vm11, %v1510_v17, %v1516_v52 }
 0x315   : > { %v1495_v13 = vpop.permute.xlu1 %1494 }
 0x316   : > { %v1511_v53 = vperm.slane %v1495_v13, %v3239_v34 }
 0x318   : > { %v1518_v23 = vsel %vm1265_vm13, %v1511_v53, %v1517_v56 }
 0x319   : > { %v1519_v12 = vsel %vm1267_vm14, %v1512_v15, %v1518_v23 }
 0x31d   : > { %v1983_v4 = vpop.f32.mrf.mxu0  ;;  %v1501_v58 = vpop.permute.xlu1 %1500 }
 0x31e   : > { %v1984_v14 = vadd.f32 %v2239_v8, %v1983_v4  ;;  %v1513_v48 = vperm.slane %v1501_v58, %v3239_v34 }
 0x320   : > { %v1987_v61 = vmul.f32 %v1984_v14, %v3417_v29  ;;  %v1520_v1 = vsel %vm1269_vm15, %v1513_v48, %v1519_v12 }
 0x321   : > { %v1521_v27 = vsel %vm1271_vm0, %v1514_v51, %v1520_v1 }
 0x322   : > { %v1988_v26 = vpack.c.bf16 %v1987_v61, %v1987_v61 }
 0x324   : > { %1990 = vst.msk [vmem:[%s575_s27] sm:$0xf] %vm1989_vm2, %v1988_v26 }
 0x325   : > { %v1985_v32 = vpop.f32.mrf.mxu0 }
 0x326   : > { %v1610_v43 = vpop.permute.xlu2 %1609 }
 0x327   : > { %v1632_v19 = vperm.slane %v1610_v43, %v3239_v34 }
 0x32e   : > { %v1619_v41 = vpop.permute.xlu2 %1618 }
 0x32f   : > { %v1635_v9 = vperm.slane %v1619_v41, %v3239_v34 }
 0x336   : > { %v1625_v57 = vpop.permute.xlu2 %1624 }
 0x337   : > { %v1637_v20 = vperm.slane %v1625_v57, %v3239_v34 }
 0x33e   : > { %v1616_v18 = vpop.permute.xlu0 %1615  ;;  %v1631_v40 = vpop.permute.xlu2 %1630 }
 0x33f   : > { %v1613_v50 = vpop.permute.xlu1 %1612  ;;  %v1634_v10 = vperm.slane %v1616_v18, %v3239_v34  ;;  %v1639_v46 = vperm.slane %v1631_v40, %v3239_v34 }
 0x340   : > { %v1633_v47 = vperm.slane %v1613_v50, %v3239_v34 }
 0x342   : > { %v1640_v16 = vsel %vm1261_vm10, %v1633_v47, %v1632_v19 }
 0x343   : > { %v1641_v60 = vsel %vm1263_vm11, %v1634_v10, %v1640_v16 }
 0x344   : > { %v1642_v2 = vsel %vm1265_vm13, %v1635_v9, %v1641_v60 }
 0x346   : > { %v1628_v54 = vpop.permute.xlu0 %1627 }
 0x347   : > { %v1622_v31 = vpop.permute.xlu1 %1621  ;;  %v1638_v49 = vperm.slane %v1628_v54, %v3239_v34 }
 0x348   : > { %v1636_v59 = vperm.slane %v1622_v31, %v3239_v34 }
 0x34a   : > { %v1643_v62 = vsel %vm1267_vm14, %v1636_v59, %v1642_v2 }
 0x34b   : > { %v1644_v55 = vsel %vm1269_vm15, %v1637_v20, %v1643_v62 }
 0x34c   : > { %v1645_v44 = vsel %vm1271_vm0, %v1638_v49, %v1644_v55 }
 0x34d   : > { %v1646_v25 = vsel %vm1273_vm1, %v1639_v46, %v1645_v44 }
 0x34e   : > { %v1647_v35 = vpack.c.b16 %v1646_v25, %v1646_v25 }
 0x34f   : > { %v1507_v38 = vpop.permute.xlu1 %1506 }
 0x350   : > { %2162 = vst.msk [vmem:[%s3260_s22 + $0xc] sm:$0xf] %vm1277_vm8, %v1647_v35  ;;  %v1515_v36 = vperm.slane %v1507_v38, %v3239_v34 }
 0x352   : > { %v1522_v45 = vsel %vm1273_vm1, %v1515_v36, %v1521_v27 }
 0x353   : > { %v1523_v7 = vpack.c.b16 %v1522_v45, %v1522_v45 }
 0x355   : > { %2161 = vst.msk [vmem:[%s3260_s22 + $0x8] sm:$0xf] %vm1277_vm8, %v1523_v7 }
 0x356 PF: > { %s27_s17 = sadd.s32 1, %s2324_s17   ;;  %s3418_s15 = smov %s2320_s16 }
 0x357   : > { %p24_p5 = scmp.ge.s32.totalorder %s27_s17, 4   ;;  %s3419_s16 = smov %s3421_s4 }
 0x359   :  { %26 = sbr.rel (!%p24_p5) target bundleno = 3 (0x3), region = 126 }

// kernel: pet_body_forward.8
= control target key start
LH: loop header
LB: loop body
LE: loop exit
PB: predicated region body
PF: predicated region fallthrough
CT: control target
= control target key end

     0   :  { %s1916_s0 = inlined_call_operand.vmem [shape: bf16[2,12,32], index: 0, kind: input, shape index: {}]   ;;  %s1917_s1 = inlined_call_operand.vmem [shape: f32[2,1,12], index: 1, kind: input, shape index: {}]   ;;  %s1918_s2 = inlined_call_operand.vmem [shape: bf16[2,4,12,12], index: 2, kind: input, shape index: {}]   ;;  %s1919_s3 = inlined_call_operand.<no memory space> [shape: f32[1,1], index: 3, kind: input, shape index: {}]   ;;  %s1920_s6 = inlined_call_operand.vmem [shape: f32[1,32], index: 6, kind: input, shape index: {}]   ;;  %s1921_s7 = inlined_call_operand.vmem [shape: f32[1,32], index: 7, kind: input, shape index: {}]   ;;  %s1922_s8 = inlined_call_operand.vmem [shape: bf16[32,96], index: 8, kind: input, shape index: {}]   ;;  %s1923_s9 = inlined_call_operand.vmem [shape: f32[1,96], index: 9, kind: input, shape index: {}]   ;;  %s1924_s10 = inlined_call_operand.vmem [shape: bf16[32,32], index: 10, kind: input, shape index: {}]   ;;  %s1925_s11 = inlined_call_operand.vmem [shape: f32[1,32], index: 11, kind: input, shape index: {}]   ;;  %s1926_s12 = inlined_call_operand.vmem [shape: f32[1,32], index: 12, kind: input, shape index: {}]   ;;  %s1927_s13 = inlined_call_operand.vmem [shape: f32[1,32], index: 13, kind: input, shape index: {}]   ;;  %s1928_s14 = inlined_call_operand.vmem [shape: bf16[32,64], index: 14, kind: input, shape index: {}]   ;;  %s1929_s15 = inlined_call_operand.vmem [shape: f32[1,64], index: 15, kind: input, shape index: {}]   ;;  %s1930_s16 = inlined_call_operand.vmem [shape: f32[1,64], index: 16, kind: input, shape index: {}]   ;;  %s1931_s17 = inlined_call_operand.vmem [shape: f32[1,64], index: 17, kind: input, shape index: {}]   ;;  %s1932_s18 = inlined_call_operand.vmem [shape: bf16[64,32], index: 18, kind: input, shape index: {}]   ;;  %s1933_s19 = inlined_call_operand.vmem [shape: f32[1,32], index: 19, kind: input, shape index: {}]   ;;  %s1934_s20 = inlined_call_operand.vmem [shape: f32[1,32], index: 20, kind: input, shape index: {}]   ;;  %s1935_s21 = inlined_call_operand.vmem [shape: bf16[2,12,32], index: 21, kind: output, shape index: {}]   ;;  %s1936_s4 = inlined_call_operand.<no memory space> [shape: f32[1,1], index: 4, kind: input, shape index: {}]   ;;  %s1937_s5 = inlined_call_operand.<no memory space> [shape: f32[1,1], index: 5, kind: input, shape index: {}]  }
   0x1   :  { %1939 = sst [smem:[#allocation5_spill]] %s1916_s0  ;;  %v28_v1 = vstv %s1936_s4  ;;  %v30_v2 = vstv %s1937_s5  ;;  %s1725_s0 = smov 0  }
   0x2   :  { %1940 = sst [smem:[#allocation6_spill]] %s1917_s1  ;;  %29 = vst [vmem:[#allocation3] sm:$0x1] %v28_v1 }
   0x3   :  { %1941 = sst [smem:[#allocation7_spill]] %s1918_s2  ;;  %31 = vst [vmem:[#allocation4] sm:$0x1] %v30_v2 }
   0x4   :  { %1942 = sst [smem:[#allocation8_spill]] %s1919_s3 }
   0x5   :  { %1943 = sst [smem:[#allocation9_spill]] %s1920_s6 }
   0x6   :  { %1944 = sst [smem:[#allocation10_spill]] %s1921_s7 }
   0x7   :  { %s1945_s26 = sld [smem:[#allocation8_spill]] }
   0xd   :  { %v26_v0 = vstv %s1945_s26 }
   0xe   :  { %27 = vst [vmem:[#allocation2] sm:$0x1] %v26_v0 }
   0xf LB: > { %s1396_s6 = sadd.s32 4294967295, %s1589_s0   ;;  %p1400_p0 = scmp.ge.s32.totalorder %s1589_s0, 1  ;;  %s1589_s0 = sphi %s1725_s0, %s37_s0  }
  0x10   : > { %p611_p1 = scmp.lt.s32.totalorder %s1589_s0, 3 }
  0x12   : > { %p612_p2 = pnand %p1400_p0, %p611_p1 }
  0x13   : > { %p679_p3 = scmp.lt.s32.totalorder (!%p612_p2), %s1396_s6, 1  ;;  %s1946_s30 = sld [smem:[#allocation6_spill]] (!%p612_p2) }
  0x14   : > { %615 = sbr.rel (%p612_p2) target bundleno = 1612 (0x64c), region = 104  ;;  %s1947_s27 = sld [smem:[#allocation5_spill]] (!%p612_p2) }
  0x15   : > { %s1948_s4 = sld [smem:[#allocation9_spill]] (!%p612_p2)  ;;  %s1592_s25 = smov (!%p612_p2), 72  }
  0x16   : > { %s1949_s23 = sld [smem:[#allocation10_spill]] (!%p612_p2)  ;;  %s1593_s26 = smov (!%p612_p2), 88  }
  0x17   : > { %s1596_s28 = smov (!%p612_p2), 120   ;;  %s1597_s29 = smov (!%p612_p2), 80  }
  0x18   : > { %s1950_s1 = sld [smem:[#allocation7_spill]] (!%p612_p2) }
  0x19   : > { %v1520_v3 = vld [vmem:[#allocation2] ss:$0 sm:$0xff]  ;;  %v1591_v4 = vmov 0   ;;  %s1952_s6 = smov (!%p679_p3, %s1396_s6), 1  ;;  %v1471_v5 = vld [vmem:[%s1922_s8 + $0x8] sm:$0xff]  ;;  %vm747_vm0 = vcmask 261120  }
  0x1a   : > { %1503 = vset.pattern.permute.xlu0 %v1591_v4  ;;  %1519 = vset.pattern.permute.xlu1 %v1591_v4  ;;  %s686_s7 = scalar_lea.vmem %s1946_s30, %s1952_s6  ;;  %v1470_v6 = vld [vmem:[%s1922_s8] sm:$0xff]  ;;  %s1467_s2 = sshll.u32 %s1952_s6, 3  ;;  %vm773_vm1 = vcmask 64512   ;;  %vm799_vm2 = vcmask 97280   ;;  %vm803_vm3 = vcmask 93184   ;;  %vm829_vm4 = vcmask 1045504  }
  0x1b   : > { %707 = vperm.xlu0 %1503, %v1520_v3   ;;  %757 = vmatpush.bf16.msra.mxu0 %v1471_v5  ;;  %s683_s3 = scalar_lea.vmem %s1947_s27, %s1467_s2  ;;  %v1522_v14 = vld [vmem:[%s1948_s4] ss:$0 sm:$0xff]  ;;  %s1594_s27 = smov 96   ;;  %vm1101_vm5 = vcmask 130048   ;;  %vm1104_vm6 = vcmask 195584   ;;  %vm1286_vm7 = vcmask 523264  }
  0x1c   : > { %v698_v7 = vld [vmem:[%s683_s3] sm:$0xf]  ;;  %v699_v8 = vld [vmem:[%s683_s3 + $0x4] sm:$0x3]  ;;  %s1595_s3 = smov 104   ;;  %s1598_s4 = smov 112  }
  0x1d   : > { %v1751_v9 = vunpack.c.l.bf16 %v698_v7  ;;  %v1753_v10 = vunpack.c.l.bf16 %v699_v8  ;;  %v1523_v15 = vld [vmem:[%s1949_s23] ss:$0 sm:$0xff]  ;;  %s1468_s5 = sshll.u32 %s1952_s6, 5  ;;  %vm1316_vm8 = vcmask 257024   ;;  %vm1318_vm9 = vcmask 254976  }
  0x1e   : > { %v1524_v24 = vld [vmem:[%s1923_s9] ss:$0 sm:$0xff]  ;;  %s1789_s24 = scalar_lea.vmem %s1950_s1, %s1468_s5  ;;  %s1605_s5 = smov 24  }
  0x1f   : > { %758 = vmatpush.bf16.msra.mxu0 %v1470_v6  ;;  %v766_v40 = vld [vmem:[%s1789_s24] sm:$0xf]  ;;  %v767_v45 = vld [vmem:[%s1789_s24 + $0x4] sm:$0x3]  ;;  %v1422_v46 = vld [vmem:[%s1789_s24 + $0x10] sm:$0xf] }
  0x20   : > { %v768_v41 = vunpack.c.l.bf16 %v766_v40  ;;  %v1521_v42 = vld [vmem:[%s686_s7] ss:$0 sm:$0xff]  ;;  %v769_v50 = vunpack.c.l.bf16 %v767_v45  ;;  %v926_v51 = vunpack.c.l.bf16 %v1422_v46  ;;  %v1418_v52 = vld [vmem:[%s1789_s24 + $0x8] sm:$0xf]  ;;  %v1423_v58 = vld [vmem:[%s1789_s24 + $0x14] sm:$0x3] }
  0x21   : > { %v850_v55 = vunpack.c.l.bf16 %v1418_v52  ;;  %v927_v1 = vunpack.c.l.bf16 %v1423_v58  ;;  %v1419_v2 = vld [vmem:[%s1789_s24 + $0xc] sm:$0x3]  ;;  %s1599_s7 = smov 56  }
  0x22   : > { %v851_v4 = vunpack.c.l.bf16 %v1419_v2 }
  0x8d   : > { %v708_v11 = vpop.permute.xlu0 %707 }
  0x8e   : > { %v710_v12 = vmul.f32 %v708_v11, %v1751_v9  ;;  %v711_v13 = vmul.f32 %v708_v11, %v1753_v10 }
  0x90   : > { %1535 = vtanh.f32 %v710_v12 }
  0x91   : > { %1537 = vtanh.f32 %v711_v13 }
  0x96   : > { %v1536_v16 = vpop.eup %1535 }
  0x97   : > { %v1538_v17 = vpop.eup %1537  ;;  %v718_v18 = vmul.f32 %v1536_v16, %v1522_v14 }
  0x98   : > { %v719_v19 = vmul.f32 %v1538_v17, %v1522_v14  ;;  %v1426_v14 = vld [vmem:[%s1789_s24 + $0x18] sm:$0xf] }
  0x99   : > { %v724_v20 = vadd.f32 %v1523_v15, %v718_v18  ;;  %v1002_v16 = vunpack.c.l.bf16 %v1426_v14 }
  0x9a   : > { %v725_v21 = vadd.f32 %v1523_v15, %v719_v19  ;;  %v1427_v15 = vld [vmem:[%s1789_s24 + $0x1c] sm:$0x3] }
  0x9b   : > { %v1003_v18 = vunpack.c.l.bf16 %v1427_v15 }
  0x9c   : > { %v726_v22 = vpack.c.bf16 %v725_v21, %v724_v20 }
  0x9e   : > { %1415 = vmatmul.msk.bf16.vlgmr.msra.gmra.mxu0 %vm747_vm0, %v726_v22 }
 0x11b   : > { %v760_v23 = vpop.f32.mrf.mxu0 }
 0x11c   : > { %v761_v26 = vadd.f32 %v1524_v24, %v760_v23 }
 0x123   : > { %v762_v25 = vpop.f32.mrf.mxu0 }
 0x124   : > { %v763_v27 = vadd.f32 %v1524_v24, %v762_v25 }
 0x126   : > { %v1767_v28 = vpack.c.bf16 %v763_v27, %v761_v26 }
 0x128   : > { %1006 = vrot.lane.b32.xlu2 %v1767_v28, %s1592_s25  ;;  %854 = vrot.lane.b32.xlu1 %v1767_v28, %s1593_s26 }
 0x129   : > { %771 = vrot.lane.b32.xlu0 %v1767_v28, %s1594_s27  ;;  %s1600_s27 = smov 64  }
 0x130   : > { %1004 = vrot.lane.b32.xlu2 %v1767_v28, %s1595_s3  ;;  %852 = vrot.lane.b32.xlu1 %v1767_v28, %s1596_s28  ;;  %s1601_s3 = smov 40   ;;  %s1602_s28 = smov 48  }
 0x131   : > { %930 = vrot.lane.b32.xlu0 %v1767_v28, %s1597_s29  ;;  %s1603_s29 = smov 16  }
 0x138   : > { %928 = vrot.lane.b32.xlu1 %v1767_v28, %s1598_s4  ;;  %s1604_s4 = smov 8  }
 0x182   : > { %v1007_v29 = vpop.permute.xlu2 %1006 }
 0x183   : > { %v1012_v34 = vsel %vm773_vm1, %v1007_v29, 0 }
 0x18a   : > { %v1005_v39 = vpop.permute.xlu2 %1004 }
 0x19a   : > { %v855_v30 = vpop.permute.xlu1 %854 }
 0x19b   : > { %v772_v31 = vpop.permute.xlu0 %771  ;;  %v860_v32 = vsel %vm773_vm1, %v855_v30, 0 }
 0x19c   : > { %v778_v33 = vsel %vm773_vm1, %v772_v31, 0  ;;  %869 = vmatpush.bf16.xpose.msra.mxu3 %v860_v32 }
 0x19d   : > { %787 = vmatpush.bf16.xpose.msra.mxu1 %v778_v33 }
 0x1a2   : > { %v853_v35 = vpop.permute.xlu1 %852 }
 0x1a3   : > { %v931_v36 = vpop.permute.xlu0 %930  ;;  %1420 = vmatmul.msk.bf16.vlgmr.msra.gmra.mxu3 %vm773_vm1, %v853_v35 }
 0x1a4   : > { %1021 = vmatpush.bf16.xpose.msrb.mxu3 %v1012_v34  ;;  %1416 = vmatmul.msk.bf16.vlgmr.msra.gmra.mxu1 %vm773_vm1, %v1767_v28  ;;  %v936_v37 = vsel %vm773_vm1, %v931_v36, 0 }
 0x1a5   : > { %945 = vmatpush.bf16.xpose.msrb.mxu0 %v936_v37 }
 0x1aa   : > { %v929_v38 = vpop.permute.xlu1 %928 }
 0x1ac   : > { %1424 = vmatmul.msk.bf16.vlgmr.msrb.gmra.mxu0 %vm773_vm1, %v929_v38 }
 0x1b3   : > { %1428 = vmatmul.msk.bf16.vlgmr.msrb.gmra.mxu3 %vm773_vm1, %v1005_v39 }
 0x221   : > { %v789_v43 = vpop.f32.mrf.mxu1 }
 0x222   : > { %v790_v44 = vadd.f32 %v789_v43, %v768_v41 }
 0x224   : > { %v797_v47 = vadd.f32 %v1521_v42, %v790_v44 }
 0x226   : > { %v871_v48 = vpop.f32.mrf.mxu3  ;;  %v800_v49 = vsel %vm799_vm2, %v797_v47, -inf }
 0x227   : > { %801 = vmax.xlane.f32.xlu2 %v800_v49  ;;  %v872_v61 = vadd.f32 %v871_v48, %v850_v55 }
 0x229   : > { %v791_v53 = vpop.f32.mrf.mxu1  ;;  %v947_v54 = vpop.f32.mrf.mxu0  ;;  %v876_v6 = vadd.f32 %v1521_v42, %v872_v61 }
 0x22a   : > { %v792_v56 = vadd.f32 %v791_v53, %v769_v50  ;;  %v948_v57 = vadd.f32 %v947_v54, %v926_v51 }
 0x22b   : > { %v878_v13 = vsel %vm799_vm2, %v876_v6, -inf }
 0x22c   : > { %v798_v59 = vadd.f32 %v1521_v42, %v792_v56  ;;  %v952_v60 = vadd.f32 %v1521_v42, %v948_v57 }
 0x22e   : > { %v873_v62 = vpop.f32.mrf.mxu3  ;;  %v804_v63 = vsel %vm803_vm3, %v798_v59, -inf  ;;  %v954_v0 = vsel %vm799_vm2, %v952_v60, -inf }
 0x22f   : > { %805 = vmax.xlane.f32.xlu0 %v804_v63  ;;  %955 = vmax.xlane.f32.xlu1 %v954_v0  ;;  %v874_v8 = vadd.f32 %v873_v62, %v851_v4 }
 0x231   : > { %v949_v3 = vpop.f32.mrf.mxu0  ;;  %v877_v17 = vadd.f32 %v1521_v42, %v874_v8 }
 0x232   : > { %v950_v5 = vadd.f32 %v949_v3, %v927_v1 }
 0x233   : > { %v881_v21 = vsel %vm803_vm3, %v877_v17, -inf }
 0x234   : > { %v953_v7 = vadd.f32 %v1521_v42, %v950_v5 }
 0x236   : > { %v1023_v11 = vpop.f32.mrf.mxu3  ;;  %v957_v12 = vsel %vm803_vm3, %v953_v7, -inf }
 0x237   : > { %958 = vmax.xlane.f32.xlu2 %v957_v12  ;;  %879 = vmax.xlane.f32.xlu1 %v878_v13  ;;  %v1024_v19 = vadd.f32 %v1023_v11, %v1002_v16 }
 0x239   : > { %v1028_v24 = vadd.f32 %v1521_v42, %v1024_v19 }
 0x23b   : > { %v1030_v26 = vsel %vm799_vm2, %v1028_v24, -inf }
 0x23e   : > { %v1025_v20 = vpop.f32.mrf.mxu3 }
 0x23f   : > { %v1026_v22 = vadd.f32 %v1025_v20, %v1003_v18  ;;  %882 = vmax.xlane.f32.xlu2 %v881_v21 }
 0x241   : > { %v1029_v23 = vadd.f32 %v1521_v42, %v1026_v22 }
 0x243   : > { %v1033_v25 = vsel %vm803_vm3, %v1029_v23, -inf }
 0x244   : > { %1034 = vmax.xlane.f32.xlu0 %v1033_v25 }
 0x247   : > { %1031 = vmax.xlane.f32.xlu2 %v1030_v26 }
 0x258   : > { %901 = vrot.lane.b32.xlu0 %v1767_v28, %s1599_s7 }
 0x25f   : > { %824 = vrot.lane.b32.xlu2 %v1767_v28, %s1600_s27 }
 0x29a   : > { %v802_v27 = vpop.xlane.xlu2 %801 }
 0x29b   : > { %v807_v29 = vsub.f32 %v797_v47, %v802_v27 }
 0x29d   : > { %v809_v30 = vmul.f32 1.442695, %v807_v29 }
 0x29f   : > { %1539 = vpow2.f32 %v809_v30 }
 0x2a2   : > { %v956_v31 = vpop.xlane.xlu1 %955  ;;  %v806_v32 = vpop.xlane.xlu0 %805 }
 0x2a3   : > { %v960_v33 = vsub.f32 %v952_v60, %v956_v31  ;;  %v808_v34 = vsub.f32 %v798_v59, %v806_v32 }
 0x2a5   : > { %v1814_v35 = vpop.eup %1539  ;;  %v962_v36 = vmul.f32 1.442695, %v960_v33  ;;  %v811_v37 = vmul.f32 1.442695, %v808_v34 }
 0x2a6   : > { %v813_v38 = vsel %vm799_vm2, %v1814_v35, 0.0 }
 0x2a7   : > { %1541 = vpow2.f32 %v962_v36  ;;  %814 = vadd.xlane.f32.xlu0 %v813_v38 }
 0x2a8   : > { %1543 = vpow2.f32 %v811_v37 }
 0x2aa   : > { %v959_v39 = vpop.xlane.xlu2 %958  ;;  %v880_v40 = vpop.xlane.xlu1 %879 }
 0x2ab   : > { %v961_v41 = vsub.f32 %v953_v7, %v959_v39  ;;  %v884_v42 = vsub.f32 %v876_v6, %v880_v40 }
 0x2ad   : > { %v1818_v43 = vpop.eup %1541  ;;  %v964_v44 = vmul.f32 1.442695, %v961_v41  ;;  %v886_v45 = vmul.f32 1.442695, %v884_v42 }
 0x2ae   : > { %v1544_v46 = vpop.eup %1543  ;;  %v966_v47 = vsel %vm799_vm2, %v1818_v43, 0.0 }
 0x2af   : > { %1545 = vpow2.f32 %v964_v44  ;;  %967 = vadd.xlane.f32.xlu2 %v966_v47  ;;  %v816_v48 = vsel %vm803_vm3, %v1544_v46, 0.0 }
 0x2b0   : > { %1547 = vpow2.f32 %v886_v45  ;;  %817 = vadd.xlane.f32.xlu1 %v816_v48 }
 0x2b2   : > { %v883_v49 = vpop.xlane.xlu2 %882 }
 0x2b3   : > { %v885_v50 = vsub.f32 %v877_v17, %v883_v49 }
 0x2b5   : > { %v1823_v51 = vpop.eup %1545  ;;  %v888_v52 = vmul.f32 1.442695, %v885_v50 }
 0x2b6   : > { %v1548_v53 = vpop.eup %1547  ;;  %v969_v54 = vsel %vm803_vm3, %v1823_v51, 0.0 }
 0x2b7   : > { %1549 = vpow2.f32 %v888_v52  ;;  %v890_v55 = vsel %vm799_vm2, %v1548_v53, 0.0  ;;  %v1035_v57 = vpop.xlane.xlu0 %1034 }
 0x2b8   : > { %891 = vadd.xlane.f32.xlu0 %v890_v55  ;;  %970 = vadd.xlane.f32.xlu1 %v969_v54  ;;  %v1037_v61 = vsub.f32 %v1029_v23, %v1035_v57  ;;  %v1473_v54 = vld [vmem:[%s1924_s10 + $0x8] sm:$0xff]  ;;  %v1472_v55 = vld [vmem:[%s1924_s10] sm:$0xff] }
 0x2b9   : > { %1137 = vmatpush.bf16.msra.mxu0 %v1473_v54 }
 0x2ba   : > { %v1032_v56 = vpop.xlane.xlu2 %1031  ;;  %v1040_v63 = vmul.f32 1.442695, %v1037_v61 }
 0x2bb   : > { %v1036_v58 = vsub.f32 %v1028_v24, %v1032_v56  ;;  %v1526_v56 = vld [vmem:[#allocation3] ss:$0 sm:$0xff] }
 0x2bd   : > { %v1550_v59 = vpop.eup %1549  ;;  %v1038_v60 = vmul.f32 1.442695, %v1036_v58  ;;  %1138 = vmatpush.bf16.msra.mxu0 %v1472_v55 }
 0x2be   : > { %v893_v62 = vsel %vm803_vm3, %v1550_v59, 0.0 }
 0x2bf   : > { %1551 = vpow2.f32 %v1038_v60 }
 0x2c0   : > { %894 = vadd.xlane.f32.xlu1 %v893_v62  ;;  %1553 = vpow2.f32 %v1040_v63 }
 0x2c2   : > { %v825_v0 = vpop.permute.xlu2 %824 }
 0x2c3   : > { %v831_v1 = vsel %vm829_vm4, %v825_v0, 0 }
 0x2c4   : > { %840 = vmatpush.bf16.msra.mxu2 %v831_v1 }
 0x2c5   : > { %v1552_v2 = vpop.eup %1551 }
 0x2c6   : > { %v1042_v3 = vsel %vm799_vm2, %v1552_v2, 0.0  ;;  %v1554_v6 = vpop.eup %1553 }
 0x2c7   : > { %v1045_v7 = vsel %vm803_vm3, %v1554_v6, 0.0 }
 0x2c8   : > { %1043 = vadd.xlane.f32.xlu1 %v1042_v3 }
 0x2ca   : > { %v902_v4 = vpop.permute.xlu0 %901 }
 0x2cb   : > { %v907_v5 = vsel %vm829_vm4, %v902_v4, 0 }
 0x2cc   : > { %1053 = vrot.lane.b32.xlu0 %v1767_v28, %s1601_s3  ;;  %916 = vmatpush.bf16.msrb.mxu2 %v907_v5  ;;  %s696_s3 = scalar_lea.vmem %s1935_s21, %s1467_s2 }
 0x2d0   : > { %1046 = vadd.xlane.f32.xlu1 %v1045_v7 }
 0x2e9   : > { %977 = vrot.lane.b32.xlu1 %v1767_v28, %s1602_s28 }
 0x2f1   : > { %1151 = vperm.xlu1 %1519, %v1526_v56  }
 0x31a   : > { %v815_v8 = vpop.xlane.xlu0 %814 }
 0x31b   : > { %1555 = vrcp.f32 %v815_v8 }
 0x321   : > { %v1556_v12 = vpop.eup %1555 }
 0x322   : > { %v821_v15 = vmul.f32 %v1556_v12, %v1814_v35  ;;  %v968_v34 = vpop.xlane.xlu2 %967  ;;  %v1474_v12 = vld [vmem:[%s1928_s14] sm:$0xff] }
 0x323   : > { %v818_v11 = vpop.xlane.xlu1 %817 }
 0x324   : > { %1557 = vrcp.f32 %v818_v11  ;;  %v1475_v11 = vld [vmem:[%s1928_s14 + $0x8] sm:$0xff] }
 0x32a   : > { %v1558_v13 = vpop.eup %1557 }
 0x32b   : > { %v971_v14 = vpop.xlane.xlu1 %970  ;;  %v822_v16 = vmul.f32 %v1558_v13, %v1544_v46  ;;  %v892_v18 = vpop.xlane.xlu0 %891  ;;  %v1527_v13 = vld [vmem:[%s1925_s11] ss:$0 sm:$0xff] }
 0x32c   : > { %1559 = vrcp.f32 %v892_v18 }
 0x32d   : > { %v823_v17 = vpack.c.bf16 %v822_v16, %v821_v15 }
 0x32f   : > { %1417 = vmatmul.msk.bf16.vlgmr.msra.gmra.mxu2 %vm799_vm2, %v823_v17 }
 0x332   : > { %v1560_v20 = vpop.eup %1559 }
 0x333   : > { %v895_v19 = vpop.xlane.xlu1 %894  ;;  %v898_v28 = vmul.f32 %v1560_v20, %v1548_v53  ;;  %v1525_v53 = vld [vmem:[#allocation4] ss:$0 sm:$0xff] }
 0x334   : > { %1561 = vrcp.f32 %v895_v19 }
 0x33a   : > { %v1562_v21 = vpop.eup %1561 }
 0x33b   : > { %v899_v22 = vmul.f32 %v1562_v21, %v1550_v59  ;;  %v1044_v23 = vpop.xlane.xlu1 %1043 }
 0x33c   : > { %1563 = vrcp.f32 %v1044_v23 }
 0x33d   : > { %v900_v24 = vpack.c.bf16 %v899_v22, %v898_v28  ;;  %v1528_v22 = vld [vmem:[%s1926_s12] ss:$0 sm:$0xff] }
 0x33e   : > { %v1054_v25 = vpop.permute.xlu0 %1053 }
 0x33f   : > { %v1059_v26 = vsel %vm829_vm4, %v1054_v25, 0  ;;  %1421 = vmatmul.msk.bf16.vlgmr.msrb.gmra.mxu2 %vm799_vm2, %v900_v24  ;;  %v1529_v24 = vld [vmem:[%s1927_s13] ss:$0 sm:$0xff] }
 0x340   : > { %1068 = vmatpush.bf16.msra.mxu2 %v1059_v26 }
 0x342   : > { %v1564_v29 = vpop.eup %1563 }
 0x343   : > { %v1047_v27 = vpop.xlane.xlu1 %1046  ;;  %v1050_v31 = vmul.f32 %v1564_v29, %v1552_v2 }
 0x344   : > { %1565 = vrcp.f32 %v1047_v27 }
 0x345   : > { %1567 = vrcp.f32 %v971_v14 }
 0x346   : > { %1569 = vrcp.f32 %v968_v34 }
 0x34a   : > { %v1566_v30 = vpop.eup %1565 }
 0x34b   : > { %v1051_v32 = vmul.f32 %v1566_v30, %v1554_v6  ;;  %v1568_v35 = vpop.eup %1567 }
 0x34c   : > { %v1570_v36 = vpop.eup %1569  ;;  %v975_v37 = vmul.f32 %v1568_v35, %v1823_v51 }
 0x34d   : > { %v1052_v33 = vpack.c.bf16 %v1051_v32, %v1050_v31  ;;  %v974_v39 = vmul.f32 %v1570_v36, %v1818_v43  ;;  %v1530_v32 = vld [vmem:[%s1929_s15] ss:$0 sm:$0xff]  ;;  %v1478_v36 = vld [vmem:[%s1932_s18 + $0x10] sm:$0xff] }
 0x34f   : > { %1429 = vmatmul.msk.bf16.vlgmr.msra.gmra.mxu2 %vm799_vm2, %v1052_v33  ;;  %v976_v41 = vpack.c.bf16 %v975_v37, %v974_v39  ;;  %v1479_v33 = vld [vmem:[%s1932_s18 + $0x18] sm:$0xff]  ;;  %v1477_v39 = vld [vmem:[%s1932_s18 + $0x8] sm:$0xff] }
 0x350   : > { %1294 = vmatpush.bf16.msra.mxu3 %v1479_v33 }
 0x354   : > { %1295 = vmatpush.bf16.msra.mxu3 %v1478_v36 }
 0x358   : > { %1296 = vmatpush.bf16.msra.mxu3 %v1477_v39 }
 0x35b   : > { %v978_v38 = vpop.permute.xlu1 %977 }
 0x35c   : > { %v983_v40 = vsel %vm829_vm4, %v978_v38, 0 }
 0x35d   : > { %992 = vmatpush.bf16.msrb.mxu1 %v983_v40 }
 0x360   : > { %1425 = vmatmul.msk.bf16.vlgmr.msrb.gmra.mxu1 %vm799_vm2, %v976_v41 }
 0x361   : > { %1200 = vmatpush.bf16.msra.mxu1 %v1475_v11 }
 0x363   : > { %v1152_v17 = vpop.permute.xlu1 %1151 }
 0x365   : > { %1201 = vmatpush.bf16.msra.mxu1 %v1474_v12  ;;  %v1534_v12 = vld [vmem:[%s1934_s20] ss:$0 sm:$0xff] }
 0x3b2   : > { %v842_v42 = vpop.f32.mrf.mxu2 }
 0x3ba   : > { %v844_v44 = vpop.f32.mrf.mxu2 }
 0x3c2   : > { %v918_v45 = vpop.f32.mrf.mxu2 }
 0x3ca   : > { %v920_v47 = vpop.f32.mrf.mxu2 }
 0x3cb   : > { %v1509_v51 = vpack.i.bf16 %v920_v47, %v918_v45  ;;  %v1476_v45 = vld [vmem:[%s1932_s18] sm:$0xff] }
 0x3cc   : > { %1297 = vmatpush.bf16.msra.mxu3 %v1476_v45 }
 0x3d2   : > { %v1070_v50 = vpop.f32.mrf.mxu2 }
 0x3da   : > { %v1072_v43 = vpop.f32.mrf.mxu2 }
 0x3db   : > { %v1514_v52 = vpack.i.bf16 %v1072_v43, %v1070_v50 }
 0x3dd   : > { %v994_v46 = vpop.f32.mrf.mxu1 }
 0x3e5   : > { %v996_v48 = vpop.f32.mrf.mxu1 }
 0x3e6   : > { %v1504_v49 = vpack.i.bf16 %v996_v48, %v994_v46 }
 0x3e8   : > { %1505 = vrot.lane.b32.xlu0 %v1504_v49, %s1603_s29 }
 0x3f0   : > { %1510 = vrot.lane.b32.xlu0 %v1509_v51, %s1604_s4 }
 0x3f8   : > { %1515 = vrot.lane.b32.xlu0 %v1514_v52, %s1605_s5 }
 0x400   : > { %1230 = vperm.xlu0 %1503, %v1525_v53  }
 0x45a   : > { %v1506_v57 = vpop.permute.xlu0 %1505 }
 0x45b   : > { %v1508_v63 = vunpack.i.h.bf16 %v1506_v57  ;;  %v1507_v0 = vunpack.i.l.bf16 %v1506_v57 }
 0x462   : > { %v1511_v58 = vpop.permute.xlu0 %1510 }
 0x463   : > { %v1513_v59 = vunpack.i.h.bf16 %v1511_v58  ;;  %v1512_v60 = vunpack.i.l.bf16 %v1511_v58 }
 0x465   : > { %v1100_v61 = vsel %vm773_vm1, %v844_v44, %v1513_v59  ;;  %v1099_v62 = vsel %vm773_vm1, %v842_v42, %v1512_v60 }
 0x466   : > { %v1102_v4 = vsel %vm1101_vm5, %v1099_v62, %v1507_v0  ;;  %v1103_v5 = vsel %vm1101_vm5, %v1100_v61, %v1508_v63  ;;  %v1531_v62 = vld [vmem:[%s1930_s16] ss:$0 sm:$0xff] }
 0x46a   : > { %v1516_v1 = vpop.permute.xlu0 %1515 }
 0x46b   : > { %v1518_v2 = vunpack.i.h.bf16 %v1516_v1  ;;  %v1517_v3 = vunpack.i.l.bf16 %v1516_v1  ;;  %v1532_v1 = vld [vmem:[%s1931_s17] ss:$0 sm:$0xff] }
 0x46d   : > { %v1105_v6 = vsel %vm1104_vm6, %v1102_v4, %v1517_v3  ;;  %v1106_v7 = vsel %vm1104_vm6, %v1103_v5, %v1518_v2 }
 0x46e   : > { %v1107_v8 = vpack.c.bf16 %v1106_v7, %v1105_v6  ;;  %v1533_v7 = vld [vmem:[%s1933_s19] ss:$0 sm:$0xff] }
 0x470   : > { %1438 = vmatmul.msk.bf16.vlgmr.msra.gmra.mxu0 %vm747_vm0, %v1107_v8 }
 0x472   : > { %v1231_v55 = vpop.permute.xlu0 %1230 }
 0x4ed   : > { %v1140_v14 = vpop.f32.mrf.mxu0 }
 0x4ee   : > { %v1862_v15 = vadd.f32 %v1527_v13, %v1140_v14 }
 0x4f0   : > { %v1145_v16 = vadd.f32 %v1862_v15, %v1751_v9 }
 0x4f2   : > { %v1154_v18 = vmul.f32 %v1152_v17, %v1145_v16 }
 0x4f4   : > { %1571 = vtanh.f32 %v1154_v18 }
 0x4f5   : > { %v1142_v19 = vpop.f32.mrf.mxu0 }
 0x4f6   : > { %v1866_v20 = vadd.f32 %v1527_v13, %v1142_v19 }
 0x4f8   : > { %v1146_v21 = vadd.f32 %v1866_v20, %v1753_v10 }
 0x4fa   : > { %v1155_v28 = vmul.f32 %v1152_v17, %v1146_v21  ;;  %v1572_v23 = vpop.eup %1571 }
 0x4fb   : > { %v1162_v25 = vmul.f32 %v1572_v23, %v1528_v22 }
 0x4fc   : > { %1573 = vtanh.f32 %v1155_v28 }
 0x4fd   : > { %v1168_v29 = vadd.f32 %v1529_v24, %v1162_v25 }
 0x502   : > { %v1574_v26 = vpop.eup %1573 }
 0x503   : > { %v1163_v27 = vmul.f32 %v1574_v26, %v1528_v22 }
 0x505   : > { %v1169_v30 = vadd.f32 %v1529_v24, %v1163_v27 }
 0x507   : > { %v1170_v31 = vpack.c.bf16 %v1169_v30, %v1168_v29 }
 0x509   : > { %1447 = vmatmul.msk.bf16.vlgmr.msra.gmra.mxu1 %vm747_vm0, %v1170_v31 }
 0x586   : > { %v1203_v34 = vpop.f32.mrf.mxu1 }
 0x587   : > { %v1204_v35 = vadd.f32 %v1530_v32, %v1203_v34 }
 0x589   : > { %v1210_v37 = vmul.f32 0.044715, %v1204_v35  ;;  %v1208_v52 = vmul.f32 0.5, %v1204_v35 }
 0x58b   : > { %v1212_v38 = vmul.f32 %v1210_v37, %v1204_v35 }
 0x58d   : > { %v1214_v40 = vmul.f32 %v1212_v38, %v1204_v35 }
 0x58e   : > { %v1205_v41 = vpop.f32.mrf.mxu1 }
 0x58f   : > { %v1216_v42 = vadd.f32 %v1214_v40, %v1204_v35  ;;  %v1206_v44 = vadd.f32 %v1530_v32, %v1205_v41 }
 0x591   : > { %v1218_v46 = vmul.f32 0.7978846, %v1216_v42  ;;  %v1211_v47 = vmul.f32 0.044715, %v1206_v44  ;;  %v1209_v58 = vmul.f32 0.5, %v1206_v44 }
 0x593   : > { %1575 = vtanh.f32 %v1218_v46  ;;  %v1213_v48 = vmul.f32 %v1211_v47, %v1206_v44 }
 0x595   : > { %v1215_v49 = vmul.f32 %v1213_v48, %v1206_v44 }
 0x597   : > { %v1217_v50 = vadd.f32 %v1215_v49, %v1206_v44 }
 0x599   : > { %v1576_v51 = vpop.eup %1575  ;;  %v1219_v43 = vmul.f32 0.7978846, %v1217_v50 }
 0x59a   : > { %v1222_v53 = vadd.f32 1.0, %v1576_v51 }
 0x59b   : > { %1577 = vtanh.f32 %v1219_v43 }
 0x59c   : > { %v1224_v54 = vmul.f32 %v1222_v53, %v1208_v52 }
 0x59e   : > { %v1233_v56 = vmul.f32 %v1231_v55, %v1224_v54 }
 0x5a0   : > { %1579 = vtanh.f32 %v1233_v56 }
 0x5a1   : > { %v1578_v57 = vpop.eup %1577 }
 0x5a2   : > { %v1223_v59 = vadd.f32 1.0, %v1578_v57 }
 0x5a4   : > { %v1225_v60 = vmul.f32 %v1223_v59, %v1209_v58 }
 0x5a6   : > { %v1234_v61 = vmul.f32 %v1231_v55, %v1225_v60  ;;  %v1580_v63 = vpop.eup %1579 }
 0x5a7   : > { %v1241_v0 = vmul.f32 %v1580_v63, %v1531_v62 }
 0x5a8   : > { %1581 = vtanh.f32 %v1234_v61 }
 0x5a9   : > { %v1247_v4 = vadd.f32 %v1532_v1, %v1241_v0 }
 0x5ae   : > { %v1582_v2 = vpop.eup %1581 }
 0x5af   : > { %v1242_v3 = vmul.f32 %v1582_v2, %v1531_v62 }
 0x5b1   : > { %v1248_v5 = vadd.f32 %v1532_v1, %v1242_v3 }
 0x5b3   : > { %v1249_v6 = vpack.c.bf16 %v1248_v5, %v1247_v4 }
 0x5b5   : > { %1464 = vmatmul.msk.bf16.vlgmr.msra.gmra.mxu3 %vm1286_vm7, %v1249_v6 }
 0x638   : > { %v1299_v8 = vpop.f32.mrf.mxu3 }
 0x639   : > { %v1300_v11 = vadd.f32 %v1533_v7, %v1299_v8 }
 0x63b   : > { %v1305_v13 = vadd.f32 %v1300_v11, %v1862_v15 }
 0x63d   : > { %v1310_v14 = vmul.f32 %v1534_v12, %v1305_v13 }
 0x63f   : > { %v1312_v16 = vadd.f32 %v1310_v14, %v1751_v9 }
 0x640   : > { %v1301_v17 = vpop.f32.mrf.mxu3 }
 0x641   : > { %v1314_v18 = vpack.c.bf16 %v1312_v16, %v1312_v16  ;;  %v1302_v19 = vadd.f32 %v1533_v7, %v1301_v17 }
 0x643   : > { %1317 = vst.msk [vmem:[%s696_s3] sm:$0xf] %vm1316_vm8, %v1314_v18  ;;  %v1306_v21 = vadd.f32 %v1302_v19, %v1866_v20 }
 0x645   : > { %v1311_v28 = vmul.f32 %v1534_v12, %v1306_v21 }
 0x647   : > { %v1313_v22 = vadd.f32 %v1311_v28, %v1753_v10 }
 0x649   : > { %v1315_v15 = vpack.c.bf16 %v1313_v22, %v1313_v22 }
 0x64b   : > { %1319 = vst.msk [vmem:[%s696_s3 + $0x4] sm:$0x3] %vm1318_vm9, %v1315_v15 }
 0x64c PF: > { %s37_s0 = sadd.s32 1, %s1589_s0  }
 0x64d   : > { %p34_p4 = scmp.ge.s32.totalorder %s37_s0, 4  }
 0x64f   :  { %36 = sbr.rel (!%p34_p4) target bundleno = 15 (0xf), region = 143 }

</bundles_post_ra>
